<compile_context>
chip_gen: v7x
topology: tpu7x:2x2x1
jax: 0.10.0
libtpu: 0.0.40
codegen_flags: <defaults>
</compile_context>

<pallas_src>
import functools
from typing import Any, NamedTuple

import numpy as np
import jax
import jax.numpy as jnp
from jax import lax
from jax.experimental import pallas as pl
from jax.experimental.pallas import tpu as pltpu

# ------------------------------ configuration -------------------------------
IN_CH = 4              # input channels (e.g. RGB + NIR)
NUM_CLASSES = 3
HL_CH = 48             # high_level_ch of the (simplified) backbone
MID_CH = 64            # cfg.MODEL.OCR.MID_CHANNELS (small synthetic value)
KEY_CH = 32            # cfg.MODEL.OCR.KEY_CHANNELS (small synthetic value)
EMBED_DIV = 2
EMBED_CH = MID_CH // EMBED_DIV
PATCH_DIM = 4
EMB_PATCH_DIV = 1
NUM_HEADS = 4
HEAD_DIM = EMBED_CH // NUM_HEADS

LANE = 128             # lane-dense output width
DEF_TM = 256           # row tile for matmul kernels (fits v5e/v6e/v7x VMEM budgets)
VMEM_LIMIT = 32 * 1024 * 1024
_CP1 = pltpu.CompilerParams(dimension_semantics=("parallel",),
                            vmem_limit_bytes=VMEM_LIMIT)
_CP2 = pltpu.CompilerParams(dimension_semantics=("parallel", "parallel"),
                            vmem_limit_bytes=VMEM_LIMIT)


class ComposedOutput(NamedTuple):
    main: Any
    aux: Any


# ------------------------------ small helpers --------------------------------
def _round_up(x, m):
    return (x + m - 1) // m * m


def _pad_to(x, shape):
    pads = [(0, s - d) for d, s in zip(x.shape, shape)]
    if any(p[1] for p in pads):
        return jnp.pad(x, pads)
    return x


def _row_tile(m):
    return DEF_TM if m >= DEF_TM else _round_up(m, 8)


def _as_affine(p):
    """Return (w^T (Cin,Cout), scale (Cout,), bias (Cout,)) for conv1x1/linear params."""
    w = p['w']
    cout = w.shape[0]
    if 'scale' in p:
        return w.T, p['scale'], p['bias']
    return w.T, jnp.ones((cout,), jnp.float32), p['b']


# ------------------------------ Pallas kernels -------------------------------
def _mm_affine_kernel(a_ref, b_ref, s_ref, c_ref, o_ref, *, relu):
    acc = jnp.dot(a_ref[...], b_ref[...], preferred_element_type=jnp.float32)
    acc = acc * s_ref[...] + c_ref[...]
    if relu:
        acc = jnp.maximum(acc, 0.0)
    o_ref[...] = acc


def matmul_affine(a, b, scale=None, bias=None, relu=False):
    """o = act((a @ b) * scale + bias); row-tiled, bf16 MXU operands, f32 accumulation."""
    M, K = a.shape
    _, N = b.shape
    scale = jnp.ones((N,), jnp.float32) if scale is None else scale
    bias = jnp.zeros((N,), jnp.float32) if bias is None else bias
    Np = _round_up(N, LANE)
    TM = _row_tile(M)
    Mp = _round_up(M, TM)
    a_p = _pad_to(a.astype(jnp.bfloat16), (Mp, K))
    b_p = _pad_to(b.astype(jnp.bfloat16), (K, Np))
    s_p = _pad_to(scale.reshape(1, N).astype(jnp.float32), (1, Np))
    c_p = _pad_to(bias.reshape(1, N).astype(jnp.float32), (1, Np))
    out = pl.pallas_call(
        functools.partial(_mm_affine_kernel, relu=relu),
        out_shape=jax.ShapeDtypeStruct((Mp, Np), jnp.float32),
        grid=(Mp // TM,),
        in_specs=[pl.BlockSpec((TM, K), lambda i: (i, 0)),
                  pl.BlockSpec((K, Np), lambda i: (0, 0)),
                  pl.BlockSpec((1, Np), lambda i: (0, 0)),
                  pl.BlockSpec((1, Np), lambda i: (0, 0))],
        out_specs=pl.BlockSpec((TM, Np), lambda i: (i, 0)),
        compiler_params=_CP1,
    )(a_p, b_p, s_p, c_p)
    return out[:M, :N]


def _mm2_kernel(*refs, relu1, relu2, has_resid, return_first):
    idx = 0
    a_ref = refs[idx]; idx += 1
    w1_ref, s1_ref, c1_ref = refs[idx:idx + 3]; idx += 3
    w2_ref, s2_ref, c2_ref = refs[idx:idx + 3]; idx += 3
    r_ref = None
    if has_resid:
        r_ref = refs[idx]; idx += 1
    out_refs = refs[idx:]
    h = jnp.dot(a_ref[...], w1_ref[...], preferred_element_type=jnp.float32)
    h = h * s1_ref[...] + c1_ref[...]
    if relu1:
        h = jnp.maximum(h, 0.0)
    if has_resid:
        h = h + r_ref[...]
    y = jnp.dot(h.astype(jnp.bfloat16), w2_ref[...], preferred_element_type=jnp.float32)
    y = y * s2_ref[...] + c2_ref[...]
    if relu2:
        y = jnp.maximum(y, 0.0)
    if return_first:
        out_refs[0][...] = h
        out_refs[1][...] = y
    else:
        out_refs[0][...] = y


def fused_mm2(a, l1, l2, relu1=False, relu2=False, residual=None, return_first=False):
    """y = affine2(act(affine1(a) [+ residual])); both matmuls fused in one kernel."""
    w1, s1, b1 = _as_affine(l1)
    w2, s2, b2 = _as_affine(l2)
    M, K = a.shape
    N1, N2 = w1.shape[1], w2.shape[1]
    N1p, N2p = _round_up(N1, LANE), _round_up(N2, LANE)
    TM = _row_tile(M)
    Mp = _round_up(M, TM)
    inputs = [
        _pad_to(a.astype(jnp.bfloat16), (Mp, K)),
        _pad_to(w1.astype(jnp.bfloat16), (K, N1p)),
        _pad_to(s1.reshape(1, N1).astype(jnp.float32), (1, N1p)),
        _pad_to(b1.reshape(1, N1).astype(jnp.float32), (1, N1p)),
        _pad_to(w2.astype(jnp.bfloat16), (N1p, N2p)),
        _pad_to(s2.reshape(1, N2).astype(jnp.float32), (1, N2p)),
        _pad_to(b2.reshape(1, N2).astype(jnp.float32), (1, N2p)),
    ]
    in_specs = [pl.BlockSpec((TM, K), lambda i: (i, 0)),
                pl.BlockSpec((K, N1p), lambda i: (0, 0)),
                pl.BlockSpec((1, N1p), lambda i: (0, 0)),
                pl.BlockSpec((1, N1p), lambda i: (0, 0)),
                pl.BlockSpec((N1p, N2p), lambda i: (0, 0)),
                pl.BlockSpec((1, N2p), lambda i: (0, 0)),
                pl.BlockSpec((1, N2p), lambda i: (0, 0))]
    if residual is not None:
        inputs.append(_pad_to(residual.astype(jnp.float32), (Mp, N1p)))
        in_specs.append(pl.BlockSpec((TM, N1p), lambda i: (i, 0)))
    if return_first:
        out_shape = (jax.ShapeDtypeStruct((Mp, N1p), jnp.float32),
                     jax.ShapeDtypeStruct((Mp, N2p), jnp.float32))
        out_specs = (pl.BlockSpec((TM, N1p), lambda i: (i, 0)),
                     pl.BlockSpec((TM, N2p), lambda i: (i, 0)))
    else:
        out_shape = jax.ShapeDtypeStruct((Mp, N2p), jnp.float32)
        out_specs = pl.BlockSpec((TM, N2p), lambda i: (i, 0))
    out = pl.pallas_call(
        functools.partial(_mm2_kernel, relu1=relu1, relu2=relu2,
                          has_resid=residual is not None, return_first=return_first),
        out_shape=out_shape, grid=(Mp // TM,),
        in_specs=in_specs, out_specs=out_specs, compiler_params=_CP1,
    )(*inputs)
    if return_first:
        return out[0][:M, :N1], out[1][:M, :N2]
    return out[:M, :N2]


def _softmax_mm_kernel(l_ref, v_ref, o_ref):
    logits = l_ref[0]                                     # (K, hw)
    v = v_ref[0]                                          # (hw, C)
    m = jnp.max(logits, axis=-1, keepdims=True)
    p = jnp.exp(logits - m)
    p = p * pl.reciprocal(jnp.sum(p, axis=-1, keepdims=True), approx=True)
    o_ref[0] = jnp.dot(p.astype(v.dtype), v, preferred_element_type=jnp.float32)


def softmax_matmul(logits, v):
    """(B, M, L), (B, L, C) -> softmax(logits, -1) @ v.  SpatialGather hot path."""
    B, M, L = logits.shape
    _, _, C = v.shape
    return pl.pallas_call(
        _softmax_mm_kernel,
        out_shape=jax.ShapeDtypeStruct((B, M, C), jnp.float32),
        grid=(B,),
        in_specs=[pl.BlockSpec((1, M, L), lambda b: (b, 0, 0)),
                  pl.BlockSpec((1, L, C), lambda b: (b, 0, 0))],
        out_specs=pl.BlockSpec((1, M, C), lambda b: (b, 0, 0)),
        compiler_params=_CP1,
    )(logits.astype(jnp.float32), v.astype(jnp.bfloat16))


def _obj_attn_kernel(pix_ref, k_ref, v_ref,
                     wq1_ref, sq1_ref, cq1_ref,
                     wq2_ref, sq2_ref, cq2_ref,
                     wu_ref, su_ref, cu_ref, o_ref, *, scale):
    # fused f_pixel (2x conv-bn-relu) -> softmax(QK^T)V over L=num_classes -> f_up
    x = pix_ref[0]                                                     # (TQ, MID) bf16
    q = jnp.dot(x, wq1_ref[...], preferred_element_type=jnp.float32)
    q = jnp.maximum(q * sq1_ref[...] + cq1_ref[...], 0.0)
    q = jnp.dot(q.astype(jnp.bfloat16), wq2_ref[...], preferred_element_type=jnp.float32)
    q = jnp.maximum(q * sq2_ref[...] + cq2_ref[...], 0.0)              # (TQ, KEY)
    k = k_ref[0]                                                       # (L, KEY)  f32
    v = v_ref[0]                                                       # (L, KEY)  f32
    logits = lax.dot_general(q, k, (((1,), (1,)), ((), ())),
                             preferred_element_type=jnp.float32) * scale
    m = jnp.max(logits, axis=-1, keepdims=True)
    p = jnp.exp(logits - m)
    p = p * pl.reciprocal(jnp.sum(p, axis=-1, keepdims=True), approx=True)
    ctx = jnp.dot(p, v, preferred_element_type=jnp.float32)            # (TQ, KEY)
    up = jnp.dot(ctx.astype(jnp.bfloat16), wu_ref[...], preferred_element_type=jnp.float32)
    o_ref[0] = jnp.maximum(up * su_ref[...] + cu_ref[...], 0.0)        # (TQ, MID)


def object_attention(pix, kk, vv, fp1, fp2, fu, scale):
    """pix (N, hw, MID), kk/vv (N, L, KEY) -> (N, hw, MID)."""
    N, HW, C = pix.shape
    L, KEY = kk.shape[1], kk.shape[2]
    MIDc = fu['w'].shape[0]
    TQ = _row_tile(HW)
    HWp = _round_up(HW, TQ)
    pix_p = _pad_to(pix.astype(jnp.bfloat16), (N, HWp, C))
    w1, s1, b1 = _as_affine(fp1)
    w2, s2, b2 = _as_affine(fp2)
    wu, su, bu = _as_affine(fu)
    out = pl.pallas_call(
        functools.partial(_obj_attn_kernel, scale=scale),
        out_shape=jax.ShapeDtypeStruct((N, HWp, MIDc), jnp.float32),
        grid=(N, HWp // TQ),
        in_specs=[pl.BlockSpec((1, TQ, C), lambda b, t: (b, t, 0)),
                  pl.BlockSpec((1, L, KEY), lambda b, t: (b, 0, 0)),
                  pl.BlockSpec((1, L, KEY), lambda b, t: (b, 0, 0)),
                  pl.BlockSpec((C, KEY), lambda b, t: (0, 0)),
                  pl.BlockSpec((1, KEY), lambda b, t: (0, 0)),
                  pl.BlockSpec((1, KEY), lambda b, t: (0, 0)),
                  pl.BlockSpec((KEY, KEY), lambda b, t: (0, 0)),
                  pl.BlockSpec((1, KEY), lambda b, t: (0, 0)),
                  pl.BlockSpec((1, KEY), lambda b, t: (0, 0)),
                  pl.BlockSpec((KEY, MIDc), lambda b, t: (0, 0)),
                  pl.BlockSpec((1, MIDc), lambda b, t: (0, 0)),
                  pl.BlockSpec((1, MIDc), lambda b, t: (0, 0))],
        out_specs=pl.BlockSpec((1, TQ, MIDc), lambda b, t: (b, t, 0)),
        compiler_params=_CP2,
    )(pix_p, kk.astype(jnp.float32), vv.astype(jnp.float32),
      w1.astype(jnp.bfloat16), s1.reshape(1, -1).astype(jnp.float32),
      b1.reshape(1, -1).astype(jnp.float32),
      w2.astype(jnp.bfloat16), s2.reshape(1, -1).astype(jnp.float32),
      b2.reshape(1, -1).astype(jnp.float32),
      wu.astype(jnp.bfloat16), su.reshape(1, -1).astype(jnp.float32),
      bu.reshape(1, -1).astype(jnp.float32))
    return out[:, :HW, :]


def _mhsa_kernel(q_ref, k_ref, v_ref, o_ref, *, scale, num_heads):
    q_all = q_ref[0]                                  # (H, T, D) bf16
    k_all = k_ref[0]
    v_all = v_ref[0]
    for h in range(num_heads):                        # static unroll; all heads in one step
        q = q_all[h]
        k = k_all[h]
        v = v_all[h]
        logits = lax.dot_general(q, k, (((1,), (1,)), ((), ())),
                                 preferred_element_type=jnp.float32) * scale
        m = jnp.max(logits, axis=-1, keepdims=True)
        p = jnp.exp(logits - m)
        p = p * pl.reciprocal(jnp.sum(p, axis=-1, keepdims=True), approx=True)
        o_ref[0, h] = lax.dot_general(p.astype(v.dtype), v, (((1,), (0,)), ((), ())),
                                      preferred_element_type=jnp.float32)


def mhsa(q, k, v, scale):
    """(N, H, T, D) multi-head self-attention, one grid step per batch element."""
    N, H, T, D = q.shape
    return pl.pallas_call(
        functools.partial(_mhsa_kernel, scale=scale, num_heads=H),
        out_shape=jax.ShapeDtypeStruct((N, H, T, D), jnp.float32),
        grid=(N,),
        in_specs=[pl.BlockSpec((1, H, T, D), lambda b: (b, 0, 0, 0))] * 3,
        out_specs=pl.BlockSpec((1, H, T, D), lambda b: (b, 0, 0, 0)),
        compiler_params=_CP1,
    )(q.astype(jnp.bfloat16), k.astype(jnp.bfloat16), v.astype(jnp.bfloat16))


def _resize_kernel(x_ref, a_ref, bt_ref, o_ref):
    t = jnp.dot(a_ref[...], x_ref[0], preferred_element_type=jnp.float32)   # (Ho, W)
    o_ref[0] = jnp.dot(t, bt_ref[...], preferred_element_type=jnp.float32)  # (Ho, Wo)


def _bilinear_matrix(out_size, in_size):
    i = np.arange(out_size, dtype=np.float64)
    src = (i + 0.5) * in_size / out_size - 0.5
    src = np.clip(src, 0.0, in_size - 1)
    i0 = np.floor(src).astype(np.int64)
    i1 = np.minimum(i0 + 1, in_size - 1)
    w1 = src - i0
    w0 = 1.0 - w1
    M = np.zeros((out_size, in_size), np.float32)
    M[np.arange(out_size), i0] += w0
    M[np.arange(out_size), i1] += w1
    return jnp.asarray(M)


def scale_as(x, ref):
    """Bilinear (align_corners=False) resize of NCHW x to ref's spatial size: A @ x @ B^T."""
    N, C, H, W = x.shape
    Ho, Wo = ref.shape[2], ref.shape[3]
    if (Ho, Wo) == (H, W):
        return x
    A = _bilinear_matrix(Ho, H)              # (Ho, H)
    Bt = _bilinear_matrix(Wo, W).T           # (W, Wo)
    xf = x.reshape(N * C, H, W).astype(jnp.float32)
    out = pl.pallas_call(
        _resize_kernel,
        out_shape=jax.ShapeDtypeStruct((N * C, Ho, Wo), jnp.float32),
        grid=(N * C,),
        in_specs=[pl.BlockSpec((1, H, W), lambda i: (i, 0, 0)),
                  pl.BlockSpec((Ho, H), lambda i: (0, 0)),
                  pl.BlockSpec((W, Wo), lambda i: (0, 0))],
        out_specs=pl.BlockSpec((1, Ho, Wo), lambda i: (i, 0, 0)),
        compiler_params=_CP1,
    )(xf, A, Bt)
    return out.reshape(N, C, Ho, Wo)


# ------------------------------ conv glue (NHWC) ------------------------------
def conv2d_nhwc(x, cp, stride=1, pad=0, relu=False):
    """NHWC conv via channel-last im2col + the fused Pallas matmul/BN/ReLU kernel."""
    # TODO(synk): patch extraction is still XLA glue; an in-kernel halo'd BlockSpec would
    # remove the kh*kw x HBM inflation of the im2col buffer.
    N, H, W, C = x.shape
    w = cp['w']                               # (Cout, Cin, kh, kw)
    Cout, Cin, kh, kw = w.shape
    xp = jnp.pad(x, ((0, 0), (pad, pad), (pad, pad), (0, 0)))
    Hp, Wp = H + 2 * pad, W + 2 * pad
    Ho = (Hp - kh) // stride + 1
    Wo = (Wp - kw) // stride + 1
    cols = [xp[:, i:i + stride * Ho:stride, j:j + stride * Wo:stride, :]
            for i in range(kh) for j in range(kw)]
    patches = jnp.concatenate(cols, axis=-1)                       # (N, Ho, Wo, kh*kw*Cin)
    a = patches.reshape(N * Ho * Wo, kh * kw * Cin)
    b = w.transpose(2, 3, 1, 0).reshape(kh * kw * Cin, Cout)
    o = matmul_affine(a, b, cp['scale'], cp['bias'], relu=relu)
    return o.reshape(N, Ho, Wo, Cout)


# ------------------------------ parameters -----------------------------------
def _bn_fold(kg, kb, c, conv_bias, eps=1e-5):
    gamma = 1.0 + 0.1 * jax.random.normal(kg, (c,), jnp.float32)
    beta = 0.1 * jax.random.normal(kb, (c,), jnp.float32)
    mean = jnp.zeros((c,), jnp.float32)
    var = jnp.ones((c,), jnp.float32)
    s = gamma / jnp.sqrt(var + eps)
    return s, s * (conv_bias - mean) + beta


def make_conv(key, cout, cin, k, conv_bias=True, bn=True, std=0.05):
    ks = jax.random.split(key, 4)
    w = std * jax.random.normal(ks[0], (cout, cin, k, k), jnp.float32)
    b = std * jax.random.normal(ks[1], (cout,), jnp.float32) if conv_bias \
        else jnp.zeros((cout,), jnp.float32)
    if bn:
        s, bias = _bn_fold(ks[2], ks[3], cout, b)
    else:
        s, bias = jnp.ones((cout,), jnp.float32), b
    return {'w': w, 'scale': s, 'bias': bias}


def make_conv1x1(key, cout, cin, conv_bias=True, bn=True, std=0.05):
    p = make_conv(key, cout, cin, 1, conv_bias=conv_bias, bn=bn, std=std)
    return {'w': p['w'].reshape(cout, cin), 'scale': p['scale'], 'bias': p['bias']}


def make_linear(key, cout, cin, std=0.05):
    k1, k2 = jax.random.split(key)
    return {'w': std * jax.random.normal(k1, (cout, cin), jnp.float32),
            'b': std * jax.random.normal(k2, (cout,), jnp.float32)}


def init_params(key):
    ks = iter(jax.random.split(key, 20))
    p = {}
    # simplified backbone stem (stands in for the HRNetV2 trunk)
    p['stem1'] = make_conv(next(ks), 24, IN_CH, 3)
    p['stem2'] = make_conv(next(ks), HL_CH, 24, 3)
    # OCR_block
    p['ocr3'] = make_conv(next(ks), MID_CH, HL_CH, 3)                       # conv3x3_ocr + BNReLU
    p['aux1'] = make_conv1x1(next(ks), HL_CH, HL_CH)                        # aux_head[0] + BNReLU
    p['aux2'] = make_conv1x1(next(ks), NUM_CLASSES, HL_CH, bn=False)        # aux_head[2]
    p['fp1'] = make_conv1x1(next(ks), KEY_CH, MID_CH, conv_bias=False)      # f_pixel
    p['fp2'] = make_conv1x1(next(ks), KEY_CH, KEY_CH, conv_bias=False)
    p['fo1'] = make_conv1x1(next(ks), KEY_CH, MID_CH, conv_bias=False)      # f_object
    p['fo2'] = make_conv1x1(next(ks), KEY_CH, KEY_CH, conv_bias=False)
    p['fd'] = make_conv1x1(next(ks), KEY_CH, MID_CH, conv_bias=False)       # f_down
    p['fu'] = make_conv1x1(next(ks), MID_CH, KEY_CH, conv_bias=False)       # f_up
    p['cbd'] = make_conv1x1(next(ks), MID_CH, 2 * MID_CH, conv_bias=False)  # conv_bn_dropout
    p['cls'] = make_conv1x1(next(ks), NUM_CLASSES, MID_CH, bn=False)        # cls_head
    # WeedLayer
    ps = PATCH_DIM // EMB_PATCH_DIV
    p['pe'] = make_conv(next(ks), EMBED_CH, MID_CH, ps, bn=False)
    p['qkv'] = make_linear(next(ks), 3 * EMBED_CH, EMBED_CH)
    p['proj'] = make_linear(next(ks), EMBED_CH, EMBED_CH)
    p['head'] = make_linear(next(ks), NUM_CLASSES * ps * ps, EMBED_CH)
    return p


# ------------------------------ forward passes --------------------------------
def backbone_forward(p, x_nhwc):
    # TODO(synk): real HRNetV2 multi-branch backbone not replicated; replaced by a 2-conv
    # stride-2 stem producing high_level_ch features at 1/4 resolution (same interface).
    h = conv2d_nhwc(x_nhwc, p['stem1'], stride=2, pad=1, relu=True)
    h = conv2d_nhwc(h, p['stem2'], stride=2, pad=1, relu=True)
    return h                                                            # (N, H/4, W/4, HL)


def ocr_block_forward(p, hl):
    N, h, w, _ = hl.shape
    hw = h * w
    feats = conv2d_nhwc(hl, p['ocr3'], stride=1, pad=1, relu=True)      # (N, h, w, MID)

    # aux_head: fused conv1x1 + BNReLU + conv1x1 chain
    aux_flat = fused_mm2(hl.reshape(N * hw, HL_CH), p['aux1'], p['aux2'],
                         relu1=True, relu2=False)                       # (N*hw, K)
    aux_nhwc = aux_flat.reshape(N, h, w, NUM_CLASSES)

    # SpatialGather_Module: context = softmax_over_hw(aux) @ feats
    probs = aux_nhwc.reshape(N, hw, NUM_CLASSES).transpose(0, 2, 1)     # (N, K, hw)
    feats_flat = feats.reshape(N, hw, MID_CH)                           # (N, hw, MID)
    context = softmax_matmul(probs, feats_flat)                         # (N, K, MID)

    # ObjectAttentionBlock2D key / value projections (tiny: K=3 rows per batch)
    ctx2d = context.reshape(N * NUM_CLASSES, MID_CH)
    kk = fused_mm2(ctx2d, p['fo1'], p['fo2'], relu1=True, relu2=True)   # (N*K, KEY)
    vv = matmul_affine(ctx2d, p['fd']['w'].T, p['fd']['scale'], p['fd']['bias'], relu=True)
    kk = kk.reshape(N, NUM_CLASSES, KEY_CH)
    vv = vv.reshape(N, NUM_CLASSES, KEY_CH)

    # fused f_pixel -> attention(L=K) -> f_up over pixel tiles
    up = object_attention(feats_flat, kk, vv, p['fp1'], p['fp2'], p['fu'],
                          scale=KEY_CH ** -0.5)                          # (N, hw, MID)

    # SpatialOCR conv_bn_dropout fused with cls_head (Dropout2d identity in eval).
    cat = jnp.concatenate([up.reshape(N, h, w, MID_CH), feats], axis=-1)
    ocr_flat, cls_flat = fused_mm2(cat.reshape(N * hw, 2 * MID_CH), p['cbd'], p['cls'],
                                   relu1=True, relu2=False, return_first=True)
    ocr_feats = ocr_flat.reshape(N, h, w, MID_CH)                        # NHWC
    cls_out = cls_flat.reshape(N, h, w, NUM_CLASSES).transpose(0, 3, 1, 2)   # NCHW
    aux_out = aux_nhwc.transpose(0, 3, 1, 2)                                 # NCHW
    return cls_out, aux_out, ocr_feats


def weeder_forward(p, ocr_feats_nhwc, lres):
    # TODO(synk): wd.network.weeder.WeedLayer source was not provided; implemented as a
    # faithful-interface patch-embed + multi-head self-attention residual adjustment of lres.
    N, h, w, _ = ocr_feats_nhwc.shape
    ps = PATCH_DIM // EMB_PATCH_DIV
    tok = conv2d_nhwc(ocr_feats_nhwc, p['pe'], stride=ps, pad=0, relu=False)  # (N, gh, gw, E)
    gh, gw = tok.shape[1], tok.shape[2]
    T = gh * gw
    t2d = tok.reshape(N * T, EMBED_CH)
    qkv = matmul_affine(t2d, p['qkv']['w'].T, None, p['qkv']['b'])            # (N*T, 3E)
    qkv = qkv.reshape(N, T, 3, NUM_HEADS, HEAD_DIM).transpose(2, 0, 3, 1, 4)  # (3, N, H, T, D)
    att = mhsa(qkv[0], qkv[1], qkv[2], scale=HEAD_DIM ** -0.5)                # (N, H, T, D)
    att2d = att.transpose(0, 2, 1, 3).reshape(N * T, EMBED_CH)
    # fused: proj + residual, then classification head
    delta = fused_mm2(att2d, p['proj'], p['head'], relu1=False, relu2=False,
                      residual=t2d)                                           # (N*T, K*ps*ps)
    delta = delta.reshape(N, gh, gw, NUM_CLASSES, ps, ps)
    delta = delta.transpose(0, 3, 1, 4, 2, 5).reshape(N, NUM_CLASSES, gh * ps, gw * ps)
    return lres + delta


def hrnet_forward(p, x):
    x_nhwc = x.transpose(0, 2, 3, 1)          # single NCHW->NHWC permute at the boundary
    hl = backbone_forward(p, x_nhwc)
    cls_out, aux_out, ocr_feats = ocr_block_forward(p, hl)
    aux_out_hr = scale_as(aux_out, x)
    hi_res_cls_out = scale_as(cls_out, x)
    # ocr_output=True, lres_output=True, aux_output=True (HRNetWeeder reads key 'aux_out').
    aux_dict = {'aux_out': aux_out_hr, 'ocr': ocr_feats, 'lres': cls_out}
    return hi_res_cls_out, aux_dict


def hrnet_weeder_forward(p, x):
    probs, other = hrnet_forward(p, x)
    adjusted_probs = weeder_forward(p, other['ocr'], other['lres'])
    adjusted_probs_hr = scale_as(adjusted_probs, x)
    aux_output = {'aux_out': other['aux_out'], 'branch_out': probs}
    return ComposedOutput(adjusted_probs_hr, aux_output)


# ------------------------------ main -----------------------------------------
if __name__ == "__main__":
    key = jax.random.PRNGKey(0)
    pkey, xkey = jax.random.split(key)
    params = init_params(pkey)
    x = jax.random.normal(xkey, (2, IN_CH, 32, 32), jnp.float32)

    fwd = jax.jit(hrnet_weeder_forward)
    out = fwd(params, x)
    jax.block_until_ready(out)

    assert out.main.shape == (2, NUM_CLASSES, 32, 32)
    assert out.aux['branch_out'].shape == (2, NUM_CLASSES, 32, 32)
    assert out.aux['aux_out'].shape == (2, NUM_CLASSES, 32, 32)
    print("KERNEL_OK")
</pallas_src>

<mosaic_0001>
module attributes {stable_mosaic.version = 11 : i64} {
  func.func @_mm_affine_kernel(%arg0: i32, %arg1: memref<256x36xbf16, #tpu.memory_space<vmem>>, %arg2: memref<36x128xbf16, #tpu.memory_space<vmem>>, %arg3: memref<1x128xf32, #tpu.memory_space<vmem>>, %arg4: memref<1x128xf32, #tpu.memory_space<vmem>>, %arg5: memref<256x128xf32, #tpu.memory_space<vmem>>) attributes {dimension_semantics = [#tpu.dimension_semantics<parallel>], iteration_bounds = array<i64: 2>, scalar_prefetch = 0 : i64, scratch_operands = 0 : i64, tpu.core_type = #tpu.core_type<tc>, window_params = [{transform_indices = @transform_0, window_bounds = array<i64: 256, 36>}, {pipeline_mode = #tpu.pipeline_mode<synchronous>, transform_indices = @transform_1, window_bounds = array<i64: 36, 128>}, {pipeline_mode = #tpu.pipeline_mode<synchronous>, transform_indices = @transform_2, window_bounds = array<i64: 1, 128>}, {pipeline_mode = #tpu.pipeline_mode<synchronous>, transform_indices = @transform_3, window_bounds = array<i64: 1, 128>}, {transform_indices = @transform_4, window_bounds = array<i64: 256, 128>}]} {
    %c0 = arith.constant 0 : index
    %c0_0 = arith.constant 0 : index
    %0 = vector.load %arg1[%c0, %c0_0] : memref<256x36xbf16, #tpu.memory_space<vmem>>, vector<256x36xbf16>
    %c0_1 = arith.constant 0 : index
    %c0_2 = arith.constant 0 : index
    %1 = vector.load %arg2[%c0_1, %c0_2] : memref<36x128xbf16, #tpu.memory_space<vmem>>, vector<36x128xbf16>
    %cst = arith.constant dense<0.000000e+00> : vector<256x128xf32>
    %2 = tpu.matmul %0, %1, %cst {dimension_numbers = #tpu.dot_dimension_numbers<[1], [0], [0], [1], [0, 0, 1, 1], [], []>} : vector<256x36xbf16>, vector<36x128xbf16>, vector<256x128xf32> -> vector<256x128xf32>
    %c0_3 = arith.constant 0 : index
    %c0_4 = arith.constant 0 : index
    %3 = vector.load %arg3[%c0_3, %c0_4] : memref<1x128xf32, #tpu.memory_space<vmem>>, vector<1x128xf32>
    %4 = vector.broadcast %3 : vector<1x128xf32> to vector<256x128xf32>
    %5 = arith.mulf %2, %4 : vector<256x128xf32>
    %c0_5 = arith.constant 0 : index
    %c0_6 = arith.constant 0 : index
    %6 = vector.load %arg4[%c0_5, %c0_6] : memref<1x128xf32, #tpu.memory_space<vmem>>, vector<1x128xf32>
    %7 = vector.broadcast %6 : vector<1x128xf32> to vector<256x128xf32>
    %8 = arith.addf %5, %7 : vector<256x128xf32>
    %cst_7 = arith.constant 0.000000e+00 : f32
    %9 = vector.broadcast %cst_7 : f32 to vector<256x128xf32>
    %10 = arith.maximumf %8, %9 : vector<256x128xf32>
    %c0_8 = arith.constant 0 : index
    %c0_9 = arith.constant 0 : index
    %11 = vector.load %arg5[%c0_8, %c0_9] : memref<256x128xf32, #tpu.memory_space<vmem>>, vector<256x128xf32>
    tpu.vector_store %arg5[%c0_8, %c0_9], %10 {strides = array<i32>} : memref<256x128xf32, #tpu.memory_space<vmem>>, vector<256x128xf32>,
    return
  }
  func.func @transform_0(%arg0: i32) -> (i32, i32) {
    %c0_i32 = arith.constant 0 : i32
    %c0_i32_0 = arith.constant 0 : i32
    return %arg0, %c0_i32 : i32, i32
  }
  func.func @transform_1(%arg0: i32) -> (i32, i32) {
    %c0_i32 = arith.constant 0 : i32
    %c0_i32_0 = arith.constant 0 : i32
    %c0_i32_1 = arith.constant 0 : i32
    return %c0_i32, %c0_i32_0 : i32, i32
  }
  func.func @transform_2(%arg0: i32) -> (i32, i32) {
    %c0_i32 = arith.constant 0 : i32
    %c0_i32_0 = arith.constant 0 : i32
    %c0_i32_1 = arith.constant 0 : i32
    return %c0_i32, %c0_i32_0 : i32, i32
  }
  func.func @transform_3(%arg0: i32) -> (i32, i32) {
    %c0_i32 = arith.constant 0 : i32
    %c0_i32_0 = arith.constant 0 : i32
    %c0_i32_1 = arith.constant 0 : i32
    return %c0_i32, %c0_i32_0 : i32, i32
  }
  func.func @transform_4(%arg0: i32) -> (i32, i32) {
    %c0_i32 = arith.constant 0 : i32
    %c0_i32_0 = arith.constant 0 : i32
    return %arg0, %c0_i32 : i32, i32
  }
}

module attributes {stable_mosaic.version = 11 : i64} {
  func.func @_mm_affine_kernel(%arg0: i32, %arg1: memref<128x216xbf16, #tpu.memory_space<vmem>>, %arg2: memref<216x128xbf16, #tpu.memory_space<vmem>>, %arg3: memref<1x128xf32, #tpu.memory_space<vmem>>, %arg4: memref<1x128xf32, #tpu.memory_space<vmem>>, %arg5: memref<128x128xf32, #tpu.memory_space<vmem>>) attributes {dimension_semantics = [#tpu.dimension_semantics<parallel>], iteration_bounds = array<i64: 1>, scalar_prefetch = 0 : i64, scratch_operands = 0 : i64, tpu.core_type = #tpu.core_type<tc>, window_params = [{transform_indices = @transform_0, window_bounds = array<i64: 128, 216>}, {pipeline_mode = #tpu.pipeline_mode<synchronous>, transform_indices = @transform_1, window_bounds = array<i64: 216, 128>}, {pipeline_mode = #tpu.pipeline_mode<synchronous>, transform_indices = @transform_2, window_bounds = array<i64: 1, 128>}, {pipeline_mode = #tpu.pipeline_mode<synchronous>, transform_indices = @transform_3, window_bounds = array<i64: 1, 128>}, {transform_indices = @transform_4, window_bounds = array<i64: 128, 128>}]} {
    %c0 = arith.constant 0 : index
    %c0_0 = arith.constant 0 : index
    %0 = vector.load %arg1[%c0, %c0_0] : memref<128x216xbf16, #tpu.memory_space<vmem>>, vector<128x216xbf16>
    %c0_1 = arith.constant 0 : index
    %c0_2 = arith.constant 0 : index
    %1 = vector.load %arg2[%c0_1, %c0_2] : memref<216x128xbf16, #tpu.memory_space<vmem>>, vector<216x128xbf16>
    %cst = arith.constant dense<0.000000e+00> : vector<128x128xf32>
    %2 = tpu.matmul %0, %1, %cst {dimension_numbers = #tpu.dot_dimension_numbers<[1], [0], [0], [1], [0, 0, 1, 1], [], []>} : vector<128x216xbf16>, vector<216x128xbf16>, vector<128x128xf32> -> vector<128x128xf32>
    %c0_3 = arith.constant 0 : index
    %c0_4 = arith.constant 0 : index
    %3 = vector.load %arg3[%c0_3, %c0_4] : memref<1x128xf32, #tpu.memory_space<vmem>>, vector<1x128xf32>
    %4 = vector.broadcast %3 : vector<1x128xf32> to vector<128x128xf32>
    %5 = arith.mulf %2, %4 : vector<128x128xf32>
    %c0_5 = arith.constant 0 : index
    %c0_6 = arith.constant 0 : index
    %6 = vector.load %arg4[%c0_5, %c0_6] : memref<1x128xf32, #tpu.memory_space<vmem>>, vector<1x128xf32>
    %7 = vector.broadcast %6 : vector<1x128xf32> to vector<128x128xf32>
    %8 = arith.addf %5, %7 : vector<128x128xf32>
    %cst_7 = arith.constant 0.000000e+00 : f32
    %9 = vector.broadcast %cst_7 : f32 to vector<128x128xf32>
    %10 = arith.maximumf %8, %9 : vector<128x128xf32>
    %c0_8 = arith.constant 0 : index
    %c0_9 = arith.constant 0 : index
    %11 = vector.load %arg5[%c0_8, %c0_9] : memref<128x128xf32, #tpu.memory_space<vmem>>, vector<128x128xf32>
    tpu.vector_store %arg5[%c0_8, %c0_9], %10 {strides = array<i32>} : memref<128x128xf32, #tpu.memory_space<vmem>>, vector<128x128xf32>,
    return
  }
  func.func @transform_0(%arg0: i32) -> (i32, i32) {
    %c0_i32 = arith.constant 0 : i32
    %c0_i32_0 = arith.constant 0 : i32
    return %arg0, %c0_i32 : i32, i32
  }
  func.func @transform_1(%arg0: i32) -> (i32, i32) {
    %c0_i32 = arith.constant 0 : i32
    %c0_i32_0 = arith.constant 0 : i32
    %c0_i32_1 = arith.constant 0 : i32
    return %c0_i32, %c0_i32_0 : i32, i32
  }
  func.func @transform_2(%arg0: i32) -> (i32, i32) {
    %c0_i32 = arith.constant 0 : i32
    %c0_i32_0 = arith.constant 0 : i32
    %c0_i32_1 = arith.constant 0 : i32
    return %c0_i32, %c0_i32_0 : i32, i32
  }
  func.func @transform_3(%arg0: i32) -> (i32, i32) {
    %c0_i32 = arith.constant 0 : i32
    %c0_i32_0 = arith.constant 0 : i32
    %c0_i32_1 = arith.constant 0 : i32
    return %c0_i32, %c0_i32_0 : i32, i32
  }
  func.func @transform_4(%arg0: i32) -> (i32, i32) {
    %c0_i32 = arith.constant 0 : i32
    %c0_i32_0 = arith.constant 0 : i32
    return %arg0, %c0_i32 : i32, i32
  }
}

module attributes {stable_mosaic.version = 11 : i64} {
  func.func @_mm_affine_kernel(%arg0: i32, %arg1: memref<128x432xbf16, #tpu.memory_space<vmem>>, %arg2: memref<432x128xbf16, #tpu.memory_space<vmem>>, %arg3: memref<1x128xf32, #tpu.memory_space<vmem>>, %arg4: memref<1x128xf32, #tpu.memory_space<vmem>>, %arg5: memref<128x128xf32, #tpu.memory_space<vmem>>) attributes {dimension_semantics = [#tpu.dimension_semantics<parallel>], iteration_bounds = array<i64: 1>, scalar_prefetch = 0 : i64, scratch_operands = 0 : i64, tpu.core_type = #tpu.core_type<tc>, window_params = [{transform_indices = @transform_0, window_bounds = array<i64: 128, 432>}, {pipeline_mode = #tpu.pipeline_mode<synchronous>, transform_indices = @transform_1, window_bounds = array<i64: 432, 128>}, {pipeline_mode = #tpu.pipeline_mode<synchronous>, transform_indices = @transform_2, window_bounds = array<i64: 1, 128>}, {pipeline_mode = #tpu.pipeline_mode<synchronous>, transform_indices = @transform_3, window_bounds = array<i64: 1, 128>}, {transform_indices = @transform_4, window_bounds = array<i64: 128, 128>}]} {
    %c0 = arith.constant 0 : index
    %c0_0 = arith.constant 0 : index
    %0 = vector.load %arg1[%c0, %c0_0] : memref<128x432xbf16, #tpu.memory_space<vmem>>, vector<128x432xbf16>
    %c0_1 = arith.constant 0 : index
    %c0_2 = arith.constant 0 : index
    %1 = vector.load %arg2[%c0_1, %c0_2] : memref<432x128xbf16, #tpu.memory_space<vmem>>, vector<432x128xbf16>
    %cst = arith.constant dense<0.000000e+00> : vector<128x128xf32>
    %2 = tpu.matmul %0, %1, %cst {dimension_numbers = #tpu.dot_dimension_numbers<[1], [0], [0], [1], [0, 0, 1, 1], [], []>} : vector<128x432xbf16>, vector<432x128xbf16>, vector<128x128xf32> -> vector<128x128xf32>
    %c0_3 = arith.constant 0 : index
    %c0_4 = arith.constant 0 : index
    %3 = vector.load %arg3[%c0_3, %c0_4] : memref<1x128xf32, #tpu.memory_space<vmem>>, vector<1x128xf32>
    %4 = vector.broadcast %3 : vector<1x128xf32> to vector<128x128xf32>
    %5 = arith.mulf %2, %4 : vector<128x128xf32>
    %c0_5 = arith.constant 0 : index
    %c0_6 = arith.constant 0 : index
    %6 = vector.load %arg4[%c0_5, %c0_6] : memref<1x128xf32, #tpu.memory_space<vmem>>, vector<1x128xf32>
    %7 = vector.broadcast %6 : vector<1x128xf32> to vector<128x128xf32>
    %8 = arith.addf %5, %7 : vector<128x128xf32>
    %cst_7 = arith.constant 0.000000e+00 : f32
    %9 = vector.broadcast %cst_7 : f32 to vector<128x128xf32>
    %10 = arith.maximumf %8, %9 : vector<128x128xf32>
    %c0_8 = arith.constant 0 : index
    %c0_9 = arith.constant 0 : index
    %11 = vector.load %arg5[%c0_8, %c0_9] : memref<128x128xf32, #tpu.memory_space<vmem>>, vector<128x128xf32>
    tpu.vector_store %arg5[%c0_8, %c0_9], %10 {strides = array<i32>} : memref<128x128xf32, #tpu.memory_space<vmem>>, vector<128x128xf32>,
    return
  }
  func.func @transform_0(%arg0: i32) -> (i32, i32) {
    %c0_i32 = arith.constant 0 : i32
    %c0_i32_0 = arith.constant 0 : i32
    return %arg0, %c0_i32 : i32, i32
  }
  func.func @transform_1(%arg0: i32) -> (i32, i32) {
    %c0_i32 = arith.constant 0 : i32
    %c0_i32_0 = arith.constant 0 : i32
    %c0_i32_1 = arith.constant 0 : i32
    return %c0_i32, %c0_i32_0 : i32, i32
  }
  func.func @transform_2(%arg0: i32) -> (i32, i32) {
    %c0_i32 = arith.constant 0 : i32
    %c0_i32_0 = arith.constant 0 : i32
    %c0_i32_1 = arith.constant 0 : i32
    return %c0_i32, %c0_i32_0 : i32, i32
  }
  func.func @transform_3(%arg0: i32) -> (i32, i32) {
    %c0_i32 = arith.constant 0 : i32
    %c0_i32_0 = arith.constant 0 : i32
    %c0_i32_1 = arith.constant 0 : i32
    return %c0_i32, %c0_i32_0 : i32, i32
  }
  func.func @transform_4(%arg0: i32) -> (i32, i32) {
    %c0_i32 = arith.constant 0 : i32
    %c0_i32_0 = arith.constant 0 : i32
    return %arg0, %c0_i32 : i32, i32
  }
}

module attributes {stable_mosaic.version = 11 : i64} {
  func.func @_softmax_mm_kernel(%arg0: i32, %arg1: memref<1x3x64xf32, #tpu.memory_space<vmem>>, %arg2: memref<1x64x64xbf16, #tpu.memory_space<vmem>>, %arg3: memref<1x3x64xf32, #tpu.memory_space<vmem>>) attributes {dimension_semantics = [#tpu.dimension_semantics<parallel>], iteration_bounds = array<i64: 2>, scalar_prefetch = 0 : i64, scratch_operands = 0 : i64, tpu.core_type = #tpu.core_type<tc>, window_params = [{transform_indices = @transform_0, window_bounds = array<i64: 1, 3, 64>}, {transform_indices = @transform_1, window_bounds = array<i64: 1, 64, 64>}, {transform_indices = @transform_2, window_bounds = array<i64: 1, 3, 64>}]} {
    %c0 = arith.constant 0 : index
    %c0_0 = arith.constant 0 : index
    %c0_1 = arith.constant 0 : index
    %0 = vector.load %arg1[%c0, %c0_0, %c0_1] : memref<1x3x64xf32, #tpu.memory_space<vmem>>, vector<1x3x64xf32>
    %1 = vector.shape_cast %0 : vector<1x3x64xf32> to vector<3x64xf32>
    %c0_2 = arith.constant 0 : index
    %c0_3 = arith.constant 0 : index
    %c0_4 = arith.constant 0 : index
    %2 = vector.load %arg2[%c0_2, %c0_3, %c0_4] : memref<1x64x64xbf16, #tpu.memory_space<vmem>>, vector<1x64x64xbf16>
    %3 = vector.shape_cast %2 : vector<1x64x64xbf16> to vector<64x64xbf16>
    %cst = arith.constant dense<0xFF800000> : vector<3xf32>
    %4 = vector.multi_reduction <maximumf>, %1, %cst [1] : vector<3x64xf32> to vector<3xf32>
    %5 = vector.shape_cast %4 : vector<3xf32> to vector<3x1xf32>
    %6 = vector.broadcast %5 : vector<3x1xf32> to vector<3x64xf32>
    %7 = arith.subf %1, %6 : vector<3x64xf32>
    %8 = math.exp %7 : vector<3x64xf32>
    %cst_5 = arith.constant dense<0.000000e+00> : vector<3xf32>
    %9 = vector.multi_reduction <add>, %8, %cst_5 [1] : vector<3x64xf32> to vector<3xf32>
    %10 = vector.shape_cast %9 : vector<3xf32> to vector<3x1xf32>
    %11 = tpu.reciprocal %10 {approx = true} : vector<3x1xf32> -> vector<3x1xf32>
    %12 = vector.broadcast %11 : vector<3x1xf32> to vector<3x64xf32>
    %13 = arith.mulf %8, %12 : vector<3x64xf32>
    %14 = arith.truncf %13 : vector<3x64xf32> to vector<3x64xbf16>
    %cst_6 = arith.constant dense<0.000000e+00> : vector<3x64xf32>
    %15 = tpu.matmul %14, %3, %cst_6 {dimension_numbers = #tpu.dot_dimension_numbers<[1], [0], [0], [1], [0, 0, 1, 1], [], []>} : vector<3x64xbf16>, vector<64x64xbf16>, vector<3x64xf32> -> vector<3x64xf32>
    %c0_7 = arith.constant 0 : index
    %c0_8 = arith.constant 0 : index
    %c0_9 = arith.constant 0 : index
    %16 = vector.load %arg3[%c0_7, %c0_8, %c0_9] : memref<1x3x64xf32, #tpu.memory_space<vmem>>, vector<1x3x64xf32>
    %17 = vector.shape_cast %16 : vector<1x3x64xf32> to vector<3x64xf32>
    %18 = vector.shape_cast %15 : vector<3x64xf32> to vector<1x3x64xf32>
    tpu.vector_store %arg3[%c0_7, %c0_8, %c0_9], %18 {strides = array<i32>} : memref<1x3x64xf32, #tpu.memory_space<vmem>>, vector<1x3x64xf32>,
    return
  }
  func.func @transform_0(%arg0: i32) -> (i32, i32, i32) {
    %c0_i32 = arith.constant 0 : i32
    %c0_i32_0 = arith.constant 0 : i32
    %c0_i32_1 = arith.constant 0 : i32
    return %arg0, %c0_i32, %c0_i32_0 : i32, i32, i32
  }
  func.func @transform_1(%arg0: i32) -> (i32, i32, i32) {
    %c0_i32 = arith.constant 0 : i32
    %c0_i32_0 = arith.constant 0 : i32
    %c0_i32_1 = arith.constant 0 : i32
    return %arg0, %c0_i32, %c0_i32_0 : i32, i32, i32
  }
  func.func @transform_2(%arg0: i32) -> (i32, i32, i32) {
    %c0_i32 = arith.constant 0 : i32
    %c0_i32_0 = arith.constant 0 : i32
    %c0_i32_1 = arith.constant 0 : i32
    return %arg0, %c0_i32, %c0_i32_0 : i32, i32, i32
  }
}

module attributes {stable_mosaic.version = 11 : i64} {
  func.func @_mm2_kernel(%arg0: i32, %arg1: memref<128x48xbf16, #tpu.memory_space<vmem>>, %arg2: memref<48x128xbf16, #tpu.memory_space<vmem>>, %arg3: memref<1x128xf32, #tpu.memory_space<vmem>>, %arg4: memref<1x128xf32, #tpu.memory_space<vmem>>, %arg5: memref<128x128xbf16, #tpu.memory_space<vmem>>, %arg6: memref<1x128xf32, #tpu.memory_space<vmem>>, %arg7: memref<1x128xf32, #tpu.memory_space<vmem>>, %arg8: memref<128x128xf32, #tpu.memory_space<vmem>>) attributes {dimension_semantics = [#tpu.dimension_semantics<parallel>], iteration_bounds = array<i64: 1>, scalar_prefetch = 0 : i64, scratch_operands = 0 : i64, tpu.core_type = #tpu.core_type<tc>, window_params = [{transform_indices = @transform_0, window_bounds = array<i64: 128, 48>}, {pipeline_mode = #tpu.pipeline_mode<synchronous>, transform_indices = @transform_1, window_bounds = array<i64: 48, 128>}, {pipeline_mode = #tpu.pipeline_mode<synchronous>, transform_indices = @transform_2, window_bounds = array<i64: 1, 128>}, {pipeline_mode = #tpu.pipeline_mode<synchronous>, transform_indices = @transform_3, window_bounds = array<i64: 1, 128>}, {pipeline_mode = #tpu.pipeline_mode<synchronous>, transform_indices = @transform_4, window_bounds = array<i64: 128, 128>}, {pipeline_mode = #tpu.pipeline_mode<synchronous>, transform_indices = @transform_5, window_bounds = array<i64: 1, 128>}, {pipeline_mode = #tpu.pipeline_mode<synchronous>, transform_indices = @transform_6, window_bounds = array<i64: 1, 128>}, {transform_indices = @transform_7, window_bounds = array<i64: 128, 128>}]} {
    %c0 = arith.constant 0 : index
    %c0_0 = arith.constant 0 : index
    %0 = vector.load %arg1[%c0, %c0_0] : memref<128x48xbf16, #tpu.memory_space<vmem>>, vector<128x48xbf16>
    %c0_1 = arith.constant 0 : index
    %c0_2 = arith.constant 0 : index
    %1 = vector.load %arg2[%c0_1, %c0_2] : memref<48x128xbf16, #tpu.memory_space<vmem>>, vector<48x128xbf16>
    %cst = arith.constant dense<0.000000e+00> : vector<128x128xf32>
    %2 = tpu.matmul %0, %1, %cst {dimension_numbers = #tpu.dot_dimension_numbers<[1], [0], [0], [1], [0, 0, 1, 1], [], []>} : vector<128x48xbf16>, vector<48x128xbf16>, vector<128x128xf32> -> vector<128x128xf32>
    %c0_3 = arith.constant 0 : index
    %c0_4 = arith.constant 0 : index
    %3 = vector.load %arg3[%c0_3, %c0_4] : memref<1x128xf32, #tpu.memory_space<vmem>>, vector<1x128xf32>
    %4 = vector.broadcast %3 : vector<1x128xf32> to vector<128x128xf32>
    %5 = arith.mulf %2, %4 : vector<128x128xf32>
    %c0_5 = arith.constant 0 : index
    %c0_6 = arith.constant 0 : index
    %6 = vector.load %arg4[%c0_5, %c0_6] : memref<1x128xf32, #tpu.memory_space<vmem>>, vector<1x128xf32>
    %7 = vector.broadcast %6 : vector<1x128xf32> to vector<128x128xf32>
    %8 = arith.addf %5, %7 : vector<128x128xf32>
    %cst_7 = arith.constant 0.000000e+00 : f32
    %9 = vector.broadcast %cst_7 : f32 to vector<128x128xf32>
    %10 = arith.maximumf %8, %9 : vector<128x128xf32>
    %11 = arith.truncf %10 : vector<128x128xf32> to vector<128x128xbf16>
    %c0_8 = arith.constant 0 : index
    %c0_9 = arith.constant 0 : index
    %12 = vector.load %arg5[%c0_8, %c0_9] : memref<128x128xbf16, #tpu.memory_space<vmem>>, vector<128x128xbf16>
    %cst_10 = arith.constant dense<0.000000e+00> : vector<128x128xf32>
    %13 = tpu.matmul %11, %12, %cst_10 {dimension_numbers = #tpu.dot_dimension_numbers<[1], [0], [0], [1], [0, 0, 1, 1], [], []>} : vector<128x128xbf16>, vector<128x128xbf16>, vector<128x128xf32> -> vector<128x128xf32>
    %c0_11 = arith.constant 0 : index
    %c0_12 = arith.constant 0 : index
    %14 = vector.load %arg6[%c0_11, %c0_12] : memref<1x128xf32, #tpu.memory_space<vmem>>, vector<1x128xf32>
    %15 = vector.broadcast %14 : vector<1x128xf32> to vector<128x128xf32>
    %16 = arith.mulf %13, %15 : vector<128x128xf32>
    %c0_13 = arith.constant 0 : index
    %c0_14 = arith.constant 0 : index
    %17 = vector.load %arg7[%c0_13, %c0_14] : memref<1x128xf32, #tpu.memory_space<vmem>>, vector<1x128xf32>
    %18 = vector.broadcast %17 : vector<1x128xf32> to vector<128x128xf32>
    %19 = arith.addf %16, %18 : vector<128x128xf32>
    %c0_15 = arith.constant 0 : index
    %c0_16 = arith.constant 0 : index
    %20 = vector.load %arg8[%c0_15, %c0_16] : memref<128x128xf32, #tpu.memory_space<vmem>>, vector<128x128xf32>
    tpu.vector_store %arg8[%c0_15, %c0_16], %19 {strides = array<i32>} : memref<128x128xf32, #tpu.memory_space<vmem>>, vector<128x128xf32>,
    return
  }
  func.func @transform_0(%arg0: i32) -> (i32, i32) {
    %c0_i32 = arith.constant 0 : i32
    %c0_i32_0 = arith.constant 0 : i32
    return %arg0, %c0_i32 : i32, i32
  }
  func.func @transform_1(%arg0: i32) -> (i32, i32) {
    %c0_i32 = arith.constant 0 : i32
    %c0_i32_0 = arith.constant 0 : i32
    %c0_i32_1 = arith.constant 0 : i32
    return %c0_i32, %c0_i32_0 : i32, i32
  }
  func.func @transform_2(%arg0: i32) -> (i32, i32) {
    %c0_i32 = arith.constant 0 : i32
    %c0_i32_0 = arith.constant 0 : i32
    %c0_i32_1 = arith.constant 0 : i32
    return %c0_i32, %c0_i32_0 : i32, i32
  }
  func.func @transform_3(%arg0: i32) -> (i32, i32) {
    %c0_i32 = arith.constant 0 : i32
    %c0_i32_0 = arith.constant 0 : i32
    %c0_i32_1 = arith.constant 0 : i32
    return %c0_i32, %c0_i32_0 : i32, i32
  }
  func.func @transform_4(%arg0: i32) -> (i32, i32) {
    %c0_i32 = arith.constant 0 : i32
    %c0_i32_0 = arith.constant 0 : i32
    %c0_i32_1 = arith.constant 0 : i32
    return %c0_i32, %c0_i32_0 : i32, i32
  }
  func.func @transform_5(%arg0: i32) -> (i32, i32) {
    %c0_i32 = arith.constant 0 : i32
    %c0_i32_0 = arith.constant 0 : i32
    %c0_i32_1 = arith.constant 0 : i32
    return %c0_i32, %c0_i32_0 : i32, i32
  }
  func.func @transform_6(%arg0: i32) -> (i32, i32) {
    %c0_i32 = arith.constant 0 : i32
    %c0_i32_0 = arith.constant 0 : i32
    %c0_i32_1 = arith.constant 0 : i32
    return %c0_i32, %c0_i32_0 : i32, i32
  }
  func.func @transform_7(%arg0: i32) -> (i32, i32) {
    %c0_i32 = arith.constant 0 : i32
    %c0_i32_0 = arith.constant 0 : i32
    return %arg0, %c0_i32 : i32, i32
  }
}

module attributes {stable_mosaic.version = 11 : i64} {
  func.func @_mm2_kernel(%arg0: i32, %arg1: memref<8x64xbf16, #tpu.memory_space<vmem>>, %arg2: memref<64x128xbf16, #tpu.memory_space<vmem>>, %arg3: memref<1x128xf32, #tpu.memory_space<vmem>>, %arg4: memref<1x128xf32, #tpu.memory_space<vmem>>, %arg5: memref<128x128xbf16, #tpu.memory_space<vmem>>, %arg6: memref<1x128xf32, #tpu.memory_space<vmem>>, %arg7: memref<1x128xf32, #tpu.memory_space<vmem>>, %arg8: memref<8x128xf32, #tpu.memory_space<vmem>>) attributes {dimension_semantics = [#tpu.dimension_semantics<parallel>], iteration_bounds = array<i64: 1>, scalar_prefetch = 0 : i64, scratch_operands = 0 : i64, tpu.core_type = #tpu.core_type<tc>, window_params = [{transform_indices = @transform_0, window_bounds = array<i64: 8, 64>}, {pipeline_mode = #tpu.pipeline_mode<synchronous>, transform_indices = @transform_1, window_bounds = array<i64: 64, 128>}, {pipeline_mode = #tpu.pipeline_mode<synchronous>, transform_indices = @transform_2, window_bounds = array<i64: 1, 128>}, {pipeline_mode = #tpu.pipeline_mode<synchronous>, transform_indices = @transform_3, window_bounds = array<i64: 1, 128>}, {pipeline_mode = #tpu.pipeline_mode<synchronous>, transform_indices = @transform_4, window_bounds = array<i64: 128, 128>}, {pipeline_mode = #tpu.pipeline_mode<synchronous>, transform_indices = @transform_5, window_bounds = array<i64: 1, 128>}, {pipeline_mode = #tpu.pipeline_mode<synchronous>, transform_indices = @transform_6, window_bounds = array<i64: 1, 128>}, {transform_indices = @transform_7, window_bounds = array<i64: 8, 128>}]} {
    %c0 = arith.constant 0 : index
    %c0_0 = arith.constant 0 : index
    %0 = vector.load %arg1[%c0, %c0_0] : memref<8x64xbf16, #tpu.memory_space<vmem>>, vector<8x64xbf16>
    %c0_1 = arith.constant 0 : index
    %c0_2 = arith.constant 0 : index
    %1 = vector.load %arg2[%c0_1, %c0_2] : memref<64x128xbf16, #tpu.memory_space<vmem>>, vector<64x128xbf16>
    %cst = arith.constant dense<0.000000e+00> : vector<8x128xf32>
    %2 = tpu.matmul %0, %1, %cst {dimension_numbers = #tpu.dot_dimension_numbers<[1], [0], [0], [1], [0, 0, 1, 1], [], []>} : vector<8x64xbf16>, vector<64x128xbf16>, vector<8x128xf32> -> vector<8x128xf32>
    %c0_3 = arith.constant 0 : index
    %c0_4 = arith.constant 0 : index
    %3 = vector.load %arg3[%c0_3, %c0_4] : memref<1x128xf32, #tpu.memory_space<vmem>>, vector<1x128xf32>
    %4 = vector.broadcast %3 : vector<1x128xf32> to vector<8x128xf32>
    %5 = arith.mulf %2, %4 : vector<8x128xf32>
    %c0_5 = arith.constant 0 : index
    %c0_6 = arith.constant 0 : index
    %6 = vector.load %arg4[%c0_5, %c0_6] : memref<1x128xf32, #tpu.memory_space<vmem>>, vector<1x128xf32>
    %7 = vector.broadcast %6 : vector<1x128xf32> to vector<8x128xf32>
    %8 = arith.addf %5, %7 : vector<8x128xf32>
    %cst_7 = arith.constant 0.000000e+00 : f32
    %9 = vector.broadcast %cst_7 : f32 to vector<8x128xf32>
    %10 = arith.maximumf %8, %9 : vector<8x128xf32>
    %11 = arith.truncf %10 : vector<8x128xf32> to vector<8x128xbf16>
    %c0_8 = arith.constant 0 : index
    %c0_9 = arith.constant 0 : index
    %12 = vector.load %arg5[%c0_8, %c0_9] : memref<128x128xbf16, #tpu.memory_space<vmem>>, vector<128x128xbf16>
    %cst_10 = arith.constant dense<0.000000e+00> : vector<8x128xf32>
    %13 = tpu.matmul %11, %12, %cst_10 {dimension_numbers = #tpu.dot_dimension_numbers<[1], [0], [0], [1], [0, 0, 1, 1], [], []>} : vector<8x128xbf16>, vector<128x128xbf16>, vector<8x128xf32> -> vector<8x128xf32>
    %c0_11 = arith.constant 0 : index
    %c0_12 = arith.constant 0 : index
    %14 = vector.load %arg6[%c0_11, %c0_12] : memref<1x128xf32, #tpu.memory_space<vmem>>, vector<1x128xf32>
    %15 = vector.broadcast %14 : vector<1x128xf32> to vector<8x128xf32>
    %16 = arith.mulf %13, %15 : vector<8x128xf32>
    %c0_13 = arith.constant 0 : index
    %c0_14 = arith.constant 0 : index
    %17 = vector.load %arg7[%c0_13, %c0_14] : memref<1x128xf32, #tpu.memory_space<vmem>>, vector<1x128xf32>
    %18 = vector.broadcast %17 : vector<1x128xf32> to vector<8x128xf32>
    %19 = arith.addf %16, %18 : vector<8x128xf32>
    %cst_15 = arith.constant 0.000000e+00 : f32
    %20 = vector.broadcast %cst_15 : f32 to vector<8x128xf32>
    %21 = arith.maximumf %19, %20 : vector<8x128xf32>
    %c0_16 = arith.constant 0 : index
    %c0_17 = arith.constant 0 : index
    %22 = vector.load %arg8[%c0_16, %c0_17] : memref<8x128xf32, #tpu.memory_space<vmem>>, vector<8x128xf32>
    tpu.vector_store %arg8[%c0_16, %c0_17], %21 {strides = array<i32>} : memref<8x128xf32, #tpu.memory_space<vmem>>, vector<8x128xf32>,
    return
  }
  func.func @transform_0(%arg0: i32) -> (i32, i32) {
    %c0_i32 = arith.constant 0 : i32
    %c0_i32_0 = arith.constant 0 : i32
    return %arg0, %c0_i32 : i32, i32
  }
  func.func @transform_1(%arg0: i32) -> (i32, i32) {
    %c0_i32 = arith.constant 0 : i32
    %c0_i32_0 = arith.constant 0 : i32
    %c0_i32_1 = arith.constant 0 : i32
    return %c0_i32, %c0_i32_0 : i32, i32
  }
  func.func @transform_2(%arg0: i32) -> (i32, i32) {
    %c0_i32 = arith.constant 0 : i32
    %c0_i32_0 = arith.constant 0 : i32
    %c0_i32_1 = arith.constant 0 : i32
    return %c0_i32, %c0_i32_0 : i32, i32
  }
  func.func @transform_3(%arg0: i32) -> (i32, i32) {
    %c0_i32 = arith.constant 0 : i32
    %c0_i32_0 = arith.constant 0 : i32
    %c0_i32_1 = arith.constant 0 : i32
    return %c0_i32, %c0_i32_0 : i32, i32
  }
  func.func @transform_4(%arg0: i32) -> (i32, i32) {
    %c0_i32 = arith.constant 0 : i32
    %c0_i32_0 = arith.constant 0 : i32
    %c0_i32_1 = arith.constant 0 : i32
    return %c0_i32, %c0_i32_0 : i32, i32
  }
  func.func @transform_5(%arg0: i32) -> (i32, i32) {
    %c0_i32 = arith.constant 0 : i32
    %c0_i32_0 = arith.constant 0 : i32
    %c0_i32_1 = arith.constant 0 : i32
    return %c0_i32, %c0_i32_0 : i32, i32
  }
  func.func @transform_6(%arg0: i32) -> (i32, i32) {
    %c0_i32 = arith.constant 0 : i32
    %c0_i32_0 = arith.constant 0 : i32
    %c0_i32_1 = arith.constant 0 : i32
    return %c0_i32, %c0_i32_0 : i32, i32
  }
  func.func @transform_7(%arg0: i32) -> (i32, i32) {
    %c0_i32 = arith.constant 0 : i32
    %c0_i32_0 = arith.constant 0 : i32
    return %arg0, %c0_i32 : i32, i32
  }
}

module attributes {stable_mosaic.version = 11 : i64} {
  func.func @_obj_attn_kernel(%arg0: i32, %arg1: i32, %arg2: memref<1x64x64xbf16, #tpu.memory_space<vmem>>, %arg3: memref<1x3x32xf32, #tpu.memory_space<vmem>>, %arg4: memref<1x3x32xf32, #tpu.memory_space<vmem>>, %arg5: memref<64x32xbf16, #tpu.memory_space<vmem>>, %arg6: memref<1x32xf32, #tpu.memory_space<vmem>>, %arg7: memref<1x32xf32, #tpu.memory_space<vmem>>, %arg8: memref<32x32xbf16, #tpu.memory_space<vmem>>, %arg9: memref<1x32xf32, #tpu.memory_space<vmem>>, %arg10: memref<1x32xf32, #tpu.memory_space<vmem>>, %arg11: memref<32x64xbf16, #tpu.memory_space<vmem>>, %arg12: memref<1x64xf32, #tpu.memory_space<vmem>>, %arg13: memref<1x64xf32, #tpu.memory_space<vmem>>, %arg14: memref<1x64x64xf32, #tpu.memory_space<vmem>>) attributes {dimension_semantics = [#tpu.dimension_semantics<parallel>, #tpu.dimension_semantics<parallel>], iteration_bounds = array<i64: 2, 1>, scalar_prefetch = 0 : i64, scratch_operands = 0 : i64, tpu.core_type = #tpu.core_type<tc>, window_params = [{transform_indices = @transform_0, window_bounds = array<i64: 1, 64, 64>}, {transform_indices = @transform_1, window_bounds = array<i64: 1, 3, 32>}, {transform_indices = @transform_2, window_bounds = array<i64: 1, 3, 32>}, {pipeline_mode = #tpu.pipeline_mode<synchronous>, transform_indices = @transform_3, window_bounds = array<i64: 64, 32>}, {pipeline_mode = #tpu.pipeline_mode<synchronous>, transform_indices = @transform_4, window_bounds = array<i64: 1, 32>}, {pipeline_mode = #tpu.pipeline_mode<synchronous>, transform_indices = @transform_5, window_bounds = array<i64: 1, 32>}, {pipeline_mode = #tpu.pipeline_mode<synchronous>, transform_indices = @transform_6, window_bounds = array<i64: 32, 32>}, {pipeline_mode = #tpu.pipeline_mode<synchronous>, transform_indices = @transform_7, window_bounds = array<i64: 1, 32>}, {pipeline_mode = #tpu.pipeline_mode<synchronous>, transform_indices = @transform_8, window_bounds = array<i64: 1, 32>}, {pipeline_mode = #tpu.pipeline_mode<synchronous>, transform_indices = @transform_9, window_bounds = array<i64: 32, 64>}, {pipeline_mode = #tpu.pipeline_mode<synchronous>, transform_indices = @transform_10, window_bounds = array<i64: 1, 64>}, {pipeline_mode = #tpu.pipeline_mode<synchronous>, transform_indices = @transform_11, window_bounds = array<i64: 1, 64>}, {transform_indices = @transform_12, window_bounds = array<i64: 1, 64, 64>}]} {
    %c0 = arith.constant 0 : index
    %c0_0 = arith.constant 0 : index
    %c0_1 = arith.constant 0 : index
    %0 = vector.load %arg2[%c0, %c0_0, %c0_1] : memref<1x64x64xbf16, #tpu.memory_space<vmem>>, vector<1x64x64xbf16>
    %1 = vector.shape_cast %0 : vector<1x64x64xbf16> to vector<64x64xbf16>
    %c0_2 = arith.constant 0 : index
    %c0_3 = arith.constant 0 : index
    %2 = vector.load %arg5[%c0_2, %c0_3] : memref<64x32xbf16, #tpu.memory_space<vmem>>, vector<64x32xbf16>
    %cst = arith.constant dense<0.000000e+00> : vector<64x32xf32>
    %3 = tpu.matmul %1, %2, %cst {dimension_numbers = #tpu.dot_dimension_numbers<[1], [0], [0], [1], [0, 0, 1, 1], [], []>} : vector<64x64xbf16>, vector<64x32xbf16>, vector<64x32xf32> -> vector<64x32xf32>
    %c0_4 = arith.constant 0 : index
    %c0_5 = arith.constant 0 : index
    %4 = vector.load %arg6[%c0_4, %c0_5] : memref<1x32xf32, #tpu.memory_space<vmem>>, vector<1x32xf32>
    %5 = vector.broadcast %4 : vector<1x32xf32> to vector<64x32xf32>
    %6 = arith.mulf %3, %5 : vector<64x32xf32>
    %c0_6 = arith.constant 0 : index
    %c0_7 = arith.constant 0 : index
    %7 = vector.load %arg7[%c0_6, %c0_7] : memref<1x32xf32, #tpu.memory_space<vmem>>, vector<1x32xf32>
    %8 = vector.broadcast %7 : vector<1x32xf32> to vector<64x32xf32>
    %9 = arith.addf %6, %8 : vector<64x32xf32>
    %cst_8 = arith.constant 0.000000e+00 : f32
    %10 = vector.broadcast %cst_8 : f32 to vector<64x32xf32>
    %11 = arith.maximumf %9, %10 : vector<64x32xf32>
    %12 = arith.truncf %11 : vector<64x32xf32> to vector<64x32xbf16>
    %c0_9 = arith.constant 0 : index
    %c0_10 = arith.constant 0 : index
    %13 = vector.load %arg8[%c0_9, %c0_10] : memref<32x32xbf16, #tpu.memory_space<vmem>>, vector<32x32xbf16>
    %cst_11 = arith.constant dense<0.000000e+00> : vector<64x32xf32>
    %14 = tpu.matmul %12, %13, %cst_11 {dimension_numbers = #tpu.dot_dimension_numbers<[1], [0], [0], [1], [0, 0, 1, 1], [], []>} : vector<64x32xbf16>, vector<32x32xbf16>, vector<64x32xf32> -> vector<64x32xf32>
    %c0_12 = arith.constant 0 : index
    %c0_13 = arith.constant 0 : index
    %15 = vector.load %arg9[%c0_12, %c0_13] : memref<1x32xf32, #tpu.memory_space<vmem>>, vector<1x32xf32>
    %16 = vector.broadcast %15 : vector<1x32xf32> to vector<64x32xf32>
    %17 = arith.mulf %14, %16 : vector<64x32xf32>
    %c0_14 = arith.constant 0 : index
    %c0_15 = arith.constant 0 : index
    %18 = vector.load %arg10[%c0_14, %c0_15] : memref<1x32xf32, #tpu.memory_space<vmem>>, vector<1x32xf32>
    %19 = vector.broadcast %18 : vector<1x32xf32> to vector<64x32xf32>
    %20 = arith.addf %17, %19 : vector<64x32xf32>
    %cst_16 = arith.constant 0.000000e+00 : f32
    %21 = vector.broadcast %cst_16 : f32 to vector<64x32xf32>
    %22 = arith.maximumf %20, %21 : vector<64x32xf32>
    %c0_17 = arith.constant 0 : index
    %c0_18 = arith.constant 0 : index
    %c0_19 = arith.constant 0 : index
    %23 = vector.load %arg3[%c0_17, %c0_18, %c0_19] : memref<1x3x32xf32, #tpu.memory_space<vmem>>, vector<1x3x32xf32>
    %24 = vector.shape_cast %23 : vector<1x3x32xf32> to vector<3x32xf32>
    %c0_20 = arith.constant 0 : index
    %c0_21 = arith.constant 0 : index
    %c0_22 = arith.constant 0 : index
    %25 = vector.load %arg4[%c0_20, %c0_21, %c0_22] : memref<1x3x32xf32, #tpu.memory_space<vmem>>, vector<1x3x32xf32>
    %26 = vector.shape_cast %25 : vector<1x3x32xf32> to vector<3x32xf32>
    %cst_23 = arith.constant dense<0.000000e+00> : vector<64x3xf32>
    %27 = tpu.matmul %22, %24, %cst_23 {dimension_numbers = #tpu.dot_dimension_numbers<[1], [1], [0], [0], [0, 0, 1, 0], [], []>} : vector<64x32xf32>, vector<3x32xf32>, vector<64x3xf32> -> vector<64x3xf32>
    %cst_24 = arith.constant 0.176776692 : f32
    %28 = vector.broadcast %cst_24 : f32 to vector<64x3xf32>
    %29 = arith.mulf %27, %28 : vector<64x3xf32>
    %cst_25 = arith.constant dense<0xFF800000> : vector<64xf32>
    %30 = vector.multi_reduction <maximumf>, %29, %cst_25 [1] : vector<64x3xf32> to vector<64xf32>
    %31 = vector.shape_cast %30 : vector<64xf32> to vector<64x1xf32>
    %32 = vector.broadcast %31 : vector<64x1xf32> to vector<64x3xf32>
    %33 = arith.subf %29, %32 : vector<64x3xf32>
    %34 = math.exp %33 : vector<64x3xf32>
    %cst_26 = arith.constant dense<0.000000e+00> : vector<64xf32>
    %35 = vector.multi_reduction <add>, %34, %cst_26 [1] : vector<64x3xf32> to vector<64xf32>
    %36 = vector.shape_cast %35 : vector<64xf32> to vector<64x1xf32>
    %37 = tpu.reciprocal %36 {approx = true} : vector<64x1xf32> -> vector<64x1xf32>
    %38 = vector.broadcast %37 : vector<64x1xf32> to vector<64x3xf32>
    %39 = arith.mulf %34, %38 : vector<64x3xf32>
    %cst_27 = arith.constant dense<0.000000e+00> : vector<64x32xf32>
    %40 = tpu.matmul %39, %26, %cst_27 {dimension_numbers = #tpu.dot_dimension_numbers<[1], [0], [0], [1], [0, 0, 1, 1], [], []>} : vector<64x3xf32>, vector<3x32xf32>, vector<64x32xf32> -> vector<64x32xf32>
    %41 = arith.truncf %40 : vector<64x32xf32> to vector<64x32xbf16>
    %c0_28 = arith.constant 0 : index
    %c0_29 = arith.constant 0 : index
    %42 = vector.load %arg11[%c0_28, %c0_29] : memref<32x64xbf16, #tpu.memory_space<vmem>>, vector<32x64xbf16>
    %cst_30 = arith.constant dense<0.000000e+00> : vector<64x64xf32>
    %43 = tpu.matmul %41, %42, %cst_30 {dimension_numbers = #tpu.dot_dimension_numbers<[1], [0], [0], [1], [0, 0, 1, 1], [], []>} : vector<64x32xbf16>, vector<32x64xbf16>, vector<64x64xf32> -> vector<64x64xf32>
    %c0_31 = arith.constant 0 : index
    %c0_32 = arith.constant 0 : index
    %44 = vector.load %arg12[%c0_31, %c0_32] : memref<1x64xf32, #tpu.memory_space<vmem>>, vector<1x64xf32>
    %45 = vector.broadcast %44 : vector<1x64xf32> to vector<64x64xf32>
    %46 = arith.mulf %43, %45 : vector<64x64xf32>
    %c0_33 = arith.constant 0 : index
    %c0_34 = arith.constant 0 : index
    %47 = vector.load %arg13[%c0_33, %c0_34] : memref<1x64xf32, #tpu.memory_space<vmem>>, vector<1x64xf32>
    %48 = vector.broadcast %47 : vector<1x64xf32> to vector<64x64xf32>
    %49 = arith.addf %46, %48 : vector<64x64xf32>
    %cst_35 = arith.constant 0.000000e+00 : f32
    %50 = vector.broadcast %cst_35 : f32 to vector<64x64xf32>
    %51 = arith.maximumf %49, %50 : vector<64x64xf32>
    %c0_36 = arith.constant 0 : index
    %c0_37 = arith.constant 0 : index
    %c0_38 = arith.constant 0 : index
    %52 = vector.load %arg14[%c0_36, %c0_37, %c0_38] : memref<1x64x64xf32, #tpu.memory_space<vmem>>, vector<1x64x64xf32>
    %53 = vector.shape_cast %52 : vector<1x64x64xf32> to vector<64x64xf32>
    %54 = vector.shape_cast %51 : vector<64x64xf32> to vector<1x64x64xf32>
    tpu.vector_store %arg14[%c0_36, %c0_37, %c0_38], %54 {strides = array<i32>} : memref<1x64x64xf32, #tpu.memory_space<vmem>>, vector<1x64x64xf32>,
    return
  }
  func.func @transform_0(%arg0: i32, %arg1: i32) -> (i32, i32, i32) {
    %c0_i32 = arith.constant 0 : i32
    %c0_i32_0 = arith.constant 0 : i32
    return %arg0, %arg1, %c0_i32 : i32, i32, i32
  }
  func.func @transform_1(%arg0: i32, %arg1: i32) -> (i32, i32, i32) {
    %c0_i32 = arith.constant 0 : i32
    %c0_i32_0 = arith.constant 0 : i32
    %c0_i32_1 = arith.constant 0 : i32
    return %arg0, %c0_i32, %c0_i32_0 : i32, i32, i32
  }
  func.func @transform_2(%arg0: i32, %arg1: i32) -> (i32, i32, i32) {
    %c0_i32 = arith.constant 0 : i32
    %c0_i32_0 = arith.constant 0 : i32
    %c0_i32_1 = arith.constant 0 : i32
    return %arg0, %c0_i32, %c0_i32_0 : i32, i32, i32
  }
  func.func @transform_3(%arg0: i32, %arg1: i32) -> (i32, i32) {
    %c0_i32 = arith.constant 0 : i32
    %c0_i32_0 = arith.constant 0 : i32
    %c0_i32_1 = arith.constant 0 : i32
    return %c0_i32, %c0_i32_0 : i32, i32
  }
  func.func @transform_4(%arg0: i32, %arg1: i32) -> (i32, i32) {
    %c0_i32 = arith.constant 0 : i32
    %c0_i32_0 = arith.constant 0 : i32
    %c0_i32_1 = arith.constant 0 : i32
    return %c0_i32, %c0_i32_0 : i32, i32
  }
  func.func @transform_5(%arg0: i32, %arg1: i32) -> (i32, i32) {
    %c0_i32 = arith.constant 0 : i32
    %c0_i32_0 = arith.constant 0 : i32
    %c0_i32_1 = arith.constant 0 : i32
    return %c0_i32, %c0_i32_0 : i32, i32
  }
  func.func @transform_6(%arg0: i32, %arg1: i32) -> (i32, i32) {
    %c0_i32 = arith.constant 0 : i32
    %c0_i32_0 = arith.constant 0 : i32
    %c0_i32_1 = arith.constant 0 : i32
    return %c0_i32, %c0_i32_0 : i32, i32
  }
  func.func @transform_7(%arg0: i32, %arg1: i32) -> (i32, i32) {
    %c0_i32 = arith.constant 0 : i32
    %c0_i32_0 = arith.constant 0 : i32
    %c0_i32_1 = arith.constant 0 : i32
    return %c0_i32, %c0_i32_0 : i32, i32
  }
  func.func @transform_8(%arg0: i32, %arg1: i32) -> (i32, i32) {
    %c0_i32 = arith.constant 0 : i32
    %c0_i32_0 = arith.constant 0 : i32
    %c0_i32_1 = arith.constant 0 : i32
    return %c0_i32, %c0_i32_0 : i32, i32
  }
  func.func @transform_9(%arg0: i32, %arg1: i32) -> (i32, i32) {
    %c0_i32 = arith.constant 0 : i32
    %c0_i32_0 = arith.constant 0 : i32
    %c0_i32_1 = arith.constant 0 : i32
    return %c0_i32, %c0_i32_0 : i32, i32
  }
  func.func @transform_10(%arg0: i32, %arg1: i32) -> (i32, i32) {
    %c0_i32 = arith.constant 0 : i32
    %c0_i32_0 = arith.constant 0 : i32
    %c0_i32_1 = arith.constant 0 : i32
    return %c0_i32, %c0_i32_0 : i32, i32
  }
  func.func @transform_11(%arg0: i32, %arg1: i32) -> (i32, i32) {
    %c0_i32 = arith.constant 0 : i32
    %c0_i32_0 = arith.constant 0 : i32
    %c0_i32_1 = arith.constant 0 : i32
    return %c0_i32, %c0_i32_0 : i32, i32
  }
  func.func @transform_12(%arg0: i32, %arg1: i32) -> (i32, i32, i32) {
    %c0_i32 = arith.constant 0 : i32
    %c0_i32_0 = arith.constant 0 : i32
    return %arg0, %arg1, %c0_i32 : i32, i32, i32
  }
}

module attributes {stable_mosaic.version = 11 : i64} {
  func.func @_mm_affine_kernel(%arg0: i32, %arg1: memref<8x64xbf16, #tpu.memory_space<vmem>>, %arg2: memref<64x128xbf16, #tpu.memory_space<vmem>>, %arg3: memref<1x128xf32, #tpu.memory_space<vmem>>, %arg4: memref<1x128xf32, #tpu.memory_space<vmem>>, %arg5: memref<8x128xf32, #tpu.memory_space<vmem>>) attributes {dimension_semantics = [#tpu.dimension_semantics<parallel>], iteration_bounds = array<i64: 1>, scalar_prefetch = 0 : i64, scratch_operands = 0 : i64, tpu.core_type = #tpu.core_type<tc>, window_params = [{transform_indices = @transform_0, window_bounds = array<i64: 8, 64>}, {pipeline_mode = #tpu.pipeline_mode<synchronous>, transform_indices = @transform_1, window_bounds = array<i64: 64, 128>}, {pipeline_mode = #tpu.pipeline_mode<synchronous>, transform_indices = @transform_2, window_bounds = array<i64: 1, 128>}, {pipeline_mode = #tpu.pipeline_mode<synchronous>, transform_indices = @transform_3, window_bounds = array<i64: 1, 128>}, {transform_indices = @transform_4, window_bounds = array<i64: 8, 128>}]} {
    %c0 = arith.constant 0 : index
    %c0_0 = arith.constant 0 : index
    %0 = vector.load %arg1[%c0, %c0_0] : memref<8x64xbf16, #tpu.memory_space<vmem>>, vector<8x64xbf16>
    %c0_1 = arith.constant 0 : index
    %c0_2 = arith.constant 0 : index
    %1 = vector.load %arg2[%c0_1, %c0_2] : memref<64x128xbf16, #tpu.memory_space<vmem>>, vector<64x128xbf16>
    %cst = arith.constant dense<0.000000e+00> : vector<8x128xf32>
    %2 = tpu.matmul %0, %1, %cst {dimension_numbers = #tpu.dot_dimension_numbers<[1], [0], [0], [1], [0, 0, 1, 1], [], []>} : vector<8x64xbf16>, vector<64x128xbf16>, vector<8x128xf32> -> vector<8x128xf32>
    %c0_3 = arith.constant 0 : index
    %c0_4 = arith.constant 0 : index
    %3 = vector.load %arg3[%c0_3, %c0_4] : memref<1x128xf32, #tpu.memory_space<vmem>>, vector<1x128xf32>
    %4 = vector.broadcast %3 : vector<1x128xf32> to vector<8x128xf32>
    %5 = arith.mulf %2, %4 : vector<8x128xf32>
    %c0_5 = arith.constant 0 : index
    %c0_6 = arith.constant 0 : index
    %6 = vector.load %arg4[%c0_5, %c0_6] : memref<1x128xf32, #tpu.memory_space<vmem>>, vector<1x128xf32>
    %7 = vector.broadcast %6 : vector<1x128xf32> to vector<8x128xf32>
    %8 = arith.addf %5, %7 : vector<8x128xf32>
    %cst_7 = arith.constant 0.000000e+00 : f32
    %9 = vector.broadcast %cst_7 : f32 to vector<8x128xf32>
    %10 = arith.maximumf %8, %9 : vector<8x128xf32>
    %c0_8 = arith.constant 0 : index
    %c0_9 = arith.constant 0 : index
    %11 = vector.load %arg5[%c0_8, %c0_9] : memref<8x128xf32, #tpu.memory_space<vmem>>, vector<8x128xf32>
    tpu.vector_store %arg5[%c0_8, %c0_9], %10 {strides = array<i32>} : memref<8x128xf32, #tpu.memory_space<vmem>>, vector<8x128xf32>,
    return
  }
  func.func @transform_0(%arg0: i32) -> (i32, i32) {
    %c0_i32 = arith.constant 0 : i32
    %c0_i32_0 = arith.constant 0 : i32
    return %arg0, %c0_i32 : i32, i32
  }
  func.func @transform_1(%arg0: i32) -> (i32, i32) {
    %c0_i32 = arith.constant 0 : i32
    %c0_i32_0 = arith.constant 0 : i32
    %c0_i32_1 = arith.constant 0 : i32
    return %c0_i32, %c0_i32_0 : i32, i32
  }
  func.func @transform_2(%arg0: i32) -> (i32, i32) {
    %c0_i32 = arith.constant 0 : i32
    %c0_i32_0 = arith.constant 0 : i32
    %c0_i32_1 = arith.constant 0 : i32
    return %c0_i32, %c0_i32_0 : i32, i32
  }
  func.func @transform_3(%arg0: i32) -> (i32, i32) {
    %c0_i32 = arith.constant 0 : i32
    %c0_i32_0 = arith.constant 0 : i32
    %c0_i32_1 = arith.constant 0 : i32
    return %c0_i32, %c0_i32_0 : i32, i32
  }
  func.func @transform_4(%arg0: i32) -> (i32, i32) {
    %c0_i32 = arith.constant 0 : i32
    %c0_i32_0 = arith.constant 0 : i32
    return %arg0, %c0_i32 : i32, i32
  }
}

module attributes {stable_mosaic.version = 11 : i64} {
  func.func @_mm2_kernel(%arg0: i32, %arg1: memref<128x128xbf16, #tpu.memory_space<vmem>>, %arg2: memref<128x128xbf16, #tpu.memory_space<vmem>>, %arg3: memref<1x128xf32, #tpu.memory_space<vmem>>, %arg4: memref<1x128xf32, #tpu.memory_space<vmem>>, %arg5: memref<128x128xbf16, #tpu.memory_space<vmem>>, %arg6: memref<1x128xf32, #tpu.memory_space<vmem>>, %arg7: memref<1x128xf32, #tpu.memory_space<vmem>>, %arg8: memref<128x128xf32, #tpu.memory_space<vmem>>, %arg9: memref<128x128xf32, #tpu.memory_space<vmem>>) attributes {dimension_semantics = [#tpu.dimension_semantics<parallel>], iteration_bounds = array<i64: 1>, scalar_prefetch = 0 : i64, scratch_operands = 0 : i64, tpu.core_type = #tpu.core_type<tc>, window_params = [{transform_indices = @transform_0, window_bounds = array<i64: 128, 128>}, {pipeline_mode = #tpu.pipeline_mode<synchronous>, transform_indices = @transform_1, window_bounds = array<i64: 128, 128>}, {pipeline_mode = #tpu.pipeline_mode<synchronous>, transform_indices = @transform_2, window_bounds = array<i64: 1, 128>}, {pipeline_mode = #tpu.pipeline_mode<synchronous>, transform_indices = @transform_3, window_bounds = array<i64: 1, 128>}, {pipeline_mode = #tpu.pipeline_mode<synchronous>, transform_indices = @transform_4, window_bounds = array<i64: 128, 128>}, {pipeline_mode = #tpu.pipeline_mode<synchronous>, transform_indices = @transform_5, window_bounds = array<i64: 1, 128>}, {pipeline_mode = #tpu.pipeline_mode<synchronous>, transform_indices = @transform_6, window_bounds = array<i64: 1, 128>}, {transform_indices = @transform_7, window_bounds = array<i64: 128, 128>}, {transform_indices = @transform_8, window_bounds = array<i64: 128, 128>}]} {
    %c0 = arith.constant 0 : index
    %c0_0 = arith.constant 0 : index
    %0 = vector.load %arg1[%c0, %c0_0] : memref<128x128xbf16, #tpu.memory_space<vmem>>, vector<128x128xbf16>
    %c0_1 = arith.constant 0 : index
    %c0_2 = arith.constant 0 : index
    %1 = vector.load %arg2[%c0_1, %c0_2] : memref<128x128xbf16, #tpu.memory_space<vmem>>, vector<128x128xbf16>
    %cst = arith.constant dense<0.000000e+00> : vector<128x128xf32>
    %2 = tpu.matmul %0, %1, %cst {dimension_numbers = #tpu.dot_dimension_numbers<[1], [0], [0], [1], [0, 0, 1, 1], [], []>} : vector<128x128xbf16>, vector<128x128xbf16>, vector<128x128xf32> -> vector<128x128xf32>
    %c0_3 = arith.constant 0 : index
    %c0_4 = arith.constant 0 : index
    %3 = vector.load %arg3[%c0_3, %c0_4] : memref<1x128xf32, #tpu.memory_space<vmem>>, vector<1x128xf32>
    %4 = vector.broadcast %3 : vector<1x128xf32> to vector<128x128xf32>
    %5 = arith.mulf %2, %4 : vector<128x128xf32>
    %c0_5 = arith.constant 0 : index
    %c0_6 = arith.constant 0 : index
    %6 = vector.load %arg4[%c0_5, %c0_6] : memref<1x128xf32, #tpu.memory_space<vmem>>, vector<1x128xf32>
    %7 = vector.broadcast %6 : vector<1x128xf32> to vector<128x128xf32>
    %8 = arith.addf %5, %7 : vector<128x128xf32>
    %cst_7 = arith.constant 0.000000e+00 : f32
    %9 = vector.broadcast %cst_7 : f32 to vector<128x128xf32>
    %10 = arith.maximumf %8, %9 : vector<128x128xf32>
    %11 = arith.truncf %10 : vector<128x128xf32> to vector<128x128xbf16>
    %c0_8 = arith.constant 0 : index
    %c0_9 = arith.constant 0 : index
    %12 = vector.load %arg5[%c0_8, %c0_9] : memref<128x128xbf16, #tpu.memory_space<vmem>>, vector<128x128xbf16>
    %cst_10 = arith.constant dense<0.000000e+00> : vector<128x128xf32>
    %13 = tpu.matmul %11, %12, %cst_10 {dimension_numbers = #tpu.dot_dimension_numbers<[1], [0], [0], [1], [0, 0, 1, 1], [], []>} : vector<128x128xbf16>, vector<128x128xbf16>, vector<128x128xf32> -> vector<128x128xf32>
    %c0_11 = arith.constant 0 : index
    %c0_12 = arith.constant 0 : index
    %14 = vector.load %arg6[%c0_11, %c0_12] : memref<1x128xf32, #tpu.memory_space<vmem>>, vector<1x128xf32>
    %15 = vector.broadcast %14 : vector<1x128xf32> to vector<128x128xf32>
    %16 = arith.mulf %13, %15 : vector<128x128xf32>
    %c0_13 = arith.constant 0 : index
    %c0_14 = arith.constant 0 : index
    %17 = vector.load %arg7[%c0_13, %c0_14] : memref<1x128xf32, #tpu.memory_space<vmem>>, vector<1x128xf32>
    %18 = vector.broadcast %17 : vector<1x128xf32> to vector<128x128xf32>
    %19 = arith.addf %16, %18 : vector<128x128xf32>
    %c0_15 = arith.constant 0 : index
    %c0_16 = arith.constant 0 : index
    %20 = vector.load %arg8[%c0_15, %c0_16] : memref<128x128xf32, #tpu.memory_space<vmem>>, vector<128x128xf32>
    tpu.vector_store %arg8[%c0_15, %c0_16], %10 {strides = array<i32>} : memref<128x128xf32, #tpu.memory_space<vmem>>, vector<128x128xf32>,
    %c0_17 = arith.constant 0 : index
    %c0_18 = arith.constant 0 : index
    %21 = vector.load %arg9[%c0_17, %c0_18] : memref<128x128xf32, #tpu.memory_space<vmem>>, vector<128x128xf32>
    tpu.vector_store %arg9[%c0_17, %c0_18], %19 {strides = array<i32>} : memref<128x128xf32, #tpu.memory_space<vmem>>, vector<128x128xf32>,
    return
  }
  func.func @transform_0(%arg0: i32) -> (i32, i32) {
    %c0_i32 = arith.constant 0 : i32
    %c0_i32_0 = arith.constant 0 : i32
    return %arg0, %c0_i32 : i32, i32
  }
  func.func @transform_1(%arg0: i32) -> (i32, i32) {
    %c0_i32 = arith.constant 0 : i32
    %c0_i32_0 = arith.constant 0 : i32
    %c0_i32_1 = arith.constant 0 : i32
    return %c0_i32, %c0_i32_0 : i32, i32
  }
  func.func @transform_2(%arg0: i32) -> (i32, i32) {
    %c0_i32 = arith.constant 0 : i32
    %c0_i32_0 = arith.constant 0 : i32
    %c0_i32_1 = arith.constant 0 : i32
    return %c0_i32, %c0_i32_0 : i32, i32
  }
  func.func @transform_3(%arg0: i32) -> (i32, i32) {
    %c0_i32 = arith.constant 0 : i32
    %c0_i32_0 = arith.constant 0 : i32
    %c0_i32_1 = arith.constant 0 : i32
    return %c0_i32, %c0_i32_0 : i32, i32
  }
  func.func @transform_4(%arg0: i32) -> (i32, i32) {
    %c0_i32 = arith.constant 0 : i32
    %c0_i32_0 = arith.constant 0 : i32
    %c0_i32_1 = arith.constant 0 : i32
    return %c0_i32, %c0_i32_0 : i32, i32
  }
  func.func @transform_5(%arg0: i32) -> (i32, i32) {
    %c0_i32 = arith.constant 0 : i32
    %c0_i32_0 = arith.constant 0 : i32
    %c0_i32_1 = arith.constant 0 : i32
    return %c0_i32, %c0_i32_0 : i32, i32
  }
  func.func @transform_6(%arg0: i32) -> (i32, i32) {
    %c0_i32 = arith.constant 0 : i32
    %c0_i32_0 = arith.constant 0 : i32
    %c0_i32_1 = arith.constant 0 : i32
    return %c0_i32, %c0_i32_0 : i32, i32
  }
  func.func @transform_7(%arg0: i32) -> (i32, i32) {
    %c0_i32 = arith.constant 0 : i32
    %c0_i32_0 = arith.constant 0 : i32
    return %arg0, %c0_i32 : i32, i32
  }
  func.func @transform_8(%arg0: i32) -> (i32, i32) {
    %c0_i32 = arith.constant 0 : i32
    %c0_i32_0 = arith.constant 0 : i32
    return %arg0, %c0_i32 : i32, i32
  }
}

module attributes {stable_mosaic.version = 11 : i64} {
  func.func @_mm_affine_kernel(%arg0: i32, %arg1: memref<8x1024xbf16, #tpu.memory_space<vmem>>, %arg2: memref<1024x128xbf16, #tpu.memory_space<vmem>>, %arg3: memref<1x128xf32, #tpu.memory_space<vmem>>, %arg4: memref<1x128xf32, #tpu.memory_space<vmem>>, %arg5: memref<8x128xf32, #tpu.memory_space<vmem>>) attributes {dimension_semantics = [#tpu.dimension_semantics<parallel>], iteration_bounds = array<i64: 1>, scalar_prefetch = 0 : i64, scratch_operands = 0 : i64, tpu.core_type = #tpu.core_type<tc>, window_params = [{transform_indices = @transform_0, window_bounds = array<i64: 8, 1024>}, {pipeline_mode = #tpu.pipeline_mode<synchronous>, transform_indices = @transform_1, window_bounds = array<i64: 1024, 128>}, {pipeline_mode = #tpu.pipeline_mode<synchronous>, transform_indices = @transform_2, window_bounds = array<i64: 1, 128>}, {pipeline_mode = #tpu.pipeline_mode<synchronous>, transform_indices = @transform_3, window_bounds = array<i64: 1, 128>}, {transform_indices = @transform_4, window_bounds = array<i64: 8, 128>}]} {
    %c0 = arith.constant 0 : index
    %c0_0 = arith.constant 0 : index
    %0 = vector.load %arg1[%c0, %c0_0] : memref<8x1024xbf16, #tpu.memory_space<vmem>>, vector<8x1024xbf16>
    %c0_1 = arith.constant 0 : index
    %c0_2 = arith.constant 0 : index
    %1 = vector.load %arg2[%c0_1, %c0_2] : memref<1024x128xbf16, #tpu.memory_space<vmem>>, vector<1024x128xbf16>
    %cst = arith.constant dense<0.000000e+00> : vector<8x128xf32>
    %2 = tpu.matmul %0, %1, %cst {dimension_numbers = #tpu.dot_dimension_numbers<[1], [0], [0], [1], [0, 0, 1, 1], [], []>} : vector<8x1024xbf16>, vector<1024x128xbf16>, vector<8x128xf32> -> vector<8x128xf32>
    %c0_3 = arith.constant 0 : index
    %c0_4 = arith.constant 0 : index
    %3 = vector.load %arg3[%c0_3, %c0_4] : memref<1x128xf32, #tpu.memory_space<vmem>>, vector<1x128xf32>
    %4 = vector.broadcast %3 : vector<1x128xf32> to vector<8x128xf32>
    %5 = arith.mulf %2, %4 : vector<8x128xf32>
    %c0_5 = arith.constant 0 : index
    %c0_6 = arith.constant 0 : index
    %6 = vector.load %arg4[%c0_5, %c0_6] : memref<1x128xf32, #tpu.memory_space<vmem>>, vector<1x128xf32>
    %7 = vector.broadcast %6 : vector<1x128xf32> to vector<8x128xf32>
    %8 = arith.addf %5, %7 : vector<8x128xf32>
    %c0_7 = arith.constant 0 : index
    %c0_8 = arith.constant 0 : index
    %9 = vector.load %arg5[%c0_7, %c0_8] : memref<8x128xf32, #tpu.memory_space<vmem>>, vector<8x128xf32>
    tpu.vector_store %arg5[%c0_7, %c0_8], %8 {strides = array<i32>} : memref<8x128xf32, #tpu.memory_space<vmem>>, vector<8x128xf32>,
    return
  }
  func.func @transform_0(%arg0: i32) -> (i32, i32) {
    %c0_i32 = arith.constant 0 : i32
    %c0_i32_0 = arith.constant 0 : i32
    return %arg0, %c0_i32 : i32, i32
  }
  func.func @transform_1(%arg0: i32) -> (i32, i32) {
    %c0_i32 = arith.constant 0 : i32
    %c0_i32_0 = arith.constant 0 : i32
    %c0_i32_1 = arith.constant 0 : i32
    return %c0_i32, %c0_i32_0 : i32, i32
  }
  func.func @transform_2(%arg0: i32) -> (i32, i32) {
    %c0_i32 = arith.constant 0 : i32
    %c0_i32_0 = arith.constant 0 : i32
    %c0_i32_1 = arith.constant 0 : i32
    return %c0_i32, %c0_i32_0 : i32, i32
  }
  func.func @transform_3(%arg0: i32) -> (i32, i32) {
    %c0_i32 = arith.constant 0 : i32
    %c0_i32_0 = arith.constant 0 : i32
    %c0_i32_1 = arith.constant 0 : i32
    return %c0_i32, %c0_i32_0 : i32, i32
  }
  func.func @transform_4(%arg0: i32) -> (i32, i32) {
    %c0_i32 = arith.constant 0 : i32
    %c0_i32_0 = arith.constant 0 : i32
    return %arg0, %c0_i32 : i32, i32
  }
}

module attributes {stable_mosaic.version = 11 : i64} {
  func.func @_mm_affine_kernel(%arg0: i32, %arg1: memref<8x32xbf16, #tpu.memory_space<vmem>>, %arg2: memref<32x128xbf16, #tpu.memory_space<vmem>>, %arg3: memref<1x128xf32, #tpu.memory_space<vmem>>, %arg4: memref<1x128xf32, #tpu.memory_space<vmem>>, %arg5: memref<8x128xf32, #tpu.memory_space<vmem>>) attributes {dimension_semantics = [#tpu.dimension_semantics<parallel>], iteration_bounds = array<i64: 1>, scalar_prefetch = 0 : i64, scratch_operands = 0 : i64, tpu.core_type = #tpu.core_type<tc>, window_params = [{transform_indices = @transform_0, window_bounds = array<i64: 8, 32>}, {pipeline_mode = #tpu.pipeline_mode<synchronous>, transform_indices = @transform_1, window_bounds = array<i64: 32, 128>}, {pipeline_mode = #tpu.pipeline_mode<synchronous>, transform_indices = @transform_2, window_bounds = array<i64: 1, 128>}, {pipeline_mode = #tpu.pipeline_mode<synchronous>, transform_indices = @transform_3, window_bounds = array<i64: 1, 128>}, {transform_indices = @transform_4, window_bounds = array<i64: 8, 128>}]} {
    %c0 = arith.constant 0 : index
    %c0_0 = arith.constant 0 : index
    %0 = vector.load %arg1[%c0, %c0_0] : memref<8x32xbf16, #tpu.memory_space<vmem>>, vector<8x32xbf16>
    %c0_1 = arith.constant 0 : index
    %c0_2 = arith.constant 0 : index
    %1 = vector.load %arg2[%c0_1, %c0_2] : memref<32x128xbf16, #tpu.memory_space<vmem>>, vector<32x128xbf16>
    %cst = arith.constant dense<0.000000e+00> : vector<8x128xf32>
    %2 = tpu.matmul %0, %1, %cst {dimension_numbers = #tpu.dot_dimension_numbers<[1], [0], [0], [1], [0, 0, 1, 1], [], []>} : vector<8x32xbf16>, vector<32x128xbf16>, vector<8x128xf32> -> vector<8x128xf32>
    %c0_3 = arith.constant 0 : index
    %c0_4 = arith.constant 0 : index
    %3 = vector.load %arg3[%c0_3, %c0_4] : memref<1x128xf32, #tpu.memory_space<vmem>>, vector<1x128xf32>
    %4 = vector.broadcast %3 : vector<1x128xf32> to vector<8x128xf32>
    %5 = arith.mulf %2, %4 : vector<8x128xf32>
    %c0_5 = arith.constant 0 : index
    %c0_6 = arith.constant 0 : index
    %6 = vector.load %arg4[%c0_5, %c0_6] : memref<1x128xf32, #tpu.memory_space<vmem>>, vector<1x128xf32>
    %7 = vector.broadcast %6 : vector<1x128xf32> to vector<8x128xf32>
    %8 = arith.addf %5, %7 : vector<8x128xf32>
    %c0_7 = arith.constant 0 : index
    %c0_8 = arith.constant 0 : index
    %9 = vector.load %arg5[%c0_7, %c0_8] : memref<8x128xf32, #tpu.memory_space<vmem>>, vector<8x128xf32>
    tpu.vector_store %arg5[%c0_7, %c0_8], %8 {strides = array<i32>} : memref<8x128xf32, #tpu.memory_space<vmem>>, vector<8x128xf32>,
    return
  }
  func.func @transform_0(%arg0: i32) -> (i32, i32) {
    %c0_i32 = arith.constant 0 : i32
    %c0_i32_0 = arith.constant 0 : i32
    return %arg0, %c0_i32 : i32, i32
  }
  func.func @transform_1(%arg0: i32) -> (i32, i32) {
    %c0_i32 = arith.constant 0 : i32
    %c0_i32_0 = arith.constant 0 : i32
    %c0_i32_1 = arith.constant 0 : i32
    return %c0_i32, %c0_i32_0 : i32, i32
  }
  func.func @transform_2(%arg0: i32) -> (i32, i32) {
    %c0_i32 = arith.constant 0 : i32
    %c0_i32_0 = arith.constant 0 : i32
    %c0_i32_1 = arith.constant 0 : i32
    return %c0_i32, %c0_i32_0 : i32, i32
  }
  func.func @transform_3(%arg0: i32) -> (i32, i32) {
    %c0_i32 = arith.constant 0 : i32
    %c0_i32_0 = arith.constant 0 : i32
    %c0_i32_1 = arith.constant 0 : i32
    return %c0_i32, %c0_i32_0 : i32, i32
  }
  func.func @transform_4(%arg0: i32) -> (i32, i32) {
    %c0_i32 = arith.constant 0 : i32
    %c0_i32_0 = arith.constant 0 : i32
    return %arg0, %c0_i32 : i32, i32
  }
}

module attributes {stable_mosaic.version = 11 : i64} {
  func.func @_mhsa_kernel(%arg0: i32, %arg1: memref<1x4x4x8xbf16, #tpu.memory_space<vmem>>, %arg2: memref<1x4x4x8xbf16, #tpu.memory_space<vmem>>, %arg3: memref<1x4x4x8xbf16, #tpu.memory_space<vmem>>, %arg4: memref<1x4x4x8xf32, #tpu.memory_space<vmem>>) attributes {dimension_semantics = [#tpu.dimension_semantics<parallel>], iteration_bounds = array<i64: 2>, scalar_prefetch = 0 : i64, scratch_operands = 0 : i64, tpu.core_type = #tpu.core_type<tc>, window_params = [{transform_indices = @transform_0, window_bounds = array<i64: 1, 4, 4, 8>}, {transform_indices = @transform_1, window_bounds = array<i64: 1, 4, 4, 8>}, {transform_indices = @transform_2, window_bounds = array<i64: 1, 4, 4, 8>}, {transform_indices = @transform_3, window_bounds = array<i64: 1, 4, 4, 8>}]} {
    %c0 = arith.constant 0 : index
    %c0_0 = arith.constant 0 : index
    %c0_1 = arith.constant 0 : index
    %c0_2 = arith.constant 0 : index
    %0 = vector.load %arg1[%c0, %c0_0, %c0_1, %c0_2] : memref<1x4x4x8xbf16, #tpu.memory_space<vmem>>, vector<1x4x4x8xbf16>
    %1 = vector.shape_cast %0 : vector<1x4x4x8xbf16> to vector<4x4x8xbf16>
    %c0_3 = arith.constant 0 : index
    %c0_4 = arith.constant 0 : index
    %c0_5 = arith.constant 0 : index
    %c0_6 = arith.constant 0 : index
    %2 = vector.load %arg2[%c0_3, %c0_4, %c0_5, %c0_6] : memref<1x4x4x8xbf16, #tpu.memory_space<vmem>>, vector<1x4x4x8xbf16>
    %3 = vector.shape_cast %2 : vector<1x4x4x8xbf16> to vector<4x4x8xbf16>
    %c0_7 = arith.constant 0 : index
    %c0_8 = arith.constant 0 : index
    %c0_9 = arith.constant 0 : index
    %c0_10 = arith.constant 0 : index
    %4 = vector.load %arg3[%c0_7, %c0_8, %c0_9, %c0_10] : memref<1x4x4x8xbf16, #tpu.memory_space<vmem>>, vector<1x4x4x8xbf16>
    %5 = vector.shape_cast %4 : vector<1x4x4x8xbf16> to vector<4x4x8xbf16>
    %6 = vector.extract_strided_slice %1 {offsets = [0, 0, 0], sizes = [1, 4, 8], strides = [1, 1, 1]} : vector<4x4x8xbf16> to vector<1x4x8xbf16>
    %7 = vector.shape_cast %6 : vector<1x4x8xbf16> to vector<4x8xbf16>
    %8 = vector.extract_strided_slice %3 {offsets = [0, 0, 0], sizes = [1, 4, 8], strides = [1, 1, 1]} : vector<4x4x8xbf16> to vector<1x4x8xbf16>
    %9 = vector.shape_cast %8 : vector<1x4x8xbf16> to vector<4x8xbf16>
    %10 = vector.extract_strided_slice %5 {offsets = [0, 0, 0], sizes = [1, 4, 8], strides = [1, 1, 1]} : vector<4x4x8xbf16> to vector<1x4x8xbf16>
    %11 = vector.shape_cast %10 : vector<1x4x8xbf16> to vector<4x8xbf16>
    %cst = arith.constant dense<0.000000e+00> : vector<4x4xf32>
    %12 = tpu.matmul %7, %9, %cst {dimension_numbers = #tpu.dot_dimension_numbers<[1], [1], [0], [0], [0, 0, 1, 0], [], []>} : vector<4x8xbf16>, vector<4x8xbf16>, vector<4x4xf32> -> vector<4x4xf32>
    %cst_11 = arith.constant 0.353553385 : f32
    %13 = vector.broadcast %cst_11 : f32 to vector<4x4xf32>
    %14 = arith.mulf %12, %13 : vector<4x4xf32>
    %cst_12 = arith.constant dense<0xFF800000> : vector<4xf32>
    %15 = vector.multi_reduction <maximumf>, %14, %cst_12 [1] : vector<4x4xf32> to vector<4xf32>
    %16 = vector.shape_cast %15 : vector<4xf32> to vector<4x1xf32>
    %17 = vector.broadcast %16 : vector<4x1xf32> to vector<4x4xf32>
    %18 = arith.subf %14, %17 : vector<4x4xf32>
    %19 = math.exp %18 : vector<4x4xf32>
    %cst_13 = arith.constant dense<0.000000e+00> : vector<4xf32>
    %20 = vector.multi_reduction <add>, %19, %cst_13 [1] : vector<4x4xf32> to vector<4xf32>
    %21 = vector.shape_cast %20 : vector<4xf32> to vector<4x1xf32>
    %22 = tpu.reciprocal %21 {approx = true} : vector<4x1xf32> -> vector<4x1xf32>
    %23 = vector.broadcast %22 : vector<4x1xf32> to vector<4x4xf32>
    %24 = arith.mulf %19, %23 : vector<4x4xf32>
    %25 = arith.truncf %24 : vector<4x4xf32> to vector<4x4xbf16>
    %cst_14 = arith.constant dense<0.000000e+00> : vector<4x8xf32>
    %26 = tpu.matmul %25, %11, %cst_14 {dimension_numbers = #tpu.dot_dimension_numbers<[1], [0], [0], [1], [0, 0, 1, 1], [], []>} : vector<4x4xbf16>, vector<4x8xbf16>, vector<4x8xf32> -> vector<4x8xf32>
    %c0_15 = arith.constant 0 : index
    %c0_16 = arith.constant 0 : index
    %c0_17 = arith.constant 0 : index
    %c0_18 = arith.constant 0 : index
    %27 = vector.load %arg4[%c0_15, %c0_16, %c0_17, %c0_18] : memref<1x4x4x8xf32, #tpu.memory_space<vmem>>, vector<1x1x4x8xf32>
    %28 = vector.shape_cast %27 : vector<1x1x4x8xf32> to vector<4x8xf32>
    %29 = vector.shape_cast %26 : vector<4x8xf32> to vector<1x1x4x8xf32>
    tpu.vector_store %arg4[%c0_15, %c0_16, %c0_17, %c0_18], %29 {strides = array<i32>} : memref<1x4x4x8xf32, #tpu.memory_space<vmem>>, vector<1x1x4x8xf32>,
    %30 = vector.extract_strided_slice %1 {offsets = [1, 0, 0], sizes = [1, 4, 8], strides = [1, 1, 1]} : vector<4x4x8xbf16> to vector<1x4x8xbf16>
    %31 = vector.shape_cast %30 : vector<1x4x8xbf16> to vector<4x8xbf16>
    %32 = vector.extract_strided_slice %3 {offsets = [1, 0, 0], sizes = [1, 4, 8], strides = [1, 1, 1]} : vector<4x4x8xbf16> to vector<1x4x8xbf16>
    %33 = vector.shape_cast %32 : vector<1x4x8xbf16> to vector<4x8xbf16>
    %34 = vector.extract_strided_slice %5 {offsets = [1, 0, 0], sizes = [1, 4, 8], strides = [1, 1, 1]} : vector<4x4x8xbf16> to vector<1x4x8xbf16>
    %35 = vector.shape_cast %34 : vector<1x4x8xbf16> to vector<4x8xbf16>
    %cst_19 = arith.constant dense<0.000000e+00> : vector<4x4xf32>
    %36 = tpu.matmul %31, %33, %cst_19 {dimension_numbers = #tpu.dot_dimension_numbers<[1], [1], [0], [0], [0, 0, 1, 0], [], []>} : vector<4x8xbf16>, vector<4x8xbf16>, vector<4x4xf32> -> vector<4x4xf32>
    %cst_20 = arith.constant 0.353553385 : f32
    %37 = vector.broadcast %cst_20 : f32 to vector<4x4xf32>
    %38 = arith.mulf %36, %37 : vector<4x4xf32>
    %cst_21 = arith.constant dense<0xFF800000> : vector<4xf32>
    %39 = vector.multi_reduction <maximumf>, %38, %cst_21 [1] : vector<4x4xf32> to vector<4xf32>
    %40 = vector.shape_cast %39 : vector<4xf32> to vector<4x1xf32>
    %41 = vector.broadcast %40 : vector<4x1xf32> to vector<4x4xf32>
    %42 = arith.subf %38, %41 : vector<4x4xf32>
    %43 = math.exp %42 : vector<4x4xf32>
    %cst_22 = arith.constant dense<0.000000e+00> : vector<4xf32>
    %44 = vector.multi_reduction <add>, %43, %cst_22 [1] : vector<4x4xf32> to vector<4xf32>
    %45 = vector.shape_cast %44 : vector<4xf32> to vector<4x1xf32>
    %46 = tpu.reciprocal %45 {approx = true} : vector<4x1xf32> -> vector<4x1xf32>
    %47 = vector.broadcast %46 : vector<4x1xf32> to vector<4x4xf32>
    %48 = arith.mulf %43, %47 : vector<4x4xf32>
    %49 = arith.truncf %48 : vector<4x4xf32> to vector<4x4xbf16>
    %cst_23 = arith.constant dense<0.000000e+00> : vector<4x8xf32>
    %50 = tpu.matmul %49, %35, %cst_23 {dimension_numbers = #tpu.dot_dimension_numbers<[1], [0], [0], [1], [0, 0, 1, 1], [], []>} : vector<4x4xbf16>, vector<4x8xbf16>, vector<4x8xf32> -> vector<4x8xf32>
    %c0_24 = arith.constant 0 : index
    %c1 = arith.constant 1 : index
    %c0_25 = arith.constant 0 : index
    %c0_26 = arith.constant 0 : index
    %51 = vector.load %arg4[%c0_24, %c1, %c0_25, %c0_26] : memref<1x4x4x8xf32, #tpu.memory_space<vmem>>, vector<1x1x4x8xf32>
    %52 = vector.shape_cast %51 : vector<1x1x4x8xf32> to vector<4x8xf32>
    %53 = vector.shape_cast %50 : vector<4x8xf32> to vector<1x1x4x8xf32>
    tpu.vector_store %arg4[%c0_24, %c1, %c0_25, %c0_26], %53 {strides = array<i32>} : memref<1x4x4x8xf32, #tpu.memory_space<vmem>>, vector<1x1x4x8xf32>,
    %54 = vector.extract_strided_slice %1 {offsets = [2, 0, 0], sizes = [1, 4, 8], strides = [1, 1, 1]} : vector<4x4x8xbf16> to vector<1x4x8xbf16>
    %55 = vector.shape_cast %54 : vector<1x4x8xbf16> to vector<4x8xbf16>
    %56 = vector.extract_strided_slice %3 {offsets = [2, 0, 0], sizes = [1, 4, 8], strides = [1, 1, 1]} : vector<4x4x8xbf16> to vector<1x4x8xbf16>
    %57 = vector.shape_cast %56 : vector<1x4x8xbf16> to vector<4x8xbf16>
    %58 = vector.extract_strided_slice %5 {offsets = [2, 0, 0], sizes = [1, 4, 8], strides = [1, 1, 1]} : vector<4x4x8xbf16> to vector<1x4x8xbf16>
    %59 = vector.shape_cast %58 : vector<1x4x8xbf16> to vector<4x8xbf16>
    %cst_27 = arith.constant dense<0.000000e+00> : vector<4x4xf32>
    %60 = tpu.matmul %55, %57, %cst_27 {dimension_numbers = #tpu.dot_dimension_numbers<[1], [1], [0], [0], [0, 0, 1, 0], [], []>} : vector<4x8xbf16>, vector<4x8xbf16>, vector<4x4xf32> -> vector<4x4xf32>
    %cst_28 = arith.constant 0.353553385 : f32
    %61 = vector.broadcast %cst_28 : f32 to vector<4x4xf32>
    %62 = arith.mulf %60, %61 : vector<4x4xf32>
    %cst_29 = arith.constant dense<0xFF800000> : vector<4xf32>
    %63 = vector.multi_reduction <maximumf>, %62, %cst_29 [1] : vector<4x4xf32> to vector<4xf32>
    %64 = vector.shape_cast %63 : vector<4xf32> to vector<4x1xf32>
    %65 = vector.broadcast %64 : vector<4x1xf32> to vector<4x4xf32>
    %66 = arith.subf %62, %65 : vector<4x4xf32>
    %67 = math.exp %66 : vector<4x4xf32>
    %cst_30 = arith.constant dense<0.000000e+00> : vector<4xf32>
    %68 = vector.multi_reduction <add>, %67, %cst_30 [1] : vector<4x4xf32> to vector<4xf32>
    %69 = vector.shape_cast %68 : vector<4xf32> to vector<4x1xf32>
    %70 = tpu.reciprocal %69 {approx = true} : vector<4x1xf32> -> vector<4x1xf32>
    %71 = vector.broadcast %70 : vector<4x1xf32> to vector<4x4xf32>
    %72 = arith.mulf %67, %71 : vector<4x4xf32>
    %73 = arith.truncf %72 : vector<4x4xf32> to vector<4x4xbf16>
    %cst_31 = arith.constant dense<0.000000e+00> : vector<4x8xf32>
    %74 = tpu.matmul %73, %59, %cst_31 {dimension_numbers = #tpu.dot_dimension_numbers<[1], [0], [0], [1], [0, 0, 1, 1], [], []>} : vector<4x4xbf16>, vector<4x8xbf16>, vector<4x8xf32> -> vector<4x8xf32>
    %c0_32 = arith.constant 0 : index
    %c2 = arith.constant 2 : index
    %c0_33 = arith.constant 0 : index
    %c0_34 = arith.constant 0 : index
    %75 = vector.load %arg4[%c0_32, %c2, %c0_33, %c0_34] : memref<1x4x4x8xf32, #tpu.memory_space<vmem>>, vector<1x1x4x8xf32>
    %76 = vector.shape_cast %75 : vector<1x1x4x8xf32> to vector<4x8xf32>
    %77 = vector.shape_cast %74 : vector<4x8xf32> to vector<1x1x4x8xf32>
    tpu.vector_store %arg4[%c0_32, %c2, %c0_33, %c0_34], %77 {strides = array<i32>} : memref<1x4x4x8xf32, #tpu.memory_space<vmem>>, vector<1x1x4x8xf32>,
    %78 = vector.extract_strided_slice %1 {offsets = [3, 0, 0], sizes = [1, 4, 8], strides = [1, 1, 1]} : vector<4x4x8xbf16> to vector<1x4x8xbf16>
    %79 = vector.shape_cast %78 : vector<1x4x8xbf16> to vector<4x8xbf16>
    %80 = vector.extract_strided_slice %3 {offsets = [3, 0, 0], sizes = [1, 4, 8], strides = [1, 1, 1]} : vector<4x4x8xbf16> to vector<1x4x8xbf16>
    %81 = vector.shape_cast %80 : vector<1x4x8xbf16> to vector<4x8xbf16>
    %82 = vector.extract_strided_slice %5 {offsets = [3, 0, 0], sizes = [1, 4, 8], strides = [1, 1, 1]} : vector<4x4x8xbf16> to vector<1x4x8xbf16>
    %83 = vector.shape_cast %82 : vector<1x4x8xbf16> to vector<4x8xbf16>
    %cst_35 = arith.constant dense<0.000000e+00> : vector<4x4xf32>
    %84 = tpu.matmul %79, %81, %cst_35 {dimension_numbers = #tpu.dot_dimension_numbers<[1], [1], [0], [0], [0, 0, 1, 0], [], []>} : vector<4x8xbf16>, vector<4x8xbf16>, vector<4x4xf32> -> vector<4x4xf32>
    %cst_36 = arith.constant 0.353553385 : f32
    %85 = vector.broadcast %cst_36 : f32 to vector<4x4xf32>
    %86 = arith.mulf %84, %85 : vector<4x4xf32>
    %cst_37 = arith.constant dense<0xFF800000> : vector<4xf32>
    %87 = vector.multi_reduction <maximumf>, %86, %cst_37 [1] : vector<4x4xf32> to vector<4xf32>
    %88 = vector.shape_cast %87 : vector<4xf32> to vector<4x1xf32>
    %89 = vector.broadcast %88 : vector<4x1xf32> to vector<4x4xf32>
    %90 = arith.subf %86, %89 : vector<4x4xf32>
    %91 = math.exp %90 : vector<4x4xf32>
    %cst_38 = arith.constant dense<0.000000e+00> : vector<4xf32>
    %92 = vector.multi_reduction <add>, %91, %cst_38 [1] : vector<4x4xf32> to vector<4xf32>
    %93 = vector.shape_cast %92 : vector<4xf32> to vector<4x1xf32>
    %94 = tpu.reciprocal %93 {approx = true} : vector<4x1xf32> -> vector<4x1xf32>
    %95 = vector.broadcast %94 : vector<4x1xf32> to vector<4x4xf32>
    %96 = arith.mulf %91, %95 : vector<4x4xf32>
    %97 = arith.truncf %96 : vector<4x4xf32> to vector<4x4xbf16>
    %cst_39 = arith.constant dense<0.000000e+00> : vector<4x8xf32>
    %98 = tpu.matmul %97, %83, %cst_39 {dimension_numbers = #tpu.dot_dimension_numbers<[1], [0], [0], [1], [0, 0, 1, 1], [], []>} : vector<4x4xbf16>, vector<4x8xbf16>, vector<4x8xf32> -> vector<4x8xf32>
    %c0_40 = arith.constant 0 : index
    %c3 = arith.constant 3 : index
    %c0_41 = arith.constant 0 : index
    %c0_42 = arith.constant 0 : index
    %99 = vector.load %arg4[%c0_40, %c3, %c0_41, %c0_42] : memref<1x4x4x8xf32, #tpu.memory_space<vmem>>, vector<1x1x4x8xf32>
    %100 = vector.shape_cast %99 : vector<1x1x4x8xf32> to vector<4x8xf32>
    %101 = vector.shape_cast %98 : vector<4x8xf32> to vector<1x1x4x8xf32>
    tpu.vector_store %arg4[%c0_40, %c3, %c0_41, %c0_42], %101 {strides = array<i32>} : memref<1x4x4x8xf32, #tpu.memory_space<vmem>>, vector<1x1x4x8xf32>,
    return
  }
  func.func @transform_0(%arg0: i32) -> (i32, i32, i32, i32) {
    %c0_i32 = arith.constant 0 : i32
    %c0_i32_0 = arith.constant 0 : i32
    %c0_i32_1 = arith.constant 0 : i32
    %c0_i32_2 = arith.constant 0 : i32
    return %arg0, %c0_i32, %c0_i32_0, %c0_i32_1 : i32, i32, i32, i32
  }
  func.func @transform_1(%arg0: i32) -> (i32, i32, i32, i32) {
    %c0_i32 = arith.constant 0 : i32
    %c0_i32_0 = arith.constant 0 : i32
    %c0_i32_1 = arith.constant 0 : i32
    %c0_i32_2 = arith.constant 0 : i32
    return %arg0, %c0_i32, %c0_i32_0, %c0_i32_1 : i32, i32, i32, i32
  }
  func.func @transform_2(%arg0: i32) -> (i32, i32, i32, i32) {
    %c0_i32 = arith.constant 0 : i32
    %c0_i32_0 = arith.constant 0 : i32
    %c0_i32_1 = arith.constant 0 : i32
    %c0_i32_2 = arith.constant 0 : i32
    return %arg0, %c0_i32, %c0_i32_0, %c0_i32_1 : i32, i32, i32, i32
  }
  func.func @transform_3(%arg0: i32) -> (i32, i32, i32, i32) {
    %c0_i32 = arith.constant 0 : i32
    %c0_i32_0 = arith.constant 0 : i32
    %c0_i32_1 = arith.constant 0 : i32
    %c0_i32_2 = arith.constant 0 : i32
    return %arg0, %c0_i32, %c0_i32_0, %c0_i32_1 : i32, i32, i32, i32
  }
}

module attributes {stable_mosaic.version = 11 : i64} {
  func.func @_mm2_kernel(%arg0: i32, %arg1: memref<8x32xbf16, #tpu.memory_space<vmem>>, %arg2: memref<32x128xbf16, #tpu.memory_space<vmem>>, %arg3: memref<1x128xf32, #tpu.memory_space<vmem>>, %arg4: memref<1x128xf32, #tpu.memory_space<vmem>>, %arg5: memref<128x128xbf16, #tpu.memory_space<vmem>>, %arg6: memref<1x128xf32, #tpu.memory_space<vmem>>, %arg7: memref<1x128xf32, #tpu.memory_space<vmem>>, %arg8: memref<8x128xf32, #tpu.memory_space<vmem>>, %arg9: memref<8x128xf32, #tpu.memory_space<vmem>>) attributes {dimension_semantics = [#tpu.dimension_semantics<parallel>], iteration_bounds = array<i64: 1>, scalar_prefetch = 0 : i64, scratch_operands = 0 : i64, tpu.core_type = #tpu.core_type<tc>, window_params = [{transform_indices = @transform_0, window_bounds = array<i64: 8, 32>}, {pipeline_mode = #tpu.pipeline_mode<synchronous>, transform_indices = @transform_1, window_bounds = array<i64: 32, 128>}, {pipeline_mode = #tpu.pipeline_mode<synchronous>, transform_indices = @transform_2, window_bounds = array<i64: 1, 128>}, {pipeline_mode = #tpu.pipeline_mode<synchronous>, transform_indices = @transform_3, window_bounds = array<i64: 1, 128>}, {pipeline_mode = #tpu.pipeline_mode<synchronous>, transform_indices = @transform_4, window_bounds = array<i64: 128, 128>}, {pipeline_mode = #tpu.pipeline_mode<synchronous>, transform_indices = @transform_5, window_bounds = array<i64: 1, 128>}, {pipeline_mode = #tpu.pipeline_mode<synchronous>, transform_indices = @transform_6, window_bounds = array<i64: 1, 128>}, {transform_indices = @transform_7, window_bounds = array<i64: 8, 128>}, {transform_indices = @transform_8, window_bounds = array<i64: 8, 128>}]} {
    %c0 = arith.constant 0 : index
    %c0_0 = arith.constant 0 : index
    %0 = vector.load %arg1[%c0, %c0_0] : memref<8x32xbf16, #tpu.memory_space<vmem>>, vector<8x32xbf16>
    %c0_1 = arith.constant 0 : index
    %c0_2 = arith.constant 0 : index
    %1 = vector.load %arg2[%c0_1, %c0_2] : memref<32x128xbf16, #tpu.memory_space<vmem>>, vector<32x128xbf16>
    %cst = arith.constant dense<0.000000e+00> : vector<8x128xf32>
    %2 = tpu.matmul %0, %1, %cst {dimension_numbers = #tpu.dot_dimension_numbers<[1], [0], [0], [1], [0, 0, 1, 1], [], []>} : vector<8x32xbf16>, vector<32x128xbf16>, vector<8x128xf32> -> vector<8x128xf32>
    %c0_3 = arith.constant 0 : index
    %c0_4 = arith.constant 0 : index
    %3 = vector.load %arg3[%c0_3, %c0_4] : memref<1x128xf32, #tpu.memory_space<vmem>>, vector<1x128xf32>
    %4 = vector.broadcast %3 : vector<1x128xf32> to vector<8x128xf32>
    %5 = arith.mulf %2, %4 : vector<8x128xf32>
    %c0_5 = arith.constant 0 : index
    %c0_6 = arith.constant 0 : index
    %6 = vector.load %arg4[%c0_5, %c0_6] : memref<1x128xf32, #tpu.memory_space<vmem>>, vector<1x128xf32>
    %7 = vector.broadcast %6 : vector<1x128xf32> to vector<8x128xf32>
    %8 = arith.addf %5, %7 : vector<8x128xf32>
    %c0_7 = arith.constant 0 : index
    %c0_8 = arith.constant 0 : index
    %9 = vector.load %arg8[%c0_7, %c0_8] : memref<8x128xf32, #tpu.memory_space<vmem>>, vector<8x128xf32>
    %10 = arith.addf %8, %9 : vector<8x128xf32>
    %11 = arith.truncf %10 : vector<8x128xf32> to vector<8x128xbf16>
    %c0_9 = arith.constant 0 : index
    %c0_10 = arith.constant 0 : index
    %12 = vector.load %arg5[%c0_9, %c0_10] : memref<128x128xbf16, #tpu.memory_space<vmem>>, vector<128x128xbf16>
    %cst_11 = arith.constant dense<0.000000e+00> : vector<8x128xf32>
    %13 = tpu.matmul %11, %12, %cst_11 {dimension_numbers = #tpu.dot_dimension_numbers<[1], [0], [0], [1], [0, 0, 1, 1], [], []>} : vector<8x128xbf16>, vector<128x128xbf16>, vector<8x128xf32> -> vector<8x128xf32>
    %c0_12 = arith.constant 0 : index
    %c0_13 = arith.constant 0 : index
    %14 = vector.load %arg6[%c0_12, %c0_13] : memref<1x128xf32, #tpu.memory_space<vmem>>, vector<1x128xf32>
    %15 = vector.broadcast %14 : vector<1x128xf32> to vector<8x128xf32>
    %16 = arith.mulf %13, %15 : vector<8x128xf32>
    %c0_14 = arith.constant 0 : index
    %c0_15 = arith.constant 0 : index
    %17 = vector.load %arg7[%c0_14, %c0_15] : memref<1x128xf32, #tpu.memory_space<vmem>>, vector<1x128xf32>
    %18 = vector.broadcast %17 : vector<1x128xf32> to vector<8x128xf32>
    %19 = arith.addf %16, %18 : vector<8x128xf32>
    %c0_16 = arith.constant 0 : index
    %c0_17 = arith.constant 0 : index
    %20 = vector.load %arg9[%c0_16, %c0_17] : memref<8x128xf32, #tpu.memory_space<vmem>>, vector<8x128xf32>
    tpu.vector_store %arg9[%c0_16, %c0_17], %19 {strides = array<i32>} : memref<8x128xf32, #tpu.memory_space<vmem>>, vector<8x128xf32>,
    return
  }
  func.func @transform_0(%arg0: i32) -> (i32, i32) {
    %c0_i32 = arith.constant 0 : i32
    %c0_i32_0 = arith.constant 0 : i32
    return %arg0, %c0_i32 : i32, i32
  }
  func.func @transform_1(%arg0: i32) -> (i32, i32) {
    %c0_i32 = arith.constant 0 : i32
    %c0_i32_0 = arith.constant 0 : i32
    %c0_i32_1 = arith.constant 0 : i32
    return %c0_i32, %c0_i32_0 : i32, i32
  }
  func.func @transform_2(%arg0: i32) -> (i32, i32) {
    %c0_i32 = arith.constant 0 : i32
    %c0_i32_0 = arith.constant 0 : i32
    %c0_i32_1 = arith.constant 0 : i32
    return %c0_i32, %c0_i32_0 : i32, i32
  }
  func.func @transform_3(%arg0: i32) -> (i32, i32) {
    %c0_i32 = arith.constant 0 : i32
    %c0_i32_0 = arith.constant 0 : i32
    %c0_i32_1 = arith.constant 0 : i32
    return %c0_i32, %c0_i32_0 : i32, i32
  }
  func.func @transform_4(%arg0: i32) -> (i32, i32) {
    %c0_i32 = arith.constant 0 : i32
    %c0_i32_0 = arith.constant 0 : i32
    %c0_i32_1 = arith.constant 0 : i32
    return %c0_i32, %c0_i32_0 : i32, i32
  }
  func.func @transform_5(%arg0: i32) -> (i32, i32) {
    %c0_i32 = arith.constant 0 : i32
    %c0_i32_0 = arith.constant 0 : i32
    %c0_i32_1 = arith.constant 0 : i32
    return %c0_i32, %c0_i32_0 : i32, i32
  }
  func.func @transform_6(%arg0: i32) -> (i32, i32) {
    %c0_i32 = arith.constant 0 : i32
    %c0_i32_0 = arith.constant 0 : i32
    %c0_i32_1 = arith.constant 0 : i32
    return %c0_i32, %c0_i32_0 : i32, i32
  }
  func.func @transform_7(%arg0: i32) -> (i32, i32) {
    %c0_i32 = arith.constant 0 : i32
    %c0_i32_0 = arith.constant 0 : i32
    return %arg0, %c0_i32 : i32, i32
  }
  func.func @transform_8(%arg0: i32) -> (i32, i32) {
    %c0_i32 = arith.constant 0 : i32
    %c0_i32_0 = arith.constant 0 : i32
    return %arg0, %c0_i32 : i32, i32
  }
}

module attributes {stable_mosaic.version = 11 : i64} {
  func.func @_resize_kernel(%arg0: i32, %arg1: memref<1x8x8xf32, #tpu.memory_space<vmem>>, %arg2: memref<32x8xf32, #tpu.memory_space<vmem>>, %arg3: memref<8x32xf32, #tpu.memory_space<vmem>>, %arg4: memref<1x32x32xf32, #tpu.memory_space<vmem>>) attributes {dimension_semantics = [#tpu.dimension_semantics<parallel>], iteration_bounds = array<i64: 6>, scalar_prefetch = 0 : i64, scratch_operands = 0 : i64, tpu.core_type = #tpu.core_type<tc>, window_params = [{transform_indices = @transform_0, window_bounds = array<i64: 1, 8, 8>}, {pipeline_mode = #tpu.pipeline_mode<synchronous>, transform_indices = @transform_1, window_bounds = array<i64: 32, 8>}, {pipeline_mode = #tpu.pipeline_mode<synchronous>, transform_indices = @transform_2, window_bounds = array<i64: 8, 32>}, {transform_indices = @transform_3, window_bounds = array<i64: 1, 32, 32>}]} {
    %c0 = arith.constant 0 : index
    %c0_0 = arith.constant 0 : index
    %0 = vector.load %arg2[%c0, %c0_0] : memref<32x8xf32, #tpu.memory_space<vmem>>, vector<32x8xf32>
    %c0_1 = arith.constant 0 : index
    %c0_2 = arith.constant 0 : index
    %c0_3 = arith.constant 0 : index
    %1 = vector.load %arg1[%c0_1, %c0_2, %c0_3] : memref<1x8x8xf32, #tpu.memory_space<vmem>>, vector<1x8x8xf32>
    %2 = vector.shape_cast %1 : vector<1x8x8xf32> to vector<8x8xf32>
    %cst = arith.constant dense<0.000000e+00> : vector<32x8xf32>
    %3 = tpu.matmul %0, %2, %cst {dimension_numbers = #tpu.dot_dimension_numbers<[1], [0], [0], [1], [0, 0, 1, 1], [], []>} : vector<32x8xf32>, vector<8x8xf32>, vector<32x8xf32> -> vector<32x8xf32>
    %c0_4 = arith.constant 0 : index
    %c0_5 = arith.constant 0 : index
    %4 = vector.load %arg3[%c0_4, %c0_5] : memref<8x32xf32, #tpu.memory_space<vmem>>, vector<8x32xf32>
    %cst_6 = arith.constant dense<0.000000e+00> : vector<32x32xf32>
    %5 = tpu.matmul %3, %4, %cst_6 {dimension_numbers = #tpu.dot_dimension_numbers<[1], [0], [0], [1], [0, 0, 1, 1], [], []>} : vector<32x8xf32>, vector<8x32xf32>, vector<32x32xf32> -> vector<32x32xf32>
    %c0_7 = arith.constant 0 : index
    %c0_8 = arith.constant 0 : index
    %c0_9 = arith.constant 0 : index
    %6 = vector.load %arg4[%c0_7, %c0_8, %c0_9] : memref<1x32x32xf32, #tpu.memory_space<vmem>>, vector<1x32x32xf32>
    %7 = vector.shape_cast %6 : vector<1x32x32xf32> to vector<32x32xf32>
    %8 = vector.shape_cast %5 : vector<32x32xf32> to vector<1x32x32xf32>
    tpu.vector_store %arg4[%c0_7, %c0_8, %c0_9], %8 {strides = array<i32>} : memref<1x32x32xf32, #tpu.memory_space<vmem>>, vector<1x32x32xf32>,
    return
  }
  func.func @transform_0(%arg0: i32) -> (i32, i32, i32) {
    %c0_i32 = arith.constant 0 : i32
    %c0_i32_0 = arith.constant 0 : i32
    %c0_i32_1 = arith.constant 0 : i32
    return %arg0, %c0_i32, %c0_i32_0 : i32, i32, i32
  }
  func.func @transform_1(%arg0: i32) -> (i32, i32) {
    %c0_i32 = arith.constant 0 : i32
    %c0_i32_0 = arith.constant 0 : i32
    %c0_i32_1 = arith.constant 0 : i32
    return %c0_i32, %c0_i32_0 : i32, i32
  }
  func.func @transform_2(%arg0: i32) -> (i32, i32) {
    %c0_i32 = arith.constant 0 : i32
    %c0_i32_0 = arith.constant 0 : i32
    %c0_i32_1 = arith.constant 0 : i32
    return %c0_i32, %c0_i32_0 : i32, i32
  }
  func.func @transform_3(%arg0: i32) -> (i32, i32, i32) {
    %c0_i32 = arith.constant 0 : i32
    %c0_i32_0 = arith.constant 0 : i32
    %c0_i32_1 = arith.constant 0 : i32
    return %arg0, %c0_i32, %c0_i32_0 : i32, i32, i32
  }
}

</mosaic_0001>

<bundles_post_ra>
// kernel: hrnet_weeder_forward.16
= control target key start
LH: loop header
LB: loop body
LE: loop exit
PB: predicated region body
PF: predicated region fallthrough
CT: control target
= control target key end

     0   :  { %s919_s15 = smov 0   ;;  %s1091_s0 = inlined_call_operand.vmem [shape: bf16[512,36], index: 0, kind: input, shape index: {}]   ;;  %s1092_s1 = inlined_call_operand.vmem [shape: bf16[36,128], index: 1, kind: input, shape index: {}]   ;;  %s1093_s2 = inlined_call_operand.vmem [shape: f32[1,128], index: 2, kind: input, shape index: {}]   ;;  %s1094_s3 = inlined_call_operand.vmem [shape: f32[1,128], index: 3, kind: input, shape index: {}]   ;;  %s1095_s4 = inlined_call_operand.vmem [shape: f32[512,128], index: 4, kind: output, shape index: {}]  }
   0x1 LB: > { %s746_s16 = sadd.s32 4294967295, %s892_s15   ;;  %p750_p0 = scmp.ge.s32.totalorder %s892_s15, 1  ;;  %s892_s15 = sphi %s919_s15, %s14_s15  }
   0x2   : > { %p163_p1 = scmp.lt.s32.totalorder %s892_s15, 3 }
   0x4   : > { %p164_p2 = pnand %p750_p0, %p163_p1 }
   0x5   : > { %v867_v0 = vld [vmem:[%s1092_s1] sm:$0xff] (!%p164_p2)   ;;  %v868_v1 = vld [vmem:[%s1092_s1 + $0x8] sm:$0xff] (!%p164_p2)   ;;  %s751_s21 = sshll.u32 (!%p164_p2), %s746_s16, 5  ;;  %v869_v2 = vld [vmem:[%s1092_s1 + $0x10] ss:$0 sps:$4 sm:$0x33] (!%p164_p2)  }
   0x6   : > { %167 = sbr.rel (%p164_p2) target bundleno = 265 (0x109), region = 36  ;;  %813 = vmatprep.subr.bf16.mxu0 (!%p164_p2), %v867_v0  ;;  %851 = vmatprep.subr.bf16.mxu1 (!%p164_p2), %v867_v0  ;;  %p190_p3 = scmp.lt.s32.totalorder (!%p164_p2), %s751_s21, 63  ;;  %vm383_vm0 = vcmask (!%p164_p2), 1041408   ;;  %vm334_vm1 = vcmask (!%p164_p2), 293888   ;;  %v979_v20 = vld [vmem:[%s1093_s2] ss:$0 sm:$0xff] (!%p164_p2) }
   0x7   : > { %814 = vmatpush3.bf16.msra.mxu0 (!%p164_p2), %v867_v0  ;;  %854 = vmatpush3.bf16.msra.mxu1 (!%p164_p2), %v867_v0  ;;  %v385_v3 = vsel (!%p164_p2), %vm383_vm0, %v869_v2, 0  ;;  %v984_v22 = vld [vmem:[%s1094_s3] ss:$0 sm:$0xff] (!%p164_p2) }
   0x8   : > { %815 = vmatprep.subr.bf16.mxu0 (!%p164_p2), %v868_v1  ;;  %852 = vmatprep.subr.bf16.mxu1 (!%p164_p2), %v868_v1 }
   0xb   : > { %816 = vmatpush3.bf16.msra.mxu0 (!%p164_p2), %v868_v1  ;;  %855 = vmatpush3.bf16.msra.mxu1 (!%p164_p2), %v868_v1 }
   0xc   : > { %857 = vmatprep.subr.msk.bf16.mxu0 (!%p164_p2), %vm383_vm0, %v869_v2  ;;  %858 = vmatprep.subr.msk.bf16.mxu1 (!%p164_p2), %vm383_vm0, %v869_v2 }
   0xd   : > { %s1097_s21 = smov (!%p190_p3, %s751_s21), 63 }
   0xe   : > { %s752_s24 = sshll.u32 %s1097_s21, 2  ;;  %s754_s6 = sshll.u32 %s1097_s21, 3 }
   0xf   : > { %s942_s27 = scalar_lea.vmem %s1091_s0, %s752_s24  ;;  %818 = vmatpush3.bf16.msra.mxu0 %v385_v3  ;;  %856 = vmatpush3.bf16.msra.mxu1 %v385_v3  ;;  %s998_s9 = scalar_lea.vmem %s1095_s4, %s754_s6 }
  0x10   : > { %v870_v4 = vld [vmem:[%s942_s27] sm:$0xff]   ;;  %v872_v6 = vld [vmem:[%s942_s27 + $0x8] sm:$0xff]   ;;  %v874_v8 = vld [vmem:[%s942_s27 + $0x10] sm:$0xff]  }
  0x11   : > { %v871_v5 = vld [vmem:[%s942_s27 + $0x40] sm:$0xff]   ;;  %819 = vmatprep.mubr.msk.bf16.mxu0 %vm334_vm1, %v870_v4  ;;  %v873_v7 = vld [vmem:[%s942_s27 + $0x48] sm:$0xff]   ;;  %v875_v9 = vld [vmem:[%s942_s27 + $0x50] sm:$0xff]  }
  0x12   : > { %835 = vmatprep.mubr.msk.bf16.mxu1 %vm334_vm1, %v871_v5  ;;  %820 = vmatmul.mubr.msk.bf16.vlgmr.msra.gmra.mrb[0].mxu0 %vm334_vm1, %v872_v6  ;;  %v876_v10 = vld [vmem:[%s942_s27 + $0x18] sm:$0xff]   ;;  %v878_v12 = vld [vmem:[%s942_s27 + $0x20] sm:$0xff]   ;;  %v880_v14 = vld [vmem:[%s942_s27 + $0x28] sm:$0xff]  }
  0x13   : > { %836 = vmatmul.mubr.msk.bf16.vlgmr.msra.gmra.mrb[0].mxu1 %vm334_vm1, %v873_v7  ;;  %823 = vmatprep.mubr.msk.bf16.mxu0 %vm334_vm1, %v874_v8  ;;  %v877_v11 = vld [vmem:[%s942_s27 + $0x58] sm:$0xff]   ;;  %v879_v13 = vld [vmem:[%s942_s27 + $0x60] sm:$0xff]   ;;  %v881_v15 = vld [vmem:[%s942_s27 + $0x68] sm:$0xff]  }
  0x14   : > { %839 = vmatprep.mubr.msk.bf16.mxu1 %vm334_vm1, %v875_v9  ;;  %v882_v16 = vld [vmem:[%s942_s27 + $0x30] sm:$0xff]   ;;  %v884_v18 = vld [vmem:[%s942_s27 + $0x38] sm:$0xff]  }
  0x15   : > { %v883_v17 = vld [vmem:[%s942_s27 + $0x70] sm:$0xff]   ;;  %v885_v19 = vld [vmem:[%s942_s27 + $0x78] sm:$0xff]  }
  0x1a   : > { %824 = vmatmul.mubr.msk.bf16.gmra.mrb[4].mxu0 %vm334_vm1, %v876_v10 }
  0x1b   : > { %840 = vmatmul.mubr.msk.bf16.gmra.mrb[4].mxu1 %vm334_vm1, %v877_v11  ;;  %827 = vmatprep.mubr.msk.bf16.mxu0 %vm334_vm1, %v878_v12 }
  0x1c   : > { %843 = vmatprep.mubr.msk.bf16.mxu1 %vm334_vm1, %v879_v13 }
  0x22   : > { %828 = vmatmul.mubr.msk.bf16.gmra.mrb[8].mxu0 %vm334_vm1, %v880_v14 }
  0x23   : > { %844 = vmatmul.mubr.msk.bf16.gmra.mrb[8].mxu1 %vm334_vm1, %v881_v15  ;;  %831 = vmatprep.mubr.msk.bf16.mxu0 %vm334_vm1, %v882_v16 }
  0x24   : > { %847 = vmatprep.mubr.msk.bf16.mxu1 %vm334_vm1, %v883_v17 }
  0x2a   : > { %832 = vmatmul.mubr.msk.bf16.gmra.mrb[12].mxu0 %vm334_vm1, %v884_v18 }
  0x2b   : > { %848 = vmatmul.mubr.msk.bf16.gmra.mrb[12].mxu1 %vm334_vm1, %v885_v19 }
  0xe5   : > { %v821_v21 = vpop.f32.mrb[0].mxu0 }
  0xe6   : > { %v837_v23 = vpop.f32.mrb[0].mxu1  ;;  %v557_v24 = vmul.f32 %v821_v21, %v979_v20  ;;  %v421_v26 = vpop.f32.mrb[1].mxu0 }
  0xe7   : > { %v573_v25 = vmul.f32 %v837_v23, %v979_v20  ;;  %v485_v27 = vpop.f32.mrb[1].mxu1  ;;  %v555_v28 = vmul.f32 %v979_v20, %v421_v26  ;;  %v822_v30 = vpop.f32.mrb[2].mxu0 }
  0xe8   : > { %v571_v29 = vmul.f32 %v979_v20, %v485_v27  ;;  %v838_v31 = vpop.f32.mrb[2].mxu1  ;;  %v596_v32 = vadd.f32 %v984_v22, %v557_v24  ;;  %v558_v34 = vmul.f32 %v822_v30, %v979_v20  ;;  %v424_v36 = vpop.f32.mrb[3].mxu0 }
  0xe9   : > { %v612_v33 = vadd.f32 %v984_v22, %v573_v25  ;;  %v574_v35 = vmul.f32 %v838_v31, %v979_v20  ;;  %v488_v37 = vpop.f32.mrb[3].mxu1  ;;  %v594_v38 = vadd.f32 %v984_v22, %v555_v28  ;;  %v556_v40 = vmul.f32 %v979_v20, %v424_v36 }
  0xea   : > { %v610_v39 = vadd.f32 %v984_v22, %v571_v29  ;;  %v572_v41 = vmul.f32 %v979_v20, %v488_v37  ;;  %v628_v42 = vmax.f32 %v596_v32, 0.0  ;;  %v597_v44 = vadd.f32 %v984_v22, %v558_v34 }
  0xeb   : > { %v644_v43 = vmax.f32 %v612_v33, 0.0  ;;  %v613_v45 = vadd.f32 %v984_v22, %v574_v35  ;;  %v626_v46 = vmax.f32 %v594_v38, 0.0  ;;  %v595_v48 = vadd.f32 %v984_v22, %v556_v40 }
  0xec   : > { %v642_v47 = vmax.f32 %v610_v39, 0.0  ;;  %v611_v49 = vadd.f32 %v984_v22, %v572_v41  ;;  %660 = vst [vmem:[%s998_s9 + $0x10] sm:$0xff] %v628_v42  ;;  %v629_v50 = vmax.f32 %v597_v44, 0.0 }
  0xed   : > { %676 = vst [vmem:[%s998_s9 + $0x90] sm:$0xff] %v644_v43  ;;  %v645_v51 = vmax.f32 %v613_v45, 0.0  ;;  %658 = vst [vmem:[%s998_s9] sm:$0xff] %v626_v46  ;;  %v627_v52 = vmax.f32 %v595_v48, 0.0  ;;  %v825_v54 = vpop.f32.mrb[4].mxu0 }
  0xee   : > { %674 = vst [vmem:[%s998_s9 + $0x80] sm:$0xff] %v642_v47  ;;  %v643_v53 = vmax.f32 %v611_v49, 0.0  ;;  %v841_v55 = vpop.f32.mrb[4].mxu1  ;;  %661 = vst [vmem:[%s998_s9 + $0x18] sm:$0xff] %v629_v50  ;;  %v561_v56 = vmul.f32 %v825_v54, %v979_v20  ;;  %v437_v58 = vpop.f32.mrb[5].mxu0 }
  0xef   : > { %677 = vst [vmem:[%s998_s9 + $0x98] sm:$0xff] %v645_v51  ;;  %v577_v57 = vmul.f32 %v841_v55, %v979_v20  ;;  %v501_v59 = vpop.f32.mrb[5].mxu1  ;;  %659 = vst [vmem:[%s998_s9 + $0x8] sm:$0xff] %v627_v52  ;;  %v559_v60 = vmul.f32 %v979_v20, %v437_v58  ;;  %v826_v62 = vpop.f32.mrb[6].mxu0 }
  0xf0   : > { %675 = vst [vmem:[%s998_s9 + $0x88] sm:$0xff] %v643_v53  ;;  %v575_v61 = vmul.f32 %v979_v20, %v501_v59  ;;  %v842_v63 = vpop.f32.mrb[6].mxu1  ;;  %v600_v0 = vadd.f32 %v984_v22, %v561_v56  ;;  %v562_v2 = vmul.f32 %v826_v62, %v979_v20  ;;  %v440_v4 = vpop.f32.mrb[7].mxu0 }
  0xf1   : > { %v616_v1 = vadd.f32 %v984_v22, %v577_v57  ;;  %v578_v3 = vmul.f32 %v842_v63, %v979_v20  ;;  %v504_v5 = vpop.f32.mrb[7].mxu1  ;;  %v598_v6 = vadd.f32 %v984_v22, %v559_v60  ;;  %v560_v8 = vmul.f32 %v979_v20, %v440_v4 }
  0xf2   : > { %v614_v7 = vadd.f32 %v984_v22, %v575_v61  ;;  %v576_v9 = vmul.f32 %v979_v20, %v504_v5  ;;  %v632_v10 = vmax.f32 %v600_v0, 0.0  ;;  %v601_v12 = vadd.f32 %v984_v22, %v562_v2 }
  0xf3   : > { %v648_v11 = vmax.f32 %v616_v1, 0.0  ;;  %v617_v13 = vadd.f32 %v984_v22, %v578_v3  ;;  %v630_v14 = vmax.f32 %v598_v6, 0.0  ;;  %v599_v16 = vadd.f32 %v984_v22, %v560_v8 }
  0xf4   : > { %v646_v15 = vmax.f32 %v614_v7, 0.0  ;;  %v615_v17 = vadd.f32 %v984_v22, %v576_v9  ;;  %664 = vst [vmem:[%s998_s9 + $0x30] sm:$0xff] %v632_v10  ;;  %v633_v18 = vmax.f32 %v601_v12, 0.0 }
  0xf5   : > { %680 = vst [vmem:[%s998_s9 + $0xb0] sm:$0xff] %v648_v11  ;;  %v649_v19 = vmax.f32 %v617_v13, 0.0  ;;  %662 = vst [vmem:[%s998_s9 + $0x20] sm:$0xff] %v630_v14  ;;  %v631_v21 = vmax.f32 %v599_v16, 0.0  ;;  %v829_v24 = vpop.f32.mrb[8].mxu0 }
  0xf6   : > { %678 = vst [vmem:[%s998_s9 + $0xa0] sm:$0xff] %v646_v15  ;;  %v647_v23 = vmax.f32 %v615_v17, 0.0  ;;  %v845_v25 = vpop.f32.mrb[8].mxu1  ;;  %665 = vst [vmem:[%s998_s9 + $0x38] sm:$0xff] %v633_v18  ;;  %v565_v26 = vmul.f32 %v829_v24, %v979_v20  ;;  %v453_v28 = vpop.f32.mrb[9].mxu0 }
  0xf7   : > { %681 = vst [vmem:[%s998_s9 + $0xb8] sm:$0xff] %v649_v19  ;;  %v581_v27 = vmul.f32 %v845_v25, %v979_v20  ;;  %v517_v29 = vpop.f32.mrb[9].mxu1  ;;  %663 = vst [vmem:[%s998_s9 + $0x28] sm:$0xff] %v631_v21  ;;  %v563_v30 = vmul.f32 %v979_v20, %v453_v28  ;;  %v830_v32 = vpop.f32.mrb[10].mxu0 }
  0xf8   : > { %679 = vst [vmem:[%s998_s9 + $0xa8] sm:$0xff] %v647_v23  ;;  %v579_v31 = vmul.f32 %v979_v20, %v517_v29  ;;  %v846_v33 = vpop.f32.mrb[10].mxu1  ;;  %v604_v34 = vadd.f32 %v984_v22, %v565_v26  ;;  %v566_v36 = vmul.f32 %v830_v32, %v979_v20  ;;  %v456_v38 = vpop.f32.mrb[11].mxu0 }
  0xf9   : > { %v620_v35 = vadd.f32 %v984_v22, %v581_v27  ;;  %v582_v37 = vmul.f32 %v846_v33, %v979_v20  ;;  %v520_v39 = vpop.f32.mrb[11].mxu1  ;;  %v602_v40 = vadd.f32 %v984_v22, %v563_v30  ;;  %v564_v42 = vmul.f32 %v979_v20, %v456_v38 }
  0xfa   : > { %v618_v41 = vadd.f32 %v984_v22, %v579_v31  ;;  %v580_v43 = vmul.f32 %v979_v20, %v520_v39  ;;  %v636_v44 = vmax.f32 %v604_v34, 0.0  ;;  %v605_v46 = vadd.f32 %v984_v22, %v566_v36 }
  0xfb   : > { %v652_v45 = vmax.f32 %v620_v35, 0.0  ;;  %v621_v47 = vadd.f32 %v984_v22, %v582_v37  ;;  %v634_v48 = vmax.f32 %v602_v40, 0.0  ;;  %v603_v50 = vadd.f32 %v984_v22, %v564_v42 }
  0xfc   : > { %v650_v49 = vmax.f32 %v618_v41, 0.0  ;;  %v619_v51 = vadd.f32 %v984_v22, %v580_v43  ;;  %668 = vst [vmem:[%s998_s9 + $0x50] sm:$0xff] %v636_v44  ;;  %v637_v52 = vmax.f32 %v605_v46, 0.0 }
  0xfd   : > { %684 = vst [vmem:[%s998_s9 + $0xd0] sm:$0xff] %v652_v45  ;;  %v653_v53 = vmax.f32 %v621_v47, 0.0  ;;  %666 = vst [vmem:[%s998_s9 + $0x40] sm:$0xff] %v634_v48  ;;  %v635_v54 = vmax.f32 %v603_v50, 0.0  ;;  %v833_v56 = vpop.f32.mrb[12].mxu0 }
  0xfe   : > { %682 = vst [vmem:[%s998_s9 + $0xc0] sm:$0xff] %v650_v49  ;;  %v651_v55 = vmax.f32 %v619_v51, 0.0  ;;  %v849_v57 = vpop.f32.mrb[12].mxu1  ;;  %669 = vst [vmem:[%s998_s9 + $0x58] sm:$0xff] %v637_v52  ;;  %v569_v58 = vmul.f32 %v833_v56, %v979_v20  ;;  %v469_v60 = vpop.f32.mrb[13].mxu0 }
  0xff   : > { %685 = vst [vmem:[%s998_s9 + $0xd8] sm:$0xff] %v653_v53  ;;  %v585_v59 = vmul.f32 %v849_v57, %v979_v20  ;;  %v533_v61 = vpop.f32.mrb[13].mxu1  ;;  %667 = vst [vmem:[%s998_s9 + $0x48] sm:$0xff] %v635_v54  ;;  %v567_v62 = vmul.f32 %v979_v20, %v469_v60  ;;  %v834_v0 = vpop.f32.mrb[14].mxu0 }
 0x100   : > { %683 = vst [vmem:[%s998_s9 + $0xc8] sm:$0xff] %v651_v55  ;;  %v583_v63 = vmul.f32 %v979_v20, %v533_v61  ;;  %v850_v1 = vpop.f32.mrb[14].mxu1  ;;  %v608_v2 = vadd.f32 %v984_v22, %v569_v58  ;;  %v570_v4 = vmul.f32 %v834_v0, %v979_v20  ;;  %v472_v6 = vpop.f32.mrb[15].mxu0 }
 0x101   : > { %v624_v3 = vadd.f32 %v984_v22, %v585_v59  ;;  %v586_v5 = vmul.f32 %v850_v1, %v979_v20  ;;  %v536_v7 = vpop.f32.mrb[15].mxu1  ;;  %v606_v8 = vadd.f32 %v984_v22, %v567_v62  ;;  %v568_v10 = vmul.f32 %v979_v20, %v472_v6 }
 0x102   : > { %v622_v9 = vadd.f32 %v984_v22, %v583_v63  ;;  %v584_v11 = vmul.f32 %v979_v20, %v536_v7  ;;  %v640_v12 = vmax.f32 %v608_v2, 0.0  ;;  %v609_v14 = vadd.f32 %v984_v22, %v570_v4 }
 0x103   : > { %v656_v13 = vmax.f32 %v624_v3, 0.0  ;;  %v625_v15 = vadd.f32 %v984_v22, %v586_v5  ;;  %v638_v16 = vmax.f32 %v606_v8, 0.0  ;;  %v607_v18 = vadd.f32 %v984_v22, %v568_v10 }
 0x104   : > { %v654_v17 = vmax.f32 %v622_v9, 0.0  ;;  %v623_v19 = vadd.f32 %v984_v22, %v584_v11  ;;  %672 = vst [vmem:[%s998_s9 + $0x70] sm:$0xff] %v640_v12  ;;  %v641_v21 = vmax.f32 %v609_v14, 0.0 }
 0x105   : > { %688 = vst [vmem:[%s998_s9 + $0xf0] sm:$0xff] %v656_v13  ;;  %v657_v20 = vmax.f32 %v625_v15, 0.0  ;;  %670 = vst [vmem:[%s998_s9 + $0x60] sm:$0xff] %v638_v16  ;;  %v639_v23 = vmax.f32 %v607_v18, 0.0 }
 0x106   : > { %686 = vst [vmem:[%s998_s9 + $0xe0] sm:$0xff] %v654_v17  ;;  %v655_v24 = vmax.f32 %v623_v19, 0.0  ;;  %673 = vst [vmem:[%s998_s9 + $0x78] sm:$0xff] %v641_v21 }
 0x107   : > { %689 = vst [vmem:[%s998_s9 + $0xf8] sm:$0xff] %v657_v20  ;;  %671 = vst [vmem:[%s998_s9 + $0x68] sm:$0xff] %v639_v23 }
 0x108   : > { %687 = vst [vmem:[%s998_s9 + $0xe8] sm:$0xff] %v655_v24 }
 0x109 PF: > { %s14_s15 = sadd.s32 1, %s892_s15  }
 0x10a   : > { %p11_p4 = scmp.ge.s32.totalorder %s14_s15, 4  }
 0x10c   :  { %13 = sbr.rel (!%p11_p4) target bundleno = 1 (0x1), region = 66 }

// kernel: hrnet_weeder_forward.17
= control target key start
LH: loop header
LB: loop body
LE: loop exit
PB: predicated region body
PF: predicated region fallthrough
CT: control target
= control target key end

     0   :  { %v529_v0 = vmov 0   ;;  %vm214_vm0 = vcmask 719872   ;;  %vm239_vm1 = vcmask 1043456   ;;  %s771_s1 = inlined_call_operand.vmem [shape: bf16[216,128], index: 1, kind: input, shape index: {}]   ;;  %s772_s0 = inlined_call_operand.vmem [shape: bf16[128,216], index: 0, kind: input, shape index: {}]   ;;  %s773_s2 = inlined_call_operand.vmem [shape: f32[1,128], index: 2, kind: input, shape index: {}]   ;;  %s774_s3 = inlined_call_operand.vmem [shape: f32[1,128], index: 3, kind: input, shape index: {}]   ;;  %s775_s4 = inlined_call_operand.vmem [shape: f32[128,128], index: 4, kind: output, shape index: {}]  }
   0x1   :  { %243 = vmatprep.subr.bf16.mxu0 %v529_v0  ;;  %462 = vmatprep.subr.bf16.mxu1 %v529_v0  ;;  %v491_v1 = vld [vmem:[%s771_s1] sm:$0xff]   ;;  %v492_v2 = vld [vmem:[%s771_s1 + $0x8] sm:$0xff]   ;;  %v493_v3 = vld [vmem:[%s771_s1 + $0x10] sm:$0xff]  }
   0x2   :  { %244 = vmatpush1.bf16.msra.mxu0 %v491_v1  ;;  %476 = vmatpush1.bf16.msra.mxu1 %v491_v1  ;;  %v494_v4 = vld [vmem:[%s771_s1 + $0x18] sm:$0xff]   ;;  %v495_v5 = vld [vmem:[%s771_s1 + $0x20] sm:$0xff]   ;;  %v496_v8 = vld [vmem:[%s771_s1 + $0x28] sm:$0xff]  }
   0x3   :  { %245 = vmatprep.subr.bf16.mxu0 %v529_v0  ;;  %463 = vmatprep.subr.bf16.mxu1 %v529_v0  ;;  %v507_v6 = vld [vmem:[%s772_s0 + $0x4] ss:$8 sps:$4 sm:$0xff]   ;;  %v497_v9 = vld [vmem:[%s771_s1 + $0x30] sm:$0xff]   ;;  %v498_v10 = vld [vmem:[%s771_s1 + $0x38] sm:$0xff]  }
   0x4   :  { %452 = vmatprep.mubr.msk.bf16.mxu0 %vm214_vm0, %v507_v6  ;;  %v510_v7 = vld [vmem:[%s772_s0 + $0x44] ss:$8 sps:$4 sm:$0xff]   ;;  %v501_v13 = vld [vmem:[%s771_s1 + $0x50] sm:$0xff]   ;;  %v502_v14 = vld [vmem:[%s771_s1 + $0x58] sm:$0xff]  }
   0x5   :  { %456 = vmatprep.mubr.msk.bf16.mxu1 %vm214_vm0, %v510_v7  ;;  %v499_v11 = vld [vmem:[%s771_s1 + $0x40] sm:$0xff]   ;;  %v500_v12 = vld [vmem:[%s771_s1 + $0x48] sm:$0xff]   ;;  %v511_v20 = vld [vmem:[%s772_s0 + $0x14] ss:$8 sps:$4 sm:$0xff]  }
   0x6   :  { %246 = vmatpush1.bf16.msra.mxu0 %v492_v2  ;;  %477 = vmatpush1.bf16.msra.mxu1 %v492_v2  ;;  %v503_v15 = vld [vmem:[%s771_s1 + $0x60] sm:$0xff]   ;;  %v504_v16 = vld [vmem:[%s771_s1 + $0x68] ss:$0 sps:$4 sm:$0xff]   ;;  %v513_v21 = vld [vmem:[%s772_s0 + $0x54] ss:$8 sps:$4 sm:$0xff]  }
   0x7   :  { %247 = vmatprep.subr.bf16.mxu0 %v529_v0  ;;  %464 = vmatprep.subr.bf16.mxu1 %v529_v0  ;;  %v241_v17 = vsel %vm239_vm1, %v504_v16, 0  ;;  %v505_v18 = vld [vmem:[%s772_s0] ss:$8 sps:$4 sm:$0xff]   ;;  %v515_v22 = vld [vmem:[%s772_s0 + $0x10] ss:$8 sps:$4 sm:$0xff]  }
   0x8   :  { %v508_v19 = vld [vmem:[%s772_s0 + $0x40] ss:$8 sps:$4 sm:$0xff]   ;;  %v516_v23 = vld [vmem:[%s772_s0 + $0x50] ss:$8 sps:$4 sm:$0xff]   ;;  %v517_v24 = vld [vmem:[%s772_s0 + $0x24] ss:$8 sps:$4 sm:$0xff]  }
   0x9   :  { %v519_v25 = vld [vmem:[%s772_s0 + $0x64] ss:$8 sps:$4 sm:$0xff]   ;;  %v521_v26 = vld [vmem:[%s772_s0 + $0x20] ss:$8 sps:$4 sm:$0xff]   ;;  %v523_v28 = vld [vmem:[%s772_s0 + $0x34] ss:$8 sps:$4 sm:$0xff]  }
   0xa   :  { %248 = vmatpush1.bf16.msra.mxu0 %v493_v3  ;;  %478 = vmatpush1.bf16.msra.mxu1 %v493_v3  ;;  %v522_v27 = vld [vmem:[%s772_s0 + $0x60] ss:$8 sps:$4 sm:$0xff]   ;;  %v525_v29 = vld [vmem:[%s772_s0 + $0x74] ss:$8 sps:$4 sm:$0xff]   ;;  %v527_v30 = vld [vmem:[%s772_s0 + $0x30] ss:$8 sps:$4 sm:$0xff]  }
   0xb   :  { %249 = vmatprep.subr.bf16.mxu0 %v529_v0  ;;  %465 = vmatprep.subr.bf16.mxu1 %v529_v0  ;;  %v528_v31 = vld [vmem:[%s772_s0 + $0x70] ss:$8 sps:$4 sm:$0xff]   ;;  %v684_v32 = vld [vmem:[%s773_s2] ss:$0 sm:$0xff] }
   0xc   :  { %v689_v34 = vld [vmem:[%s774_s3] ss:$0 sm:$0xff] }
   0xe   :  { %250 = vmatpush1.bf16.msra.mxu0 %v494_v4  ;;  %479 = vmatpush1.bf16.msra.mxu1 %v494_v4 }
   0xf   :  { %251 = vmatprep.subr.bf16.mxu0 %v529_v0  ;;  %466 = vmatprep.subr.bf16.mxu1 %v529_v0 }
  0x12   :  { %252 = vmatpush1.bf16.msra.mxu0 %v495_v5  ;;  %480 = vmatpush1.bf16.msra.mxu1 %v495_v5 }
  0x13   :  { %253 = vmatprep.subr.bf16.mxu0 %v529_v0  ;;  %467 = vmatprep.subr.bf16.mxu1 %v529_v0 }
  0x16   :  { %254 = vmatpush1.bf16.msra.mxu0 %v496_v8  ;;  %481 = vmatpush1.bf16.msra.mxu1 %v496_v8 }
  0x17   :  { %255 = vmatprep.subr.bf16.mxu0 %v529_v0  ;;  %468 = vmatprep.subr.bf16.mxu1 %v529_v0 }
  0x1a   :  { %256 = vmatpush1.bf16.msra.mxu0 %v497_v9  ;;  %482 = vmatpush1.bf16.msra.mxu1 %v497_v9 }
  0x1b   :  { %257 = vmatprep.subr.bf16.mxu0 %v529_v0  ;;  %469 = vmatprep.subr.bf16.mxu1 %v529_v0 }
  0x1e   :  { %258 = vmatpush1.bf16.msra.mxu0 %v498_v10  ;;  %483 = vmatpush1.bf16.msra.mxu1 %v498_v10 }
  0x1f   :  { %259 = vmatprep.subr.bf16.mxu0 %v529_v0  ;;  %470 = vmatprep.subr.bf16.mxu1 %v529_v0 }
  0x22   :  { %260 = vmatpush1.bf16.msra.mxu0 %v499_v11  ;;  %484 = vmatpush1.bf16.msra.mxu1 %v499_v11 }
  0x23   :  { %261 = vmatprep.subr.bf16.mxu0 %v529_v0  ;;  %471 = vmatprep.subr.bf16.mxu1 %v529_v0 }
  0x26   :  { %262 = vmatpush1.bf16.msra.mxu0 %v500_v12  ;;  %485 = vmatpush1.bf16.msra.mxu1 %v500_v12 }
  0x27   :  { %263 = vmatprep.subr.bf16.mxu0 %v529_v0  ;;  %472 = vmatprep.subr.bf16.mxu1 %v529_v0 }
  0x2a   :  { %264 = vmatpush1.bf16.msra.mxu0 %v501_v13  ;;  %486 = vmatpush1.bf16.msra.mxu1 %v501_v13 }
  0x2b   :  { %265 = vmatprep.subr.bf16.mxu0 %v529_v0  ;;  %473 = vmatprep.subr.bf16.mxu1 %v529_v0 }
  0x2e   :  { %266 = vmatpush1.bf16.msra.mxu0 %v502_v14  ;;  %487 = vmatpush1.bf16.msra.mxu1 %v502_v14 }
  0x2f   :  { %267 = vmatprep.subr.bf16.mxu0 %v529_v0  ;;  %474 = vmatprep.subr.bf16.mxu1 %v529_v0 }
  0x32   :  { %268 = vmatpush1.bf16.msra.mxu0 %v503_v15  ;;  %488 = vmatpush1.bf16.msra.mxu1 %v503_v15 }
  0x33   :  { %269 = vmatprep.subr.bf16.mxu0 %v529_v0  ;;  %475 = vmatprep.subr.bf16.mxu1 %v529_v0 }
  0x36   :  { %270 = vmatpush1.bf16.msra.mxu0 %v241_v17  ;;  %489 = vmatpush1.bf16.msra.mxu1 %v241_v17 }
  0x39   :  { %276 = vmatmul.mubr.bf16.vlgmr.msra.gmra.mrb[0].mxu0 %v505_v18  ;;  %308 = vmatmul.mubr.bf16.vlgmr.msra.gmra.mrb[0].mxu1 %v508_v19 }
  0x3a   :  { %453 = vmatprep.mubr.msk.bf16.mxu0 %vm214_vm0, %v511_v20  ;;  %457 = vmatprep.mubr.msk.bf16.mxu1 %vm214_vm0, %v513_v21 }
  0x41   :  { %284 = vmatmul.mubr.bf16.gmra.mrb[4].mxu0 %v515_v22  ;;  %316 = vmatmul.mubr.bf16.gmra.mrb[4].mxu1 %v516_v23 }
  0x42   :  { %454 = vmatprep.mubr.msk.bf16.mxu0 %vm214_vm0, %v517_v24  ;;  %458 = vmatprep.mubr.msk.bf16.mxu1 %vm214_vm0, %v519_v25 }
  0x49   :  { %292 = vmatmul.mubr.bf16.gmra.mrb[8].mxu0 %v521_v26  ;;  %324 = vmatmul.mubr.bf16.gmra.mrb[8].mxu1 %v522_v27 }
  0x4a   :  { %455 = vmatprep.mubr.msk.bf16.mxu0 %vm214_vm0, %v523_v28  ;;  %459 = vmatprep.mubr.msk.bf16.mxu1 %vm214_vm0, %v525_v29 }
  0x51   :  { %300 = vmatmul.mubr.bf16.gmra.mrb[12].mxu0 %v527_v30  ;;  %332 = vmatmul.mubr.bf16.gmra.mrb[12].mxu1 %v528_v31 }
 0x10c   :  { %v277_v33 = vpop.f32.mrb[0].mxu0  ;;  %v309_v35 = vpop.f32.mrb[0].mxu1 }
 0x10d   :  { %v347_v36 = vmul.f32 %v684_v32, %v277_v33  ;;  %v355_v37 = vmul.f32 %v684_v32, %v309_v35  ;;  %v279_v38 = vpop.f32.mrb[1].mxu0  ;;  %v311_v39 = vpop.f32.mrb[1].mxu1 }
 0x10e   :  { %v280_v40 = vpop.f32.mrb[2].mxu0  ;;  %v312_v41 = vpop.f32.mrb[2].mxu1 }
 0x10f   :  { %v370_v42 = vadd.f32 %v689_v34, %v347_v36  ;;  %v378_v43 = vadd.f32 %v689_v34, %v355_v37  ;;  %v348_v44 = vmul.f32 %v684_v32, %v280_v40  ;;  %v356_v45 = vmul.f32 %v684_v32, %v312_v41  ;;  %v282_v46 = vpop.f32.mrb[3].mxu0  ;;  %v314_v47 = vpop.f32.mrb[3].mxu1 }
 0x111   :  { %v386_v48 = vmax.f32 %v370_v42, 0.0  ;;  %v394_v49 = vmax.f32 %v378_v43, 0.0  ;;  %v371_v50 = vadd.f32 %v689_v34, %v348_v44  ;;  %v379_v51 = vadd.f32 %v689_v34, %v356_v45 }
 0x113   :  { %402 = vst [vmem:[%s775_s4] sm:$0xff] %v386_v48  ;;  %410 = vst [vmem:[%s775_s4 + $0x40] sm:$0xff] %v394_v49  ;;  %v387_v52 = vmax.f32 %v371_v50, 0.0  ;;  %v395_v53 = vmax.f32 %v379_v51, 0.0 }
 0x114   :  { %v285_v54 = vpop.f32.mrb[4].mxu0  ;;  %v317_v55 = vpop.f32.mrb[4].mxu1 }
 0x115   :  { %403 = vst [vmem:[%s775_s4 + $0x8] sm:$0xff] %v387_v52  ;;  %411 = vst [vmem:[%s775_s4 + $0x48] sm:$0xff] %v395_v53  ;;  %v349_v56 = vmul.f32 %v684_v32, %v285_v54  ;;  %v357_v57 = vmul.f32 %v684_v32, %v317_v55  ;;  %v287_v58 = vpop.f32.mrb[5].mxu0  ;;  %v319_v59 = vpop.f32.mrb[5].mxu1 }
 0x116   :  { %v288_v60 = vpop.f32.mrb[6].mxu0  ;;  %v320_v61 = vpop.f32.mrb[6].mxu1 }
 0x117   :  { %v372_v62 = vadd.f32 %v689_v34, %v349_v56  ;;  %v380_v63 = vadd.f32 %v689_v34, %v357_v57  ;;  %v350_v0 = vmul.f32 %v684_v32, %v288_v60  ;;  %v358_v1 = vmul.f32 %v684_v32, %v320_v61  ;;  %v290_v2 = vpop.f32.mrb[7].mxu0  ;;  %v322_v3 = vpop.f32.mrb[7].mxu1 }
 0x119   :  { %v388_v4 = vmax.f32 %v372_v62, 0.0  ;;  %v396_v5 = vmax.f32 %v380_v63, 0.0  ;;  %v373_v6 = vadd.f32 %v689_v34, %v350_v0  ;;  %v381_v7 = vadd.f32 %v689_v34, %v358_v1 }
 0x11b   :  { %404 = vst [vmem:[%s775_s4 + $0x10] sm:$0xff] %v388_v4  ;;  %412 = vst [vmem:[%s775_s4 + $0x50] sm:$0xff] %v396_v5  ;;  %v389_v8 = vmax.f32 %v373_v6, 0.0  ;;  %v397_v9 = vmax.f32 %v381_v7, 0.0 }
 0x11c   :  { %v293_v10 = vpop.f32.mrb[8].mxu0  ;;  %v325_v11 = vpop.f32.mrb[8].mxu1 }
 0x11d   :  { %405 = vst [vmem:[%s775_s4 + $0x18] sm:$0xff] %v389_v8  ;;  %413 = vst [vmem:[%s775_s4 + $0x58] sm:$0xff] %v397_v9  ;;  %v351_v12 = vmul.f32 %v684_v32, %v293_v10  ;;  %v359_v13 = vmul.f32 %v684_v32, %v325_v11  ;;  %v295_v14 = vpop.f32.mrb[9].mxu0  ;;  %v327_v15 = vpop.f32.mrb[9].mxu1 }
 0x11e   :  { %v296_v16 = vpop.f32.mrb[10].mxu0  ;;  %v328_v17 = vpop.f32.mrb[10].mxu1 }
 0x11f   :  { %v374_v18 = vadd.f32 %v689_v34, %v351_v12  ;;  %v382_v19 = vadd.f32 %v689_v34, %v359_v13  ;;  %v352_v20 = vmul.f32 %v684_v32, %v296_v16  ;;  %v360_v21 = vmul.f32 %v684_v32, %v328_v17  ;;  %v298_v22 = vpop.f32.mrb[11].mxu0  ;;  %v330_v23 = vpop.f32.mrb[11].mxu1 }
 0x121   :  { %v390_v24 = vmax.f32 %v374_v18, 0.0  ;;  %v398_v25 = vmax.f32 %v382_v19, 0.0  ;;  %v375_v26 = vadd.f32 %v689_v34, %v352_v20  ;;  %v383_v27 = vadd.f32 %v689_v34, %v360_v21 }
 0x123   :  { %406 = vst [vmem:[%s775_s4 + $0x20] sm:$0xff] %v390_v24  ;;  %414 = vst [vmem:[%s775_s4 + $0x60] sm:$0xff] %v398_v25  ;;  %v391_v28 = vmax.f32 %v375_v26, 0.0  ;;  %v399_v29 = vmax.f32 %v383_v27, 0.0 }
 0x124   :  { %v301_v30 = vpop.f32.mrb[12].mxu0  ;;  %v333_v31 = vpop.f32.mrb[12].mxu1 }
 0x125   :  { %407 = vst [vmem:[%s775_s4 + $0x28] sm:$0xff] %v391_v28  ;;  %415 = vst [vmem:[%s775_s4 + $0x68] sm:$0xff] %v399_v29  ;;  %v353_v33 = vmul.f32 %v684_v32, %v301_v30  ;;  %v361_v35 = vmul.f32 %v684_v32, %v333_v31  ;;  %v303_v36 = vpop.f32.mrb[13].mxu0  ;;  %v335_v37 = vpop.f32.mrb[13].mxu1 }
 0x126   :  { %v304_v38 = vpop.f32.mrb[14].mxu0  ;;  %v336_v39 = vpop.f32.mrb[14].mxu1 }
 0x127   :  { %v376_v40 = vadd.f32 %v689_v34, %v353_v33  ;;  %v384_v41 = vadd.f32 %v689_v34, %v361_v35  ;;  %v354_v42 = vmul.f32 %v684_v32, %v304_v38  ;;  %v362_v43 = vmul.f32 %v684_v32, %v336_v39  ;;  %v306_v44 = vpop.f32.mrb[15].mxu0  ;;  %v338_v45 = vpop.f32.mrb[15].mxu1 }
 0x129   :  { %v392_v46 = vmax.f32 %v376_v40, 0.0  ;;  %v400_v47 = vmax.f32 %v384_v41, 0.0  ;;  %v377_v48 = vadd.f32 %v689_v34, %v354_v42  ;;  %v385_v49 = vadd.f32 %v689_v34, %v362_v43 }
 0x12b   :  { %408 = vst [vmem:[%s775_s4 + $0x30] sm:$0xff] %v392_v46  ;;  %416 = vst [vmem:[%s775_s4 + $0x70] sm:$0xff] %v400_v47  ;;  %v393_v50 = vmax.f32 %v377_v48, 0.0  ;;  %v401_v51 = vmax.f32 %v385_v49, 0.0 }
 0x12d   :  { %409 = vst [vmem:[%s775_s4 + $0x38] sm:$0xff] %v393_v50  ;;  %417 = vst [vmem:[%s775_s4 + $0x78] sm:$0xff] %v401_v51 }

// kernel: hrnet_weeder_forward.18
= control target key start
LH: loop header
LB: loop body
LE: loop exit
PB: predicated region body
PF: predicated region fallthrough
CT: control target
= control target key end

     0   :  { %v928_v0 = vmov 0   ;;  %vm418_vm0 = vcmask 392192   ;;  %s1240_s1 = inlined_call_operand.vmem [shape: bf16[432,128], index: 1, kind: input, shape index: {}]   ;;  %s1241_s0 = inlined_call_operand.vmem [shape: bf16[128,432], index: 0, kind: input, shape index: {}]   ;;  %s1242_s2 = inlined_call_operand.vmem [shape: f32[1,128], index: 2, kind: input, shape index: {}]   ;;  %s1243_s3 = inlined_call_operand.vmem [shape: f32[1,128], index: 3, kind: input, shape index: {}]   ;;  %s1244_s4 = inlined_call_operand.vmem [shape: f32[128,128], index: 4, kind: output, shape index: {}]  }
   0x1   :  { %540 = vmatprep.subr.bf16.mxu1 %v928_v0  ;;  %v853_v1 = vld [vmem:[%s1240_s1 + $0x80] sm:$0xff]   ;;  %v854_v2 = vld [vmem:[%s1240_s1 + $0x88] sm:$0xff]   ;;  %v857_v5 = vld [vmem:[%s1240_s1 + $0x90] sm:$0xff]  }
   0x2   :  { %541 = vmatpush1.bf16.msra.mxu1 %v853_v1  ;;  %v855_v3 = vld [vmem:[%s1240_s1 + $0x40] sm:$0xff]   ;;  %v858_v6 = vld [vmem:[%s1240_s1 + $0x48] sm:$0xff]   ;;  %v861_v8 = vld [vmem:[%s1240_s1 + $0x50] sm:$0xff]  }
   0x3   :  { %542 = vmatprep.subr.bf16.mxu1 %v928_v0  ;;  %v856_v4 = vld [vmem:[%s1240_s1] sm:$0xff]   ;;  %788 = vmatprep.subr.bf16.mxu0 %v855_v3  ;;  %v859_v7 = vld [vmem:[%s1240_s1 + $0x8] sm:$0xff]   ;;  %v862_v9 = vld [vmem:[%s1240_s1 + $0x10] sm:$0xff]  }
   0x4   :  { %789 = vmatpush3.bf16.msra.mxu0 %v856_v4  ;;  %v860_v10 = vld [vmem:[%s1240_s1 + $0x98] sm:$0xff]   ;;  %v863_v12 = vld [vmem:[%s1240_s1 + $0xa0] sm:$0xff]   ;;  %v866_v15 = vld [vmem:[%s1240_s1 + $0xa8] sm:$0xff]  }
   0x5   :  { %790 = vmatprep.subr.bf16.mxu0 %v858_v6  ;;  %v864_v11 = vld [vmem:[%s1240_s1 + $0x58] sm:$0xff]   ;;  %v867_v14 = vld [vmem:[%s1240_s1 + $0x60] sm:$0xff]   ;;  %v870_v17 = vld [vmem:[%s1240_s1 + $0x68] sm:$0xff]  }
   0x6   :  { %543 = vmatpush1.bf16.msra.mxu1 %v854_v2  ;;  %v865_v13 = vld [vmem:[%s1240_s1 + $0x18] sm:$0xff]   ;;  %v868_v16 = vld [vmem:[%s1240_s1 + $0x20] sm:$0xff]   ;;  %v869_v18 = vld [vmem:[%s1240_s1 + $0xb0] sm:$0xff]  }
   0x7   :  { %544 = vmatprep.subr.bf16.mxu1 %v928_v0  ;;  %v871_v19 = vld [vmem:[%s1240_s1 + $0x28] sm:$0xff]   ;;  %v873_v20 = vld [vmem:[%s1240_s1 + $0x70] sm:$0xff]   ;;  %v872_v21 = vld [vmem:[%s1240_s1 + $0xb8] sm:$0xff]  }
   0x8   :  { %791 = vmatpush3.bf16.msra.mxu0 %v859_v7  ;;  %v874_v22 = vld [vmem:[%s1240_s1 + $0x30] sm:$0xff]   ;;  %v876_v23 = vld [vmem:[%s1240_s1 + $0x78] sm:$0xff]   ;;  %v875_v27 = vld [vmem:[%s1240_s1 + $0xc0] sm:$0xff]  }
   0x9   :  { %792 = vmatprep.subr.bf16.mxu0 %v861_v8  ;;  %v880_v24 = vld [vmem:[%s1241_s0 + $0x4] ss:$16 sps:$4 sm:$0xff]   ;;  %v877_v25 = vld [vmem:[%s1240_s1 + $0x38] sm:$0xff]   ;;  %v878_v28 = vld [vmem:[%s1241_s0] ss:$16 sps:$4 sm:$0xff]  }
   0xa   :  { %545 = vmatpush1.bf16.msra.mxu1 %v857_v5  ;;  %475 = vmatprep.mubr.bf16.mxu0 %v880_v24  ;;  %v885_v26 = vld [vmem:[%s1241_s0 + $0xc] ss:$16 sps:$4 sm:$0xff]   ;;  %v886_v29 = vld [vmem:[%s1241_s0 + $0x24] ss:$16 sps:$4 sm:$0xff]   ;;  %v888_v32 = vld [vmem:[%s1241_s0 + $0x20] ss:$16 sps:$4 sm:$0xff]  }
   0xb   :  { %546 = vmatprep.subr.bf16.mxu1 %v928_v0  ;;  %778 = vmatprep.mubr.msk.bf16.mxu1 %vm418_vm0, %v885_v26  ;;  %v881_v30 = vld [vmem:[%s1240_s1 + $0xc8] sm:$0xff]   ;;  %v882_v31 = vld [vmem:[%s1240_s1 + $0xd0] sm:$0xff]   ;;  %v1153_v4 = vld [vmem:[%s1242_s2] ss:$0 sm:$0xff] }
   0xc   :  { %793 = vmatpush3.bf16.msra.mxu0 %v862_v9  ;;  %v883_v33 = vld [vmem:[%s1241_s0 + $0x8] ss:$16 sps:$4 sm:$0xff]   ;;  %v892_v34 = vld [vmem:[%s1241_s0 + $0x44] ss:$16 sps:$4 sm:$0xff]   ;;  %v889_v35 = vld [vmem:[%s1241_s0 + $0x2c] ss:$16 sps:$4 sm:$0xff]  }
   0xd   :  { %794 = vmatprep.subr.bf16.mxu0 %v864_v11  ;;  %v894_v36 = vld [vmem:[%s1241_s0 + $0x40] ss:$16 sps:$4 sm:$0xff]   ;;  %v891_v37 = vld [vmem:[%s1241_s0 + $0x28] ss:$16 sps:$4 sm:$0xff]   ;;  %v898_v38 = vld [vmem:[%s1241_s0 + $0x64] ss:$16 sps:$4 sm:$0xff]  }
   0xe   :  { %547 = vmatpush1.bf16.msra.mxu1 %v860_v10  ;;  %v895_v39 = vld [vmem:[%s1241_s0 + $0x4c] ss:$16 sps:$4 sm:$0xff]   ;;  %v900_v40 = vld [vmem:[%s1241_s0 + $0x60] ss:$16 sps:$4 sm:$0xff]   ;;  %v897_v41 = vld [vmem:[%s1241_s0 + $0x48] ss:$16 sps:$4 sm:$0xff]  }
   0xf   :  { %548 = vmatprep.subr.bf16.mxu1 %v928_v0  ;;  %v904_v42 = vld [vmem:[%s1241_s0 + $0x84] ss:$16 sps:$4 sm:$0xff]   ;;  %v901_v43 = vld [vmem:[%s1241_s0 + $0x6c] ss:$16 sps:$4 sm:$0xff]   ;;  %v906_v44 = vld [vmem:[%s1241_s0 + $0x80] ss:$16 sps:$4 sm:$0xff]  }
  0x10   :  { %795 = vmatpush3.bf16.msra.mxu0 %v865_v13  ;;  %v903_v45 = vld [vmem:[%s1241_s0 + $0x68] ss:$16 sps:$4 sm:$0xff]   ;;  %v910_v46 = vld [vmem:[%s1241_s0 + $0xa4] ss:$16 sps:$4 sm:$0xff]   ;;  %v907_v47 = vld [vmem:[%s1241_s0 + $0x8c] ss:$16 sps:$4 sm:$0xff]  }
  0x11   :  { %796 = vmatprep.subr.bf16.mxu0 %v867_v14  ;;  %v912_v48 = vld [vmem:[%s1241_s0 + $0xa0] ss:$16 sps:$4 sm:$0xff]   ;;  %v909_v49 = vld [vmem:[%s1241_s0 + $0x88] ss:$16 sps:$4 sm:$0xff]   ;;  %v916_v50 = vld [vmem:[%s1241_s0 + $0xc4] ss:$16 sps:$4 sm:$0xff]  }
  0x12   :  { %549 = vmatpush1.bf16.msra.mxu1 %v863_v12  ;;  %v913_v51 = vld [vmem:[%s1241_s0 + $0xac] ss:$16 sps:$4 sm:$0xff]   ;;  %v918_v52 = vld [vmem:[%s1241_s0 + $0xc0] ss:$16 sps:$4 sm:$0xff]   ;;  %v915_v53 = vld [vmem:[%s1241_s0 + $0xa8] ss:$16 sps:$4 sm:$0xff]  }
  0x13   :  { %550 = vmatprep.subr.bf16.mxu1 %v928_v0  ;;  %v922_v54 = vld [vmem:[%s1241_s0 + $0xe4] ss:$16 sps:$4 sm:$0xff]   ;;  %v919_v55 = vld [vmem:[%s1241_s0 + $0xcc] ss:$16 sps:$4 sm:$0xff]   ;;  %v924_v56 = vld [vmem:[%s1241_s0 + $0xe0] ss:$16 sps:$4 sm:$0xff]  }
  0x14   :  { %797 = vmatpush3.bf16.msra.mxu0 %v868_v16  ;;  %v921_v57 = vld [vmem:[%s1241_s0 + $0xc8] ss:$16 sps:$4 sm:$0xff]   ;;  %v925_v58 = vld [vmem:[%s1241_s0 + $0xec] ss:$16 sps:$4 sm:$0xff]   ;;  %v1158_v10 = vld [vmem:[%s1243_s3] ss:$0 sm:$0xff] }
  0x15   :  { %798 = vmatprep.subr.bf16.mxu0 %v870_v17  ;;  %v927_v59 = vld [vmem:[%s1241_s0 + $0xe8] ss:$16 sps:$4 sm:$0xff]  }
  0x16   :  { %551 = vmatpush1.bf16.msra.mxu1 %v866_v15 }
  0x17   :  { %552 = vmatprep.subr.bf16.mxu1 %v928_v0 }
  0x18   :  { %799 = vmatpush3.bf16.msra.mxu0 %v871_v19 }
  0x19   :  { %800 = vmatprep.subr.bf16.mxu0 %v873_v20 }
  0x1a   :  { %553 = vmatpush1.bf16.msra.mxu1 %v869_v18 }
  0x1b   :  { %554 = vmatprep.subr.bf16.mxu1 %v928_v0 }
  0x1c   :  { %801 = vmatpush3.bf16.msra.mxu0 %v874_v22 }
  0x1d   :  { %802 = vmatprep.subr.bf16.mxu0 %v876_v23 }
  0x1e   :  { %555 = vmatpush1.bf16.msra.mxu1 %v872_v21 }
  0x1f   :  { %556 = vmatprep.subr.bf16.mxu1 %v928_v0 }
  0x20   :  { %803 = vmatpush3.bf16.msra.mxu0 %v877_v25 }
  0x22   :  { %557 = vmatpush1.bf16.msra.mxu1 %v875_v27 }
  0x23   :  { %558 = vmatprep.subr.bf16.mxu1 %v928_v0  ;;  %476 = vmatmul.mubr.bf16.vlgmr.msra.gmra.mrb[0].mxu0 %v878_v28 }
  0x24   :  { %483 = vmatprep.mubr.bf16.mxu0 %v886_v29 }
  0x26   :  { %559 = vmatpush1.bf16.msra.mxu1 %v881_v30 }
  0x27   :  { %560 = vmatprep.subr.bf16.mxu1 %v928_v0 }
  0x2a   :  { %561 = vmatpush1.bf16.msra.mxu1 %v882_v31 }
  0x2b   :  { %484 = vmatmul.mubr.bf16.gmra.mrb[4].mxu0 %v888_v32 }
  0x2c   :  { %491 = vmatprep.mubr.bf16.mxu0 %v892_v34 }
  0x2d   :  { %573 = vmatmul.mubr.bf16.vlgmr.msra.gmra.mrb[0].mxu1 %v883_v33 }
  0x2e   :  { %779 = vmatprep.mubr.msk.bf16.mxu1 %vm418_vm0, %v889_v35 }
  0x33   :  { %492 = vmatmul.mubr.bf16.gmra.mrb[8].mxu0 %v894_v36 }
  0x34   :  { %499 = vmatprep.mubr.bf16.mxu0 %v898_v38 }
  0x35   :  { %581 = vmatmul.mubr.bf16.gmra.mrb[4].mxu1 %v891_v37 }
  0x36   :  { %780 = vmatprep.mubr.msk.bf16.mxu1 %vm418_vm0, %v895_v39 }
  0x3b   :  { %500 = vmatmul.mubr.bf16.gmra.mrb[12].mxu0 %v900_v40 }
  0x3c   :  { %507 = vmatprep.mubr.bf16.mxu0 %v904_v42 }
  0x3d   :  { %589 = vmatmul.mubr.bf16.gmra.mrb[8].mxu1 %v897_v41 }
  0x3e   :  { %781 = vmatprep.mubr.msk.bf16.mxu1 %vm418_vm0, %v901_v43 }
  0x43   :  { %508 = vmatmul.mubr.bf16.gmra.mrb[16].mxu0 %v906_v44 }
  0x44   :  { %515 = vmatprep.mubr.bf16.mxu0 %v910_v46 }
  0x45   :  { %597 = vmatmul.mubr.bf16.gmra.mrb[12].mxu1 %v903_v45 }
  0x46   :  { %782 = vmatprep.mubr.msk.bf16.mxu1 %vm418_vm0, %v907_v47 }
  0x4b   :  { %516 = vmatmul.mubr.bf16.gmra.mrb[20].mxu0 %v912_v48 }
  0x4c   :  { %523 = vmatprep.mubr.bf16.mxu0 %v916_v50 }
  0x4d   :  { %605 = vmatmul.mubr.bf16.gmra.mrb[16].mxu1 %v909_v49 }
  0x4e   :  { %783 = vmatprep.mubr.msk.bf16.mxu1 %vm418_vm0, %v913_v51 }
  0x53   :  { %524 = vmatmul.mubr.bf16.gmra.mrb[24].mxu0 %v918_v52 }
  0x54   :  { %531 = vmatprep.mubr.bf16.mxu0 %v922_v54 }
  0x55   :  { %613 = vmatmul.mubr.bf16.gmra.mrb[20].mxu1 %v915_v53 }
  0x56   :  { %784 = vmatprep.mubr.msk.bf16.mxu1 %vm418_vm0, %v919_v55 }
  0x5b   :  { %532 = vmatmul.mubr.bf16.gmra.mrb[28].mxu0 %v924_v56 }
  0x5d   :  { %621 = vmatmul.mubr.bf16.gmra.mrb[24].mxu1 %v921_v57 }
  0x5e   :  { %785 = vmatprep.mubr.msk.bf16.mxu1 %vm418_vm0, %v925_v58 }
  0x65   :  { %629 = vmatmul.mubr.bf16.gmra.mrb[28].mxu1 %v927_v59 }
  0xf6   :  { %v804_v60 = vpop.f32.mrb[0].mxu0 }
  0xf7   :  { %v805_v61 = vpop.f32.mrb[1].mxu0 }
  0xf8   :  { %v806_v62 = vadd.f32 %v805_v61, %v804_v60  ;;  %v807_v63 = vpop.f32.mrb[2].mxu0 }
  0xf9   :  { %v808_v0 = vpop.f32.mrb[3].mxu0 }
  0xfa   :  { %v809_v1 = vadd.f32 %v808_v0, %v807_v63 }
  0xfe   :  { %v810_v2 = vpop.f32.mrb[4].mxu0 }
  0xff   :  { %v811_v5 = vpop.f32.mrb[5].mxu0 }
 0x100   :  { %v574_v3 = vpop.f32.mrb[0].mxu1  ;;  %v812_v8 = vadd.f32 %v811_v5, %v810_v2  ;;  %v813_v9 = vpop.f32.mrb[6].mxu0 }
 0x101   :  { %v575_v6 = vadd.f32 %v806_v62, %v574_v3  ;;  %v576_v7 = vpop.f32.mrb[1].mxu1  ;;  %v814_v12 = vpop.f32.mrb[7].mxu0 }
 0x102   :  { %v577_v11 = vpop.f32.mrb[2].mxu1  ;;  %v815_v16 = vadd.f32 %v814_v12, %v813_v9 }
 0x103   :  { %v644_v13 = vmul.f32 %v1153_v4, %v575_v6  ;;  %v578_v14 = vadd.f32 %v809_v1, %v577_v11  ;;  %v579_v15 = vpop.f32.mrb[3].mxu1 }
 0x105   :  { %v667_v17 = vadd.f32 %v1158_v10, %v644_v13  ;;  %v645_v18 = vmul.f32 %v1153_v4, %v578_v14 }
 0x106   :  { %v816_v21 = vpop.f32.mrb[8].mxu0 }
 0x107   :  { %v683_v19 = vmax.f32 %v667_v17, 0.0  ;;  %v668_v20 = vadd.f32 %v1158_v10, %v645_v18  ;;  %v817_v23 = vpop.f32.mrb[9].mxu0 }
 0x108   :  { %v582_v22 = vpop.f32.mrb[4].mxu1  ;;  %v818_v27 = vadd.f32 %v817_v23, %v816_v21  ;;  %v819_v28 = vpop.f32.mrb[10].mxu0 }
 0x109   :  { %699 = vst [vmem:[%s1244_s4] sm:$0xff] %v683_v19  ;;  %v684_v24 = vmax.f32 %v668_v20, 0.0  ;;  %v583_v25 = vadd.f32 %v812_v8, %v582_v22  ;;  %v584_v26 = vpop.f32.mrb[5].mxu1  ;;  %v820_v30 = vpop.f32.mrb[11].mxu0 }
 0x10a   :  { %v585_v29 = vpop.f32.mrb[6].mxu1  ;;  %v821_v34 = vadd.f32 %v820_v30, %v819_v28 }
 0x10b   :  { %700 = vst [vmem:[%s1244_s4 + $0x8] sm:$0xff] %v684_v24  ;;  %v646_v31 = vmul.f32 %v1153_v4, %v583_v25  ;;  %v586_v32 = vadd.f32 %v815_v16, %v585_v29  ;;  %v587_v33 = vpop.f32.mrb[7].mxu1 }
 0x10d   :  { %v669_v35 = vadd.f32 %v1158_v10, %v646_v31  ;;  %v647_v36 = vmul.f32 %v1153_v4, %v586_v32 }
 0x10e   :  { %v822_v39 = vpop.f32.mrb[12].mxu0 }
 0x10f   :  { %v685_v37 = vmax.f32 %v669_v35, 0.0  ;;  %v670_v38 = vadd.f32 %v1158_v10, %v647_v36  ;;  %v823_v41 = vpop.f32.mrb[13].mxu0 }
 0x110   :  { %v590_v40 = vpop.f32.mrb[8].mxu1  ;;  %v824_v45 = vadd.f32 %v823_v41, %v822_v39  ;;  %v825_v46 = vpop.f32.mrb[14].mxu0 }
 0x111   :  { %701 = vst [vmem:[%s1244_s4 + $0x10] sm:$0xff] %v685_v37  ;;  %v686_v42 = vmax.f32 %v670_v38, 0.0  ;;  %v591_v43 = vadd.f32 %v818_v27, %v590_v40  ;;  %v592_v44 = vpop.f32.mrb[9].mxu1  ;;  %v826_v48 = vpop.f32.mrb[15].mxu0 }
 0x112   :  { %v593_v47 = vpop.f32.mrb[10].mxu1  ;;  %v827_v52 = vadd.f32 %v826_v48, %v825_v46 }
 0x113   :  { %702 = vst [vmem:[%s1244_s4 + $0x18] sm:$0xff] %v686_v42  ;;  %v648_v49 = vmul.f32 %v1153_v4, %v591_v43  ;;  %v594_v50 = vadd.f32 %v821_v34, %v593_v47  ;;  %v595_v51 = vpop.f32.mrb[11].mxu1 }
 0x115   :  { %v671_v53 = vadd.f32 %v1158_v10, %v648_v49  ;;  %v649_v54 = vmul.f32 %v1153_v4, %v594_v50 }
 0x116   :  { %v828_v57 = vpop.f32.mrb[16].mxu0 }
 0x117   :  { %v687_v55 = vmax.f32 %v671_v53, 0.0  ;;  %v672_v56 = vadd.f32 %v1158_v10, %v649_v54  ;;  %v829_v59 = vpop.f32.mrb[17].mxu0 }
 0x118   :  { %v598_v58 = vpop.f32.mrb[12].mxu1  ;;  %v830_v63 = vadd.f32 %v829_v59, %v828_v57  ;;  %v831_v0 = vpop.f32.mrb[18].mxu0 }
 0x119   :  { %703 = vst [vmem:[%s1244_s4 + $0x20] sm:$0xff] %v687_v55  ;;  %v688_v60 = vmax.f32 %v672_v56, 0.0  ;;  %v599_v61 = vadd.f32 %v824_v45, %v598_v58  ;;  %v600_v62 = vpop.f32.mrb[13].mxu1  ;;  %v832_v2 = vpop.f32.mrb[19].mxu0 }
 0x11a   :  { %v601_v1 = vpop.f32.mrb[14].mxu1  ;;  %v833_v7 = vadd.f32 %v832_v2, %v831_v0 }
 0x11b   :  { %704 = vst [vmem:[%s1244_s4 + $0x28] sm:$0xff] %v688_v60  ;;  %v650_v3 = vmul.f32 %v1153_v4, %v599_v61  ;;  %v602_v5 = vadd.f32 %v827_v52, %v601_v1  ;;  %v603_v6 = vpop.f32.mrb[15].mxu1 }
 0x11d   :  { %v673_v8 = vadd.f32 %v1158_v10, %v650_v3  ;;  %v651_v9 = vmul.f32 %v1153_v4, %v602_v5 }
 0x11e   :  { %v834_v13 = vpop.f32.mrb[20].mxu0 }
 0x11f   :  { %v689_v11 = vmax.f32 %v673_v8, 0.0  ;;  %v674_v12 = vadd.f32 %v1158_v10, %v651_v9  ;;  %v835_v15 = vpop.f32.mrb[21].mxu0 }
 0x120   :  { %v606_v14 = vpop.f32.mrb[16].mxu1  ;;  %v836_v19 = vadd.f32 %v835_v15, %v834_v13  ;;  %v837_v20 = vpop.f32.mrb[22].mxu0 }
 0x121   :  { %705 = vst [vmem:[%s1244_s4 + $0x30] sm:$0xff] %v689_v11  ;;  %v690_v16 = vmax.f32 %v674_v12, 0.0  ;;  %v607_v17 = vadd.f32 %v830_v63, %v606_v14  ;;  %v608_v18 = vpop.f32.mrb[17].mxu1  ;;  %v838_v22 = vpop.f32.mrb[23].mxu0 }
 0x122   :  { %v609_v21 = vpop.f32.mrb[18].mxu1  ;;  %v839_v26 = vadd.f32 %v838_v22, %v837_v20 }
 0x123   :  { %706 = vst [vmem:[%s1244_s4 + $0x38] sm:$0xff] %v690_v16  ;;  %v652_v23 = vmul.f32 %v1153_v4, %v607_v17  ;;  %v610_v24 = vadd.f32 %v833_v7, %v609_v21  ;;  %v611_v25 = vpop.f32.mrb[19].mxu1 }
 0x125   :  { %v675_v27 = vadd.f32 %v1158_v10, %v652_v23  ;;  %v653_v28 = vmul.f32 %v1153_v4, %v610_v24 }
 0x126   :  { %v840_v31 = vpop.f32.mrb[24].mxu0 }
 0x127   :  { %v691_v29 = vmax.f32 %v675_v27, 0.0  ;;  %v676_v30 = vadd.f32 %v1158_v10, %v653_v28  ;;  %v841_v33 = vpop.f32.mrb[25].mxu0 }
 0x128   :  { %v614_v32 = vpop.f32.mrb[20].mxu1  ;;  %v842_v37 = vadd.f32 %v841_v33, %v840_v31  ;;  %v843_v38 = vpop.f32.mrb[26].mxu0 }
 0x129   :  { %707 = vst [vmem:[%s1244_s4 + $0x40] sm:$0xff] %v691_v29  ;;  %v692_v34 = vmax.f32 %v676_v30, 0.0  ;;  %v615_v35 = vadd.f32 %v836_v19, %v614_v32  ;;  %v616_v36 = vpop.f32.mrb[21].mxu1  ;;  %v844_v40 = vpop.f32.mrb[27].mxu0 }
 0x12a   :  { %v617_v39 = vpop.f32.mrb[22].mxu1  ;;  %v845_v44 = vadd.f32 %v844_v40, %v843_v38 }
 0x12b   :  { %708 = vst [vmem:[%s1244_s4 + $0x48] sm:$0xff] %v692_v34  ;;  %v654_v41 = vmul.f32 %v1153_v4, %v615_v35  ;;  %v618_v42 = vadd.f32 %v839_v26, %v617_v39  ;;  %v619_v43 = vpop.f32.mrb[23].mxu1 }
 0x12d   :  { %v677_v45 = vadd.f32 %v1158_v10, %v654_v41  ;;  %v655_v46 = vmul.f32 %v1153_v4, %v618_v42 }
 0x12e   :  { %v846_v49 = vpop.f32.mrb[28].mxu0 }
 0x12f   :  { %v693_v47 = vmax.f32 %v677_v45, 0.0  ;;  %v678_v48 = vadd.f32 %v1158_v10, %v655_v46  ;;  %v847_v51 = vpop.f32.mrb[29].mxu0 }
 0x130   :  { %v622_v50 = vpop.f32.mrb[24].mxu1  ;;  %v848_v55 = vadd.f32 %v847_v51, %v846_v49  ;;  %v849_v56 = vpop.f32.mrb[30].mxu0 }
 0x131   :  { %709 = vst [vmem:[%s1244_s4 + $0x50] sm:$0xff] %v693_v47  ;;  %v694_v52 = vmax.f32 %v678_v48, 0.0  ;;  %v623_v53 = vadd.f32 %v842_v37, %v622_v50  ;;  %v624_v54 = vpop.f32.mrb[25].mxu1  ;;  %v850_v58 = vpop.f32.mrb[31].mxu0 }
 0x132   :  { %v625_v57 = vpop.f32.mrb[26].mxu1  ;;  %v851_v62 = vadd.f32 %v850_v58, %v849_v56 }
 0x133   :  { %710 = vst [vmem:[%s1244_s4 + $0x58] sm:$0xff] %v694_v52  ;;  %v656_v59 = vmul.f32 %v1153_v4, %v623_v53  ;;  %v626_v60 = vadd.f32 %v845_v44, %v625_v57  ;;  %v627_v61 = vpop.f32.mrb[27].mxu1 }
 0x135   :  { %v679_v63 = vadd.f32 %v1158_v10, %v656_v59  ;;  %v657_v0 = vmul.f32 %v1153_v4, %v626_v60 }
 0x137   :  { %v695_v1 = vmax.f32 %v679_v63, 0.0  ;;  %v680_v2 = vadd.f32 %v1158_v10, %v657_v0 }
 0x138   :  { %v630_v3 = vpop.f32.mrb[28].mxu1 }
 0x139   :  { %711 = vst [vmem:[%s1244_s4 + $0x60] sm:$0xff] %v695_v1  ;;  %v696_v5 = vmax.f32 %v680_v2, 0.0  ;;  %v631_v6 = vadd.f32 %v848_v55, %v630_v3  ;;  %v632_v7 = vpop.f32.mrb[29].mxu1 }
 0x13a   :  { %v633_v8 = vpop.f32.mrb[30].mxu1 }
 0x13b   :  { %712 = vst [vmem:[%s1244_s4 + $0x68] sm:$0xff] %v696_v5  ;;  %v658_v9 = vmul.f32 %v1153_v4, %v631_v6  ;;  %v634_v11 = vadd.f32 %v851_v62, %v633_v8  ;;  %v635_v12 = vpop.f32.mrb[31].mxu1 }
 0x13d   :  { %v681_v13 = vadd.f32 %v1158_v10, %v658_v9  ;;  %v659_v14 = vmul.f32 %v1153_v4, %v634_v11 }
 0x13f   :  { %v697_v15 = vmax.f32 %v681_v13, 0.0  ;;  %v682_v16 = vadd.f32 %v1158_v10, %v659_v14 }
 0x141   :  { %713 = vst [vmem:[%s1244_s4 + $0x70] sm:$0xff] %v697_v15  ;;  %v698_v17 = vmax.f32 %v682_v16, 0.0 }
 0x143   :  { %714 = vst [vmem:[%s1244_s4 + $0x78] sm:$0xff] %v698_v17 }

// kernel: hrnet_weeder_forward.20
= control target key start
LH: loop header
LB: loop body
LE: loop exit
PB: predicated region body
PF: predicated region fallthrough
CT: control target
= control target key end

     0   :  { %s393_s9 = smov 0   ;;  %s424_s0 = inlined_call_operand.vmem [shape: f32[2,3,64], index: 0, kind: input, shape index: {}]   ;;  %s425_s1 = inlined_call_operand.vmem [shape: bf16[2,64,64], index: 1, kind: input, shape index: {}]   ;;  %s426_s2 = inlined_call_operand.vmem [shape: f32[2,3,64], index: 2, kind: output, shape index: {}]  }
   0x1 LB: > { %s316_s10 = sadd.s32 4294967295, %s374_s9   ;;  %p320_p0 = scmp.ge.s32.totalorder %s374_s9, 1  ;;  %s374_s9 = sphi %s393_s9, %s12_s9  }
   0x2   : > { %p121_p1 = scmp.lt.s32.totalorder %s374_s9, 3 }
   0x4   : > { %p122_p2 = pnand %p320_p0, %p121_p1 }
   0x5   : > { %p146_p3 = scmp.lt.s32.totalorder (!%p122_p2), %s316_s10, 1  ;;  %vm169_vm0 = vcmask (!%p122_p2), 518144   ;;  %v376_v2 = vmov (!%p122_p2), 0.0   ;;  %vm377_vm1 = vmmov (!%p122_p2), 0   ;;  %vm206_vm2 = vcmask (!%p122_p2), 523264  }
   0x6   : > { %125 = sbr.rel (%p122_p2) target bundleno = 548 (0x224), region = 28  ;;  %338 = vmatprep.subr.bf16.mxu0 (!%p122_p2), %v376_v2  ;;  %346 = vmatprep.mubr.msk.bf16.mxu0 (!%p122_p2), %vm377_vm1, %v376_v2 }
   0xd   : > { %s428_s10 = smov (!%p146_p3, %s316_s10), 1 }
   0xe   : > { %s321_s11 = sshll.u32 %s428_s10, 2  ;;  %s332_s12 = sshll.u32 %s428_s10, 5 }
   0xf   : > { %s149_s15 = scalar_lea.vmem %s424_s0, %s321_s11  ;;  %s154_s18 = scalar_lea.vmem %s425_s1, %s332_s12 }
  0x10   : > { %v160_v0 = vld [vmem:[%s149_s15] sm:$0x7]  ;;  %v361_v9 = vld [vmem:[%s154_s18 + $0x8] sm:$0xff]   ;;  %v362_v10 = vld [vmem:[%s154_s18 + $0x10] sm:$0xff]   ;;  %s158_s21 = scalar_lea.vmem %s426_s2, %s321_s11 }
  0x11   : > { %v170_v1 = vsel %vm169_vm0, %v160_v0, -inf  ;;  %v360_v8 = vld [vmem:[%s154_s18] sm:$0xff]   ;;  %v363_v11 = vld [vmem:[%s154_s18 + $0x18] sm:$0xff]  }
  0x12   : > { %171 = vmax.xlane.f32.xlu0 %v170_v1  ;;  %339 = vmatpush3.bf16.msra.mxu0 %v360_v8 }
  0x13   : > { %340 = vmatprep.subr.bf16.mxu0 %v376_v2 }
  0x16   : > { %341 = vmatpush3.bf16.msra.mxu0 %v361_v9 }
  0x17   : > { %342 = vmatprep.subr.bf16.mxu0 %v376_v2 }
  0x1a   : > { %343 = vmatpush3.bf16.msra.mxu0 %v362_v10 }
  0x1b   : > { %344 = vmatprep.subr.bf16.mxu0 %v376_v2 }
  0x1e   : > { %345 = vmatpush3.bf16.msra.mxu0 %v363_v11 }
  0x9f   : > { %v172_v3 = vpop.xlane.xlu0 %171 }
  0xa0   : > { %v173_v4 = vsub.f32 %v160_v0, %v172_v3 }
  0xa2   : > { %v174_v5 = vmul.f32 1.442695, %v173_v4 }
  0xa4   : > { %364 = vpow2.f32 %v174_v5 }
  0xae   : > { %v365_v6 = vpop.eup %364 }
  0xaf   : > { %v176_v7 = vsel %vm169_vm0, %v365_v6, 0.0 }
  0xb0   : > { %177 = vadd.xlane.f32.xlu0 %v176_v7 }
 0x13d   : > { %v178_v12 = vpop.xlane.xlu0 %177 }
 0x13e   : > { %366 = vrcp.f32 %v178_v12 }
 0x148   : > { %v367_v13 = vpop.eup %366 }
 0x149   : > { %v180_v14 = vmul.f32 %v367_v13, %v365_v6 }
 0x14b   : > { %v181_v15 = vpack.c.bf16 %v180_v14, %v180_v14 }
 0x14d   : > { %347 = vmatmul.mubr.msk.bf16.vlgmr.msra.gmra.mrb[0].mxu0 %vm206_vm2, %v181_v15 }
 0x220   : > { %v244_v16 = vpop.f32.mrb[0].mxu0 }
 0x221   : > { %250 = vst.msk [vmem:[%s158_s21] sm:$0x7] %vm169_vm0, %v244_v16  ;;  %v348_v17 = vpop.f32.mrb[1].mxu0 }
 0x222   : > { %v247_v18 = vpop.f32.mrb[2].mxu0 }
 0x223   : > { %v349_v19 = vpop.f32.mrb[3].mxu0 }
 0x224 PF: > { %s12_s9 = sadd.s32 1, %s374_s9  }
 0x225   : > { %p9_p4 = scmp.ge.s32.totalorder %s12_s9, 4  }
 0x227   :  { %11 = sbr.rel (!%p9_p4) target bundleno = 1 (0x1), region = 61 }

// kernel: hrnet_weeder_forward.19
= control target key start
LH: loop header
LB: loop body
LE: loop exit
PB: predicated region body
PF: predicated region fallthrough
CT: control target
= control target key end

     0   :  { %vm107_vm0 = vcmask 392192   ;;  %s874_s1 = inlined_call_operand.vmem [shape: bf16[48,128], index: 1, kind: input, shape index: {}]   ;;  %s875_s0 = inlined_call_operand.vmem [shape: bf16[128,48], index: 0, kind: input, shape index: {}]   ;;  %s876_s4 = inlined_call_operand.vmem [shape: bf16[128,128], index: 4, kind: input, shape index: {}]   ;;  %s877_s2 = inlined_call_operand.vmem [shape: f32[1,128], index: 2, kind: input, shape index: {}]   ;;  %s878_s3 = inlined_call_operand.vmem [shape: f32[1,128], index: 3, kind: input, shape index: {}]   ;;  %s879_s5 = inlined_call_operand.vmem [shape: f32[1,128], index: 5, kind: input, shape index: {}]   ;;  %s880_s6 = inlined_call_operand.vmem [shape: f32[1,128], index: 6, kind: input, shape index: {}]   ;;  %s881_s7 = inlined_call_operand.vmem [shape: f32[128,128], index: 7, kind: output, shape index: {}]  }
   0x1   :  { %v654_v0 = vld [vmem:[%s874_s1] sm:$0xff]   ;;  %v655_v1 = vld [vmem:[%s874_s1 + $0x8] sm:$0xff]   ;;  %v656_v3 = vld [vmem:[%s874_s1 + $0x10] sm:$0xff]  }
   0x2   :  { %584 = vmatprep.subr.bf16.mxu0 %v654_v0  ;;  %v657_v2 = vld [vmem:[%s875_s0] sm:$0xff]   ;;  %v658_v4 = vld [vmem:[%s875_s0 + $0x8] sm:$0xff]   ;;  %v659_v5 = vld [vmem:[%s875_s0 + $0x10] sm:$0xff]  }
   0x3   :  { %585 = vmatpush3.bf16.msra.mxu0 %v654_v0  ;;  %590 = vmatprep.mubr.msk.bf16.mxu0 %vm107_vm0, %v657_v2  ;;  %v665_v6 = vld [vmem:[%s876_s4] sm:$0xff]   ;;  %v666_v7 = vld [vmem:[%s876_s4 + $0x8] sm:$0xff]   ;;  %v667_v8 = vld [vmem:[%s876_s4 + $0x10] sm:$0xff]  }
   0x4   :  { %586 = vmatprep.subr.bf16.mxu0 %v655_v1  ;;  %638 = vmatprep.subr.bf16.mxu1 %v665_v6  ;;  %v660_v9 = vld [vmem:[%s875_s0 + $0x18] sm:$0xff]   ;;  %v661_v10 = vld [vmem:[%s875_s0 + $0x20] sm:$0xff]   ;;  %v662_v13 = vld [vmem:[%s875_s0 + $0x28] sm:$0xff]  }
   0x5   :  { %646 = vmatpush3.bf16.msra.mxu1 %v665_v6  ;;  %v668_v11 = vld [vmem:[%s876_s4 + $0x18] sm:$0xff]   ;;  %v669_v12 = vld [vmem:[%s876_s4 + $0x20] sm:$0xff]   ;;  %v663_v14 = vld [vmem:[%s875_s0 + $0x30] sm:$0xff]  }
   0x6   :  { %639 = vmatprep.subr.bf16.mxu1 %v666_v7  ;;  %v664_v15 = vld [vmem:[%s875_s0 + $0x38] sm:$0xff]   ;;  %v670_v16 = vld [vmem:[%s876_s4 + $0x28] sm:$0xff]   ;;  %v671_v17 = vld [vmem:[%s876_s4 + $0x30] sm:$0xff]  }
   0x7   :  { %587 = vmatpush3.bf16.msra.mxu0 %v655_v1  ;;  %v672_v18 = vld [vmem:[%s876_s4 + $0x38] sm:$0xff]   ;;  %v781_v19 = vld [vmem:[%s877_s2] ss:$0 sm:$0xff] }
   0x8   :  { %588 = vmatprep.subr.bf16.mxu0 %v656_v3  ;;  %v786_v21 = vld [vmem:[%s878_s3] ss:$0 sm:$0xff] }
   0x9   :  { %647 = vmatpush3.bf16.msra.mxu1 %v666_v7 }
   0xa   :  { %640 = vmatprep.subr.bf16.mxu1 %v667_v8 }
   0xb   :  { %589 = vmatpush3.bf16.msra.mxu0 %v656_v3 }
   0xc   :  { %606 = vmatprep.subr.bf16.mxu0 %v665_v6 }
   0xd   :  { %648 = vmatpush3.bf16.msra.mxu1 %v667_v8 }
   0xe   :  { %591 = vmatmul.mubr.msk.bf16.vlgmr.msra.gmra.mrb[0].mxu0 %vm107_vm0, %v658_v4  ;;  %641 = vmatprep.subr.bf16.mxu1 %v668_v11 }
   0xf   :  { %594 = vmatprep.mubr.msk.bf16.mxu0 %vm107_vm0, %v659_v5  ;;  %607 = vmatpush3.bf16.msra.mxu0 %v665_v6 }
  0x10   :  { %608 = vmatprep.subr.bf16.mxu0 %v666_v7 }
  0x11   :  { %649 = vmatpush3.bf16.msra.mxu1 %v668_v11 }
  0x12   :  { %642 = vmatprep.subr.bf16.mxu1 %v669_v12 }
  0x13   :  { %609 = vmatpush3.bf16.msra.mxu0 %v666_v7 }
  0x14   :  { %610 = vmatprep.subr.bf16.mxu0 %v667_v8 }
  0x15   :  { %650 = vmatpush3.bf16.msra.mxu1 %v669_v12 }
  0x16   :  { %595 = vmatmul.mubr.msk.bf16.gmra.mrb[4].mxu0 %vm107_vm0, %v660_v9  ;;  %643 = vmatprep.subr.bf16.mxu1 %v670_v16 }
  0x17   :  { %598 = vmatprep.mubr.msk.bf16.mxu0 %vm107_vm0, %v661_v10  ;;  %611 = vmatpush3.bf16.msra.mxu0 %v667_v8 }
  0x18   :  { %612 = vmatprep.subr.bf16.mxu0 %v668_v11 }
  0x19   :  { %651 = vmatpush3.bf16.msra.mxu1 %v670_v16 }
  0x1a   :  { %644 = vmatprep.subr.bf16.mxu1 %v671_v17 }
  0x1b   :  { %613 = vmatpush3.bf16.msra.mxu0 %v668_v11 }
  0x1c   :  { %614 = vmatprep.subr.bf16.mxu0 %v669_v12 }
  0x1d   :  { %652 = vmatpush3.bf16.msra.mxu1 %v671_v17 }
  0x1e   :  { %599 = vmatmul.mubr.msk.bf16.gmra.mrb[8].mxu0 %vm107_vm0, %v662_v13  ;;  %645 = vmatprep.subr.bf16.mxu1 %v672_v18 }
  0x1f   :  { %602 = vmatprep.mubr.msk.bf16.mxu0 %vm107_vm0, %v663_v14  ;;  %615 = vmatpush3.bf16.msra.mxu0 %v669_v12 }
  0x20   :  { %616 = vmatprep.subr.bf16.mxu0 %v670_v16 }
  0x21   :  { %653 = vmatpush3.bf16.msra.mxu1 %v672_v18 }
  0x23   :  { %617 = vmatpush3.bf16.msra.mxu0 %v670_v16 }
  0x24   :  { %618 = vmatprep.subr.bf16.mxu0 %v671_v17 }
  0x26   :  { %603 = vmatmul.mubr.msk.bf16.gmra.mrb[12].mxu0 %vm107_vm0, %v664_v15 }
  0x27   :  { %619 = vmatpush3.bf16.msra.mxu0 %v671_v17 }
  0x28   :  { %620 = vmatprep.subr.bf16.mxu0 %v672_v18 }
  0x2b   :  { %621 = vmatpush3.bf16.msra.mxu0 %v672_v18 }
  0xe1   :  { %v592_v20 = vpop.f32.mrb[0].mxu0 }
  0xe2   :  { %v238_v22 = vmul.f32 %v592_v20, %v781_v19  ;;  %v166_v23 = vpop.f32.mrb[1].mxu0 }
  0xe3   :  { %v236_v24 = vmul.f32 %v781_v19, %v166_v23  ;;  %v593_v25 = vpop.f32.mrb[2].mxu0 }
  0xe4   :  { %v261_v26 = vadd.f32 %v786_v21, %v238_v22  ;;  %v239_v27 = vmul.f32 %v593_v25, %v781_v19  ;;  %v169_v28 = vpop.f32.mrb[3].mxu0 }
  0xe5   :  { %v259_v29 = vadd.f32 %v786_v21, %v236_v24  ;;  %v237_v30 = vmul.f32 %v781_v19, %v169_v28 }
  0xe6   :  { %v262_v31 = vadd.f32 %v786_v21, %v239_v27  ;;  %v277_v33 = vmax.f32 %v261_v26, 0.0 }
  0xe7   :  { %v260_v32 = vadd.f32 %v786_v21, %v237_v30  ;;  %v275_v35 = vmax.f32 %v259_v29, 0.0 }
  0xe8   :  { %v278_v34 = vmax.f32 %v262_v31, 0.0  ;;  %v555_v31 = vld [vmem:[%s879_s5] ss:$0 sm:$0xff] }
  0xe9   :  { %v276_v36 = vmax.f32 %v260_v32, 0.0  ;;  %v596_v37 = vpop.f32.mrb[4].mxu0 }
  0xea   :  { %v292_v38 = vpack.c.bf16 %v278_v34, %v277_v33  ;;  %v242_v39 = vmul.f32 %v596_v37, %v781_v19  ;;  %v182_v40 = vpop.f32.mrb[5].mxu0 }
  0xeb   :  { %v240_v41 = vmul.f32 %v781_v19, %v182_v40  ;;  %v597_v42 = vpop.f32.mrb[6].mxu0  ;;  %v291_v43 = vpack.c.bf16 %v276_v36, %v275_v35 }
  0xec   :  { %v265_v44 = vadd.f32 %v786_v21, %v242_v39  ;;  %v243_v45 = vmul.f32 %v597_v42, %v781_v19  ;;  %v185_v46 = vpop.f32.mrb[7].mxu0 }
  0xed   :  { %v241_v47 = vmul.f32 %v781_v19, %v185_v46  ;;  %622 = vmatprep.mubr.bf16.mxu0 %v291_v43  ;;  %v263_v48 = vadd.f32 %v786_v21, %v240_v41 }
  0xee   :  { %v266_v49 = vadd.f32 %v786_v21, %v243_v45  ;;  %623 = vmatmul.mubr.bf16.vlgmr.msra.gmra.mrb[16].mxu0 %v292_v38  ;;  %v281_v51 = vmax.f32 %v265_v44, 0.0 }
  0xef   :  { %v264_v50 = vadd.f32 %v786_v21, %v241_v47  ;;  %v279_v54 = vmax.f32 %v263_v48, 0.0 }
  0xf0   :  { %v282_v52 = vmax.f32 %v266_v49, 0.0 }
  0xf1   :  { %v600_v53 = vpop.f32.mrb[8].mxu0  ;;  %v280_v55 = vmax.f32 %v264_v50, 0.0 }
  0xf2   :  { %v246_v56 = vmul.f32 %v600_v53, %v781_v19  ;;  %v198_v57 = vpop.f32.mrb[9].mxu0  ;;  %v294_v58 = vpack.c.bf16 %v282_v52, %v281_v51 }
  0xf3   :  { %v244_v59 = vmul.f32 %v781_v19, %v198_v57  ;;  %v601_v60 = vpop.f32.mrb[10].mxu0  ;;  %v293_v61 = vpack.c.bf16 %v280_v55, %v279_v54 }
  0xf4   :  { %v269_v62 = vadd.f32 %v786_v21, %v246_v56  ;;  %v247_v63 = vmul.f32 %v601_v60, %v781_v19  ;;  %v201_v0 = vpop.f32.mrb[11].mxu0 }
  0xf5   :  { %v267_v1 = vadd.f32 %v786_v21, %v244_v59  ;;  %v245_v2 = vmul.f32 %v781_v19, %v201_v0  ;;  %626 = vmatprep.mubr.bf16.mxu1 %v293_v61 }
  0xf6   :  { %v270_v3 = vadd.f32 %v786_v21, %v247_v63  ;;  %627 = vmatmul.mubr.bf16.vlgmr.msra.gmra.mrb[0].mxu1 %v294_v58  ;;  %v285_v5 = vmax.f32 %v269_v62, 0.0 }
  0xf7   :  { %v268_v4 = vadd.f32 %v786_v21, %v245_v2  ;;  %v283_v7 = vmax.f32 %v267_v1, 0.0 }
  0xf8   :  { %v286_v6 = vmax.f32 %v270_v3, 0.0 }
  0xf9   :  { %v284_v8 = vmax.f32 %v268_v4, 0.0  ;;  %v604_v9 = vpop.f32.mrb[12].mxu0 }
  0xfa   :  { %v250_v10 = vmul.f32 %v604_v9, %v781_v19  ;;  %v214_v11 = vpop.f32.mrb[13].mxu0  ;;  %v296_v12 = vpack.c.bf16 %v286_v6, %v285_v5 }
  0xfb   :  { %v248_v13 = vmul.f32 %v781_v19, %v214_v11  ;;  %v605_v14 = vpop.f32.mrb[14].mxu0  ;;  %v295_v15 = vpack.c.bf16 %v284_v8, %v283_v7 }
  0xfc   :  { %v273_v16 = vadd.f32 %v786_v21, %v250_v10  ;;  %v251_v17 = vmul.f32 %v605_v14, %v781_v19  ;;  %v217_v18 = vpop.f32.mrb[15].mxu0 }
  0xfd   :  { %v271_v20 = vadd.f32 %v786_v21, %v248_v13  ;;  %v249_v22 = vmul.f32 %v781_v19, %v217_v18  ;;  %630 = vmatprep.mubr.bf16.mxu1 %v295_v15  ;;  %v556_v19 = vld [vmem:[%s880_s6] ss:$0 sm:$0xff] }
  0xfe   :  { %v274_v23 = vadd.f32 %v786_v21, %v251_v17  ;;  %631 = vmatmul.mubr.bf16.gmra.mrb[4].mxu1 %v296_v12  ;;  %v289_v25 = vmax.f32 %v273_v16, 0.0 }
  0xff   :  { %v272_v24 = vadd.f32 %v786_v21, %v249_v22  ;;  %v287_v27 = vmax.f32 %v271_v20, 0.0 }
 0x100   :  { %v290_v26 = vmax.f32 %v274_v23, 0.0 }
 0x101   :  { %v288_v28 = vmax.f32 %v272_v24, 0.0 }
 0x102   :  { %v298_v29 = vpack.c.bf16 %v290_v26, %v289_v25 }
 0x103   :  { %v297_v30 = vpack.c.bf16 %v288_v28, %v287_v27 }
 0x105   :  { %634 = vmatprep.mubr.bf16.mxu1 %v297_v30 }
 0x106   :  { %635 = vmatmul.mubr.bf16.gmra.mrb[8].mxu1 %v298_v29 }
 0x1c1   :  { %v624_v32 = vpop.f32.mrb[16].mxu0 }
 0x1c2   :  { %v469_v33 = vmul.f32 %v624_v32, %v555_v31  ;;  %v397_v34 = vpop.f32.mrb[17].mxu0 }
 0x1c3   :  { %v467_v21 = vmul.f32 %v555_v31, %v397_v34  ;;  %v625_v35 = vpop.f32.mrb[18].mxu0 }
 0x1c4   :  { %v492_v36 = vadd.f32 %v556_v19, %v469_v33  ;;  %v470_v37 = vmul.f32 %v625_v35, %v555_v31  ;;  %v400_v38 = vpop.f32.mrb[19].mxu0 }
 0x1c5   :  { %v490_v39 = vadd.f32 %v556_v19, %v467_v21  ;;  %v468_v40 = vmul.f32 %v555_v31, %v400_v38 }
 0x1c6   :  { %508 = vst [vmem:[%s881_s7 + $0x10] sm:$0xff] %v492_v36  ;;  %v493_v41 = vadd.f32 %v556_v19, %v470_v37 }
 0x1c7   :  { %506 = vst [vmem:[%s881_s7] sm:$0xff] %v490_v39  ;;  %v491_v42 = vadd.f32 %v556_v19, %v468_v40 }
 0x1c8   :  { %509 = vst [vmem:[%s881_s7 + $0x18] sm:$0xff] %v493_v41 }
 0x1c9   :  { %507 = vst [vmem:[%s881_s7 + $0x8] sm:$0xff] %v491_v42  ;;  %v628_v43 = vpop.f32.mrb[0].mxu1 }
 0x1ca   :  { %v473_v44 = vmul.f32 %v628_v43, %v555_v31  ;;  %v413_v45 = vpop.f32.mrb[1].mxu1 }
 0x1cb   :  { %v471_v46 = vmul.f32 %v555_v31, %v413_v45  ;;  %v629_v47 = vpop.f32.mrb[2].mxu1 }
 0x1cc   :  { %v496_v48 = vadd.f32 %v556_v19, %v473_v44  ;;  %v474_v49 = vmul.f32 %v629_v47, %v555_v31  ;;  %v416_v50 = vpop.f32.mrb[3].mxu1 }
 0x1cd   :  { %v494_v51 = vadd.f32 %v556_v19, %v471_v46  ;;  %v472_v52 = vmul.f32 %v555_v31, %v416_v50 }
 0x1ce   :  { %512 = vst [vmem:[%s881_s7 + $0x30] sm:$0xff] %v496_v48  ;;  %v497_v53 = vadd.f32 %v556_v19, %v474_v49 }
 0x1cf   :  { %510 = vst [vmem:[%s881_s7 + $0x20] sm:$0xff] %v494_v51  ;;  %v495_v54 = vadd.f32 %v556_v19, %v472_v52 }
 0x1d0   :  { %513 = vst [vmem:[%s881_s7 + $0x38] sm:$0xff] %v497_v53 }
 0x1d1   :  { %511 = vst [vmem:[%s881_s7 + $0x28] sm:$0xff] %v495_v54  ;;  %v632_v55 = vpop.f32.mrb[4].mxu1 }
 0x1d2   :  { %v477_v56 = vmul.f32 %v632_v55, %v555_v31  ;;  %v429_v57 = vpop.f32.mrb[5].mxu1 }
 0x1d3   :  { %v475_v58 = vmul.f32 %v555_v31, %v429_v57  ;;  %v633_v59 = vpop.f32.mrb[6].mxu1 }
 0x1d4   :  { %v500_v60 = vadd.f32 %v556_v19, %v477_v56  ;;  %v478_v61 = vmul.f32 %v633_v59, %v555_v31  ;;  %v432_v62 = vpop.f32.mrb[7].mxu1 }
 0x1d5   :  { %v498_v63 = vadd.f32 %v556_v19, %v475_v58  ;;  %v476_v0 = vmul.f32 %v555_v31, %v432_v62 }
 0x1d6   :  { %516 = vst [vmem:[%s881_s7 + $0x50] sm:$0xff] %v500_v60  ;;  %v501_v1 = vadd.f32 %v556_v19, %v478_v61 }
 0x1d7   :  { %514 = vst [vmem:[%s881_s7 + $0x40] sm:$0xff] %v498_v63  ;;  %v499_v2 = vadd.f32 %v556_v19, %v476_v0 }
 0x1d8   :  { %517 = vst [vmem:[%s881_s7 + $0x58] sm:$0xff] %v501_v1 }
 0x1d9   :  { %515 = vst [vmem:[%s881_s7 + $0x48] sm:$0xff] %v499_v2  ;;  %v636_v3 = vpop.f32.mrb[8].mxu1 }
 0x1da   :  { %v481_v4 = vmul.f32 %v636_v3, %v555_v31  ;;  %v445_v5 = vpop.f32.mrb[9].mxu1 }
 0x1db   :  { %v479_v6 = vmul.f32 %v555_v31, %v445_v5  ;;  %v637_v7 = vpop.f32.mrb[10].mxu1 }
 0x1dc   :  { %v504_v8 = vadd.f32 %v556_v19, %v481_v4  ;;  %v482_v9 = vmul.f32 %v637_v7, %v555_v31  ;;  %v448_v10 = vpop.f32.mrb[11].mxu1 }
 0x1dd   :  { %v502_v11 = vadd.f32 %v556_v19, %v479_v6  ;;  %v480_v12 = vmul.f32 %v555_v31, %v448_v10 }
 0x1de   :  { %520 = vst [vmem:[%s881_s7 + $0x70] sm:$0xff] %v504_v8  ;;  %v505_v13 = vadd.f32 %v556_v19, %v482_v9 }
 0x1df   :  { %518 = vst [vmem:[%s881_s7 + $0x60] sm:$0xff] %v502_v11  ;;  %v503_v14 = vadd.f32 %v556_v19, %v480_v12 }
 0x1e0   :  { %521 = vst [vmem:[%s881_s7 + $0x78] sm:$0xff] %v505_v13 }
 0x1e1   :  { %519 = vst [vmem:[%s881_s7 + $0x68] sm:$0xff] %v503_v14 }

// kernel: hrnet_weeder_forward.21
= control target key start
LH: loop header
LB: loop body
LE: loop exit
PB: predicated region body
PF: predicated region fallthrough
CT: control target
= control target key end

     0   :  { %v325_v0 = vmov 0.0   ;;  %vm326_vm0 = vmmov 0   ;;  %vm60_vm1 = vcmask 523264   ;;  %s421_s1 = inlined_call_operand.vmem [shape: bf16[64,128], index: 1, kind: input, shape index: {}]   ;;  %s422_s4 = inlined_call_operand.vmem [shape: bf16[128,128], index: 4, kind: input, shape index: {}]   ;;  %s423_s0 = inlined_call_operand.vmem [shape: bf16[8,64], index: 0, kind: input, shape index: {}]   ;;  %s424_s2 = inlined_call_operand.vmem [shape: f32[1,128], index: 2, kind: input, shape index: {}]   ;;  %s425_s3 = inlined_call_operand.vmem [shape: f32[1,128], index: 3, kind: input, shape index: {}]   ;;  %s426_s5 = inlined_call_operand.vmem [shape: f32[1,128], index: 5, kind: input, shape index: {}]   ;;  %s427_s6 = inlined_call_operand.vmem [shape: f32[1,128], index: 6, kind: input, shape index: {}]   ;;  %s428_s7 = inlined_call_operand.vmem [shape: f32[8,128], index: 7, kind: output, shape index: {}]  }
   0x1   :  { %279 = vmatprep.subr.bf16.mxu0 %v325_v0  ;;  %v313_v1 = vld [vmem:[%s421_s1] sm:$0xff]   ;;  %287 = vmatprep.mubr.msk.bf16.mxu0 %vm326_vm0, %v325_v0  ;;  %v314_v2 = vld [vmem:[%s421_s1 + $0x8] sm:$0xff]   ;;  %v315_v4 = vld [vmem:[%s421_s1 + $0x10] sm:$0xff]  }
   0x2   :  { %291 = vmatprep.subr.bf16.mxu1 %v325_v0  ;;  %307 = vmatprep.mubr.msk.bf16.mxu1 %vm326_vm0, %v325_v0  ;;  %v317_v3 = vld [vmem:[%s422_s4] sm:$0xff]   ;;  %v318_v5 = vld [vmem:[%s422_s4 + $0x8] sm:$0xff]   ;;  %v316_v6 = vld [vmem:[%s421_s1 + $0x18] sm:$0xff]  }
   0x3   :  { %280 = vmatpush3.bf16.msra.mxu0 %v313_v1  ;;  %292 = vmatpush3.bf16.msra.mxu1 %v317_v3  ;;  %v319_v7 = vld [vmem:[%s422_s4 + $0x10] sm:$0xff]   ;;  %v27_v8 = vld [vmem:[%s423_s0] sm:$0xf]  ;;  %v320_v9 = vld [vmem:[%s422_s4 + $0x18] sm:$0xff]  }
   0x4   :  { %281 = vmatprep.subr.bf16.mxu0 %v325_v0  ;;  %293 = vmatprep.subr.bf16.mxu1 %v325_v0  ;;  %v321_v10 = vld [vmem:[%s422_s4 + $0x20] sm:$0xff]   ;;  %v322_v11 = vld [vmem:[%s422_s4 + $0x28] sm:$0xff]   ;;  %v323_v12 = vld [vmem:[%s422_s4 + $0x30] sm:$0xff]  }
   0x5   :  { %v324_v13 = vld [vmem:[%s422_s4 + $0x38] sm:$0xff]   ;;  %v253_v14 = vld [vmem:[%s424_s2] ss:$0 sm:$0xff] }
   0x6   :  { %v254_v16 = vld [vmem:[%s425_s3] ss:$0 sm:$0xff] }
   0x7   :  { %282 = vmatpush3.bf16.msra.mxu0 %v314_v2  ;;  %294 = vmatpush3.bf16.msra.mxu1 %v318_v5  ;;  %v263_v24 = vld [vmem:[%s426_s5] ss:$0 sm:$0xff] }
   0x8   :  { %283 = vmatprep.subr.bf16.mxu0 %v325_v0  ;;  %295 = vmatprep.subr.bf16.mxu1 %v325_v0  ;;  %v264_v26 = vld [vmem:[%s427_s6] ss:$0 sm:$0xff] }
   0xb   :  { %284 = vmatpush3.bf16.msra.mxu0 %v315_v4  ;;  %296 = vmatpush3.bf16.msra.mxu1 %v319_v7 }
   0xc   :  { %285 = vmatprep.subr.bf16.mxu0 %v325_v0  ;;  %297 = vmatprep.subr.bf16.mxu1 %v325_v0 }
   0xf   :  { %286 = vmatpush3.bf16.msra.mxu0 %v316_v6  ;;  %298 = vmatpush3.bf16.msra.mxu1 %v320_v9 }
  0x10   :  { %299 = vmatprep.subr.bf16.mxu1 %v325_v0 }
  0x12   :  { %288 = vmatmul.mubr.msk.bf16.vlgmr.msra.gmra.mrb[0].mxu0 %vm60_vm1, %v27_v8 }
  0x13   :  { %300 = vmatpush3.bf16.msra.mxu1 %v321_v10 }
  0x14   :  { %301 = vmatprep.subr.bf16.mxu1 %v325_v0 }
  0x17   :  { %302 = vmatpush3.bf16.msra.mxu1 %v322_v11 }
  0x18   :  { %303 = vmatprep.subr.bf16.mxu1 %v325_v0 }
  0x1b   :  { %304 = vmatpush3.bf16.msra.mxu1 %v323_v12 }
  0x1c   :  { %305 = vmatprep.subr.bf16.mxu1 %v325_v0 }
  0x1f   :  { %306 = vmatpush3.bf16.msra.mxu1 %v324_v13 }
  0xe5   :  { %v98_v15 = vpop.f32.mrb[0].mxu0 }
  0xe6   :  { %v111_v17 = vmul.f32 %v253_v14, %v98_v15  ;;  %v289_v18 = vpop.f32.mrb[1].mxu0 }
  0xe7   :  { %v101_v19 = vpop.f32.mrb[2].mxu0 }
  0xe8   :  { %v119_v20 = vadd.f32 %v254_v16, %v111_v17  ;;  %v290_v21 = vpop.f32.mrb[3].mxu0 }
  0xea   :  { %v120_v22 = vmax.f32 %v119_v20, 0.0 }
  0xec   :  { %v121_v23 = vpack.c.bf16 %v120_v22, %v120_v22 }
  0xee   :  { %308 = vmatmul.mubr.bf16.vlgmr.msra.gmra.mrb[0].mxu1 %v121_v23 }
 0x1c1   :  { %v220_v25 = vpop.f32.mrb[0].mxu1 }
 0x1c2   :  { %v233_v27 = vmul.f32 %v263_v24, %v220_v25  ;;  %v309_v28 = vpop.f32.mrb[1].mxu1 }
 0x1c3   :  { %v223_v29 = vpop.f32.mrb[2].mxu1 }
 0x1c4   :  { %v241_v30 = vadd.f32 %v264_v26, %v233_v27  ;;  %v310_v31 = vpop.f32.mrb[3].mxu1 }
 0x1c6   :  { %v242_v32 = vmax.f32 %v241_v30, 0.0 }
 0x1c8   :  { %243 = vst [vmem:[%s428_s7] sm:$0xff] %v242_v32 }

// kernel: hrnet_weeder_forward.22
= control target key start
LH: loop header
LB: loop body
LE: loop exit
PB: predicated region body
PF: predicated region fallthrough
CT: control target
= control target key end

     0   :  { %v147_v0 = vmov 0.0   ;;  %vm148_vm0 = vmmov 0   ;;  %vm51_vm1 = vcmask 523264   ;;  %s198_s1 = inlined_call_operand.vmem [shape: bf16[64,128], index: 1, kind: input, shape index: {}]   ;;  %s199_s0 = inlined_call_operand.vmem [shape: bf16[8,64], index: 0, kind: input, shape index: {}]   ;;  %s200_s2 = inlined_call_operand.vmem [shape: f32[1,128], index: 2, kind: input, shape index: {}]   ;;  %s201_s3 = inlined_call_operand.vmem [shape: f32[1,128], index: 3, kind: input, shape index: {}]   ;;  %s202_s4 = inlined_call_operand.vmem [shape: f32[8,128], index: 4, kind: output, shape index: {}]  }
   0x1   :  { %129 = vmatprep.subr.bf16.mxu0 %v147_v0  ;;  %v143_v1 = vld [vmem:[%s198_s1] sm:$0xff]   ;;  %137 = vmatprep.mubr.msk.bf16.mxu0 %vm148_vm0, %v147_v0  ;;  %v144_v2 = vld [vmem:[%s198_s1 + $0x8] sm:$0xff]   ;;  %v145_v3 = vld [vmem:[%s198_s1 + $0x10] sm:$0xff]  }
   0x2   :  { %130 = vmatpush3.bf16.msra.mxu0 %v143_v1  ;;  %v146_v4 = vld [vmem:[%s198_s1 + $0x18] sm:$0xff]   ;;  %v18_v5 = vld [vmem:[%s199_s0] sm:$0xf] }
   0x3   :  { %131 = vmatprep.subr.bf16.mxu0 %v147_v0  ;;  %v122_v6 = vld [vmem:[%s200_s2] ss:$0 sm:$0xff] }
   0x4   :  { %v123_v8 = vld [vmem:[%s201_s3] ss:$0 sm:$0xff] }
   0x6   :  { %132 = vmatpush3.bf16.msra.mxu0 %v144_v2 }
   0x7   :  { %133 = vmatprep.subr.bf16.mxu0 %v147_v0 }
   0xa   :  { %134 = vmatpush3.bf16.msra.mxu0 %v145_v3 }
   0xb   :  { %135 = vmatprep.subr.bf16.mxu0 %v147_v0 }
   0xe   :  { %136 = vmatpush3.bf16.msra.mxu0 %v146_v4 }
  0x11   :  { %138 = vmatmul.mubr.msk.bf16.vlgmr.msra.gmra.mrb[0].mxu0 %vm51_vm1, %v18_v5 }
  0xe4   :  { %v89_v7 = vpop.f32.mrb[0].mxu0 }
  0xe5   :  { %v102_v9 = vmul.f32 %v122_v6, %v89_v7  ;;  %v139_v10 = vpop.f32.mrb[1].mxu0 }
  0xe6   :  { %v92_v11 = vpop.f32.mrb[2].mxu0 }
  0xe7   :  { %v110_v12 = vadd.f32 %v123_v8, %v102_v9  ;;  %v140_v13 = vpop.f32.mrb[3].mxu0 }
  0xe9   :  { %v111_v14 = vmax.f32 %v110_v12, 0.0 }
  0xeb   :  { %112 = vst [vmem:[%s202_s4] sm:$0xff] %v111_v14 }

// kernel: hrnet_weeder_forward.23
= control target key start
LH: loop header
LB: loop body
LE: loop exit
PB: predicated region body
PF: predicated region fallthrough
CT: control target
= control target key end

     0   :  { %s1746_s21 = smov 0   ;;  %s1748_s22 = smov 0   ;;  %s1902_s0 = inlined_call_operand.vmem [shape: bf16[2,64,64], index: 0, kind: input, shape index: {}]   ;;  %s1903_s1 = inlined_call_operand.vmem [shape: f32[2,3,32], index: 1, kind: input, shape index: {}]   ;;  %s1904_s2 = inlined_call_operand.vmem [shape: f32[2,3,32], index: 2, kind: input, shape index: {}]   ;;  %s1905_s3 = inlined_call_operand.vmem [shape: bf16[64,32], index: 3, kind: input, shape index: {}]   ;;  %s1906_s4 = inlined_call_operand.vmem [shape: f32[1,32], index: 4, kind: input, shape index: {}]   ;;  %s1907_s5 = inlined_call_operand.vmem [shape: f32[1,32], index: 5, kind: input, shape index: {}]   ;;  %s1908_s6 = inlined_call_operand.vmem [shape: bf16[32,32], index: 6, kind: input, shape index: {}]   ;;  %s1909_s7 = inlined_call_operand.vmem [shape: f32[1,32], index: 7, kind: input, shape index: {}]   ;;  %s1910_s8 = inlined_call_operand.vmem [shape: f32[1,32], index: 8, kind: input, shape index: {}]   ;;  %s1911_s9 = inlined_call_operand.vmem [shape: bf16[32,64], index: 9, kind: input, shape index: {}]   ;;  %s1912_s10 = inlined_call_operand.vmem [shape: f32[1,64], index: 10, kind: input, shape index: {}]   ;;  %s1913_s11 = inlined_call_operand.vmem [shape: f32[1,64], index: 11, kind: input, shape index: {}]   ;;  %s1914_s12 = inlined_call_operand.vmem [shape: f32[2,64,64], index: 12, kind: output, shape index: {}]  }
   0x1   :  { %s1750_s23 = smov 0  }
   0x2 LB: > { %s34_s24 = sadd.s32 1, %s1675_s22  ;;  %p1422_p0 = scmp.ge.s32.totalorder %s1679_s23, 1  ;;  %s1679_s23 = sphi %s1750_s23, %s22_s23   ;;  %s1675_s22 = sphi %s1748_s22, %s1916_s22   ;;  %s1671_s21 = sphi %s1746_s21, %s1915_s21  }
   0x3   : > { %p36_p1 = scmp.ge.s32.totalorder %s34_s24, 2  ;;  %p401_p2 = scmp.lt.s32.totalorder %s1679_s23, 3 }
   0x5   : > { %s1918_s24 = smov (%p36_p1, %s34_s24), 0  ;;  %p402_p3 = pnand %p1422_p0, %p401_p2 }
   0x6   : > { %v1613_v0 = vld [vmem:[%s1905_s3] sm:$0xff] (!%p402_p3)   ;;  %p460_p4 = scmp.lt.s32.totalorder (!%p402_p3), %s1671_s21, 1  ;;  %v1614_v1 = vld [vmem:[%s1905_s3 + $0x8] sm:$0xff] (!%p402_p3)   ;;  %vm548_vm0 = vcmask (!%p402_p3), 523264   ;;  %v1615_v2 = vld [vmem:[%s1905_s3 + $0x10] sm:$0xff] (!%p402_p3)   ;;  %vm684_vm1 = vcmask (!%p402_p3), 261120  }
   0x7   : > { %405 = sbr.rel (%p402_p3) target bundleno = 1450 (0x5aa), region = 68  ;;  %1519 = vmatprep.subr.bf16.mxu0 (!%p402_p3), %v1613_v0  ;;  %v1616_v4 = vld [vmem:[%s1905_s3 + $0x18] sm:$0xff] (!%p402_p3)   ;;  %v1621_v8 = vld [vmem:[%s1908_s6] sm:$0xff] (!%p402_p3)   ;;  %v1622_v9 = vld [vmem:[%s1908_s6 + $0x8] sm:$0xff] (!%p402_p3)   ;;  %vm942_vm2 = vcmask (!%p402_p3), 23552   ;;  %vm1055_vm3 = vcmask (!%p402_p3), 1042432  }
   0x8   : > { %1520 = vmatpush3.bf16.msra.mxu0 (!%p402_p3), %v1613_v0  ;;  %1535 = vmatprep.subr.bf16.mxu1 (!%p402_p3), %v1621_v8  ;;  %v1441_v11 = vld [vmem:[%s1906_s4] ss:$0 sm:$0xff] (!%p402_p3) }
   0x9   : > { %1521 = vmatprep.subr.bf16.mxu0 (!%p402_p3), %v1614_v1  ;;  %1536 = vmatpush3.bf16.msra.mxu1 (!%p402_p3), %v1621_v8  ;;  %v1442_v13 = vld [vmem:[%s1907_s5] ss:$0 sm:$0xff] (!%p402_p3) }
   0xa   : > { %1537 = vmatprep.subr.bf16.mxu1 (!%p402_p3), %v1622_v9  ;;  %v1449_v49 = vld [vmem:[%s1909_s7] ss:$0 sm:$0xff] (!%p402_p3) }
   0xb   : > { %v1450_v51 = vld [vmem:[%s1910_s8] ss:$0 sm:$0xff] (!%p402_p3) }
   0xc   : > { %1522 = vmatpush3.bf16.msra.mxu0 (!%p402_p3), %v1614_v1 }
   0xd   : > { %1523 = vmatprep.subr.bf16.mxu0 (!%p402_p3), %v1615_v2  ;;  %1538 = vmatpush3.bf16.msra.mxu1 (!%p402_p3), %v1622_v9 }
   0xe   : > { %s1920_s21 = smov (!%p460_p4, %s1671_s21), 1 }
   0xf   : > { %s1479_s13 = sshll.u32 %s1920_s21, 5  ;;  %s1425_s27 = sshll.u32 %s1920_s21, 2 }
  0x10   : > { %s467_s16 = scalar_lea.vmem %s1902_s0, %s1479_s13  ;;  %1524 = vmatpush3.bf16.msra.mxu0 %v1615_v2  ;;  %s472_s30 = scalar_lea.vmem %s1903_s1, %s1425_s27 }
  0x11   : > { %v1617_v3 = vld [vmem:[%s467_s16] sm:$0xff]   ;;  %1525 = vmatprep.subr.bf16.mxu0 %v1616_v4  ;;  %v1618_v5 = vld [vmem:[%s467_s16 + $0x8] sm:$0xff]   ;;  %v1619_v6 = vld [vmem:[%s467_s16 + $0x10] sm:$0xff]   ;;  %s476_s28 = scalar_lea.vmem %s1904_s2, %s1425_s27  ;;  %s1480_s18 = sshll.u32 %s1920_s21, 6 }
  0x12   : > { %1527 = vmatprep.mubr.msk.bf16.mxu0 %vm548_vm0, %v1617_v3  ;;  %v1620_v7 = vld [vmem:[%s467_s16 + $0x18] sm:$0xff]   ;;  %v800_v10 = vld [vmem:[%s472_s30] sm:$0x7]  ;;  %s1875_s25 = scalar_lea.vmem %s1914_s12, %s1480_s18 }
  0x13   : > { %1587 = vmatprep.subr.msk.mxu1 %vm684_vm1, %v800_v10 }
  0x14   : > { %1526 = vmatpush3.bf16.msra.mxu0 %v1616_v4 }
  0x15   : > { %1547 = vmatprep.subr.msk.mxu0 %vm684_vm1, %v800_v10 }
  0x17   : > { %1528 = vmatmul.mubr.msk.bf16.vlgmr.msra.gmra.mrb[0].mxu0 %vm548_vm0, %v1618_v5 }
  0x18   : > { %1531 = vmatprep.mubr.msk.bf16.mxu0 %vm548_vm0, %v1619_v6 }
  0x1d   : > { %1548 = vmatpush3.xpose.msk.msra.mxu0 %vm684_vm1, %v800_v10 }
  0x1f   : > { %1532 = vmatmul.mubr.msk.bf16.gmra.mrb[4].mxu0 %vm548_vm0, %v1620_v7 }
  0xea   : > { %v1529_v12 = vpop.f32.mrb[0].mxu0 }
  0xeb   : > { %v635_v14 = vmul.f32 %v1529_v12, %v1441_v11  ;;  %v595_v15 = vpop.f32.mrb[1].mxu0 }
  0xec   : > { %v633_v16 = vmul.f32 %v1441_v11, %v595_v15  ;;  %v1530_v17 = vpop.f32.mrb[2].mxu0 }
  0xed   : > { %v650_v18 = vadd.f32 %v1442_v13, %v635_v14  ;;  %v636_v19 = vmul.f32 %v1530_v17, %v1441_v11  ;;  %v598_v20 = vpop.f32.mrb[3].mxu0 }
  0xee   : > { %v648_v21 = vadd.f32 %v1442_v13, %v633_v16  ;;  %v634_v22 = vmul.f32 %v1441_v11, %v598_v20 }
  0xef   : > { %v651_v23 = vadd.f32 %v1442_v13, %v636_v19  ;;  %v658_v25 = vmax.f32 %v650_v18, 0.0 }
  0xf0   : > { %v649_v24 = vadd.f32 %v1442_v13, %v634_v22  ;;  %v656_v27 = vmax.f32 %v648_v21, 0.0 }
  0xf1   : > { %v659_v26 = vmax.f32 %v651_v23, 0.0 }
  0xf2   : > { %v657_v28 = vmax.f32 %v649_v24, 0.0  ;;  %v1533_v29 = vpop.f32.mrb[4].mxu0 }
  0xf3   : > { %v665_v30 = vpack.c.bf16 %v659_v26, %v658_v25  ;;  %v639_v31 = vmul.f32 %v1533_v29, %v1441_v11  ;;  %v611_v32 = vpop.f32.mrb[5].mxu0 }
  0xf4   : > { %v637_v33 = vmul.f32 %v1441_v11, %v611_v32  ;;  %v1534_v34 = vpop.f32.mrb[6].mxu0  ;;  %v664_v35 = vpack.c.bf16 %v657_v28, %v656_v27 }
  0xf5   : > { %v654_v36 = vadd.f32 %v1442_v13, %v639_v31  ;;  %v640_v37 = vmul.f32 %v1534_v34, %v1441_v11  ;;  %v614_v38 = vpop.f32.mrb[7].mxu0 }
  0xf6   : > { %v652_v39 = vadd.f32 %v1442_v13, %v637_v33  ;;  %v638_v40 = vmul.f32 %v1441_v11, %v614_v38  ;;  %1539 = vmatprep.mubr.msk.bf16.mxu1 %vm684_vm1, %v664_v35 }
  0xf7   : > { %v662_v41 = vmax.f32 %v654_v36, 0.0  ;;  %v655_v42 = vadd.f32 %v1442_v13, %v640_v37  ;;  %1540 = vmatmul.mubr.msk.bf16.vlgmr.msra.gmra.mrb[0].mxu1 %vm684_vm1, %v665_v30 }
  0xf8   : > { %v660_v43 = vmax.f32 %v652_v39, 0.0  ;;  %v653_v44 = vadd.f32 %v1442_v13, %v638_v40  ;;  %1588 = vmatpush3.xpose.msk.msra.mxu1 %vm684_vm1, %v800_v10 }
  0xf9   : > { %v663_v45 = vmax.f32 %v655_v42, 0.0 }
  0xfa   : > { %v661_v46 = vmax.f32 %v653_v44, 0.0 }
  0xfb   : > { %v667_v47 = vpack.c.bf16 %v663_v45, %v662_v41 }
  0xfc   : > { %v666_v48 = vpack.c.bf16 %v661_v46, %v660_v43 }
  0xfe   : > { %1543 = vmatprep.mubr.msk.bf16.mxu1 %vm684_vm1, %v666_v48 }
  0xff   : > { %1544 = vmatmul.mubr.msk.bf16.gmra.mrb[4].mxu1 %vm684_vm1, %v667_v47 }
 0x1ca   : > { %v1541_v50 = vpop.f32.mrb[0].mxu1 }
 0x1cb   : > { %v771_v52 = vmul.f32 %v1541_v50, %v1449_v49  ;;  %v731_v53 = vpop.f32.mrb[1].mxu1 }
 0x1cc   : > { %v769_v54 = vmul.f32 %v1449_v49, %v731_v53  ;;  %v1542_v55 = vpop.f32.mrb[2].mxu1 }
 0x1cd   : > { %v786_v56 = vadd.f32 %v1450_v51, %v771_v52  ;;  %v772_v57 = vmul.f32 %v1542_v55, %v1449_v49  ;;  %v734_v58 = vpop.f32.mrb[3].mxu1 }
 0x1ce   : > { %v784_v59 = vadd.f32 %v1450_v51, %v769_v54  ;;  %v770_v60 = vmul.f32 %v1449_v49, %v734_v58 }
 0x1cf   : > { %v794_v61 = vmax.f32 %v786_v56, 0.0  ;;  %v787_v62 = vadd.f32 %v1450_v51, %v772_v57 }
 0x1d0   : > { %v792_v63 = vmax.f32 %v784_v59, 0.0  ;;  %v785_v0 = vadd.f32 %v1450_v51, %v770_v60 }
 0x1d1   : > { %v795_v1 = vmax.f32 %v787_v62, 0.0  ;;  %1552 = vmatprep.mubr.msk.f32.mxu1 %vm684_vm1, %v794_v61 }
 0x1d2   : > { %v793_v2 = vmax.f32 %v785_v0, 0.0  ;;  %v1545_v3 = vpop.f32.mrb[4].mxu1  ;;  %1549 = vmatprep.mubr.msk.f32.mxu0 %vm684_vm1, %v792_v63 }
 0x1d3   : > { %v775_v4 = vmul.f32 %v1545_v3, %v1449_v49  ;;  %v747_v5 = vpop.f32.mrb[5].mxu1  ;;  %1553 = vmatmul.mubr.msk.f32.vlgmr.msra.gmra.mrb[8].mxu1 %vm684_vm1, %v795_v1 }
 0x1d4   : > { %v773_v6 = vmul.f32 %v1449_v49, %v747_v5  ;;  %v1546_v7 = vpop.f32.mrb[6].mxu1  ;;  %1550 = vmatmul.mubr.msk.f32.vlgmr.msra.gmra.mrb[8].mxu0 %vm684_vm1, %v793_v2 }
 0x1d5   : > { %v750_v8 = vpop.f32.mrb[7].mxu1  ;;  %v776_v10 = vmul.f32 %v1546_v7, %v1449_v49  ;;  %v790_v12 = vadd.f32 %v1450_v51, %v775_v4 }
 0x1d6   : > { %v788_v9 = vadd.f32 %v1450_v51, %v773_v6  ;;  %v774_v11 = vmul.f32 %v1449_v49, %v750_v8 }
 0x1d7   : > { %v791_v15 = vadd.f32 %v1450_v51, %v776_v10  ;;  %v798_v17 = vmax.f32 %v790_v12, 0.0 }
 0x1d8   : > { %v796_v13 = vmax.f32 %v788_v9, 0.0  ;;  %v789_v14 = vadd.f32 %v1450_v51, %v774_v11 }
 0x1d9   : > { %v799_v18 = vmax.f32 %v791_v15, 0.0 }
 0x1da   : > { %v797_v16 = vmax.f32 %v789_v14, 0.0  ;;  %1555 = vmatprep.mubr.msk.f32.mxu1 %vm684_vm1, %v796_v13 }
 0x1dc   : > { %1556 = vmatmul.mubr.msk.f32.gmra.mrb[10].mxu1 %vm684_vm1, %v797_v16 }
 0x1dd   : > { %1558 = vmatprep.mubr.msk.f32.mxu1 %vm684_vm1, %v798_v17 }
 0x1e0   : > { %1559 = vmatmul.mubr.msk.f32.gmra.mrb[12].mxu1 %vm684_vm1, %v799_v18 }
 0x2a6   : > { %v1554_v19 = vpop.f32.mrb[8].mxu1 }
 0x2a7   : > { %v1551_v20 = vpop.f32.mrb[8].mxu0  ;;  %v905_v21 = vpop.f32.mrb[9].mxu1  ;;  %v937_v25 = vmul.f32 0.17677669, %v1554_v19  ;;  %v801_v19 = vld [vmem:[%s476_s28] sm:$0x7] }
 0x2a8   : > { %v936_v22 = vmul.f32 0.17677669, %v905_v21  ;;  %v895_v23 = vpop.f32.mrb[9].mxu0  ;;  %v935_v27 = vmul.f32 0.17677669, %v1551_v20  ;;  %1561 = vmatprep.subr.msk.mxu0 %vm1055_vm3, %v801_v19  ;;  %v1623_v20 = vld [vmem:[%s1911_s9] sm:$0xff]  }
 0x2a9   : > { %v934_v24 = vmul.f32 0.17677669, %v895_v23  ;;  %v952_v29 = vsel %vm942_vm2, %v937_v25, -inf  ;;  %1562 = vmatpush3.msk.msra.mxu0 %vm1055_vm3, %v801_v19  ;;  %1575 = vmatprep.subr.bf16.mxu1 %v1623_v20 }
 0x2aa   : > { %v949_v26 = vsel %vm942_vm2, %v936_v22, -inf  ;;  %v946_v31 = vsel %vm942_vm2, %v935_v27, -inf  ;;  %1576 = vmatpush3.bf16.msra.mxu1 %v1623_v20 }
 0x2ab   : > { %950 = vmax.xlane.f32.xlu1 %v949_v26  ;;  %v943_v28 = vsel %vm942_vm2, %v934_v24, -inf }
 0x2ac   : > { %944 = vmax.xlane.f32.xlu0 %v943_v28 }
 0x2af   : > { %953 = vmax.xlane.f32.xlu1 %v952_v29  ;;  %v1557_v30 = vpop.f32.mrb[10].mxu1 }
 0x2b0   : > { %v939_v32 = vmul.f32 0.17677669, %v1557_v30  ;;  %947 = vmax.xlane.f32.xlu0 %v946_v31  ;;  %v915_v33 = vpop.f32.mrb[11].mxu1 }
 0x2b1   : > { %v938_v34 = vmul.f32 0.17677669, %v915_v33 }
 0x2b2   : > { %v958_v35 = vsel %vm942_vm2, %v939_v32, -inf }
 0x2b3   : > { %959 = vmax.xlane.f32.xlu1 %v958_v35  ;;  %v1560_v36 = vpop.f32.mrb[12].mxu1  ;;  %v955_v37 = vsel %vm942_vm2, %v938_v34, -inf }
 0x2b4   : > { %v941_v38 = vmul.f32 0.17677669, %v1560_v36  ;;  %956 = vmax.xlane.f32.xlu0 %v955_v37  ;;  %v925_v39 = vpop.f32.mrb[13].mxu1 }
 0x2b5   : > { %v940_v40 = vmul.f32 0.17677669, %v925_v39 }
 0x2b6   : > { %v964_v41 = vsel %vm942_vm2, %v941_v38, -inf }
 0x2b7   : > { %965 = vmax.xlane.f32.xlu1 %v964_v41  ;;  %v961_v42 = vsel %vm942_vm2, %v940_v40, -inf }
 0x2b8   : > { %962 = vmax.xlane.f32.xlu0 %v961_v42 }
 0x338   : > { %v951_v43 = vpop.xlane.xlu1 %950 }
 0x339   : > { %v969_v44 = vsub.f32 %v936_v22, %v951_v43  ;;  %v945_v45 = vpop.xlane.xlu0 %944 }
 0x33a   : > { %v967_v46 = vsub.f32 %v934_v24, %v945_v45  ;;  %v1624_v45 = vld [vmem:[%s1911_s9 + $0x8] sm:$0xff]  }
 0x33b   : > { %v979_v47 = vmul.f32 1.442695, %v969_v44  ;;  %1577 = vmatprep.subr.bf16.mxu1 %v1624_v45 }
 0x33c   : > { %v975_v48 = vmul.f32 1.442695, %v967_v46  ;;  %v954_v49 = vpop.xlane.xlu1 %953  ;;  %1578 = vmatpush3.bf16.msra.mxu1 %v1624_v45 }
 0x33d   : > { %v970_v50 = vsub.f32 %v937_v25, %v954_v49  ;;  %v948_v51 = vpop.xlane.xlu0 %947 }
 0x33e   : > { %1625 = vpow2.f32 %v975_v48  ;;  %v968_v52 = vsub.f32 %v935_v27, %v948_v51 }
 0x33f   : > { %1627 = vpow2.f32 %v979_v47  ;;  %v981_v53 = vmul.f32 1.442695, %v970_v50 }
 0x340   : > { %v977_v54 = vmul.f32 1.442695, %v968_v52  ;;  %v960_v55 = vpop.xlane.xlu1 %959 }
 0x341   : > { %v972_v56 = vsub.f32 %v939_v32, %v960_v55  ;;  %v957_v57 = vpop.xlane.xlu0 %956 }
 0x342   : > { %1629 = vpow2.f32 %v977_v54  ;;  %v971_v58 = vsub.f32 %v938_v34, %v957_v57 }
 0x343   : > { %1631 = vpow2.f32 %v981_v53  ;;  %v985_v59 = vmul.f32 1.442695, %v972_v56 }
 0x344   : > { %v983_v60 = vmul.f32 1.442695, %v971_v58  ;;  %v966_v61 = vpop.xlane.xlu1 %965  ;;  %v1475_v58 = vld [vmem:[%s1912_s10] ss:$0 sm:$0xff] }
 0x345   : > { %v974_v62 = vsub.f32 %v941_v38, %v966_v61  ;;  %v963_v63 = vpop.xlane.xlu0 %962 }
 0x346   : > { %1633 = vpow2.f32 %v983_v60  ;;  %v973_v0 = vsub.f32 %v940_v40, %v963_v63  ;;  %v1476_v60 = vld [vmem:[%s1913_s11] ss:$0 sm:$0xff] }
 0x347   : > { %1635 = vpow2.f32 %v985_v59  ;;  %v989_v2 = vmul.f32 1.442695, %v974_v62 }
 0x348   : > { %v1626_v1 = vpop.eup %1625  ;;  %v987_v3 = vmul.f32 1.442695, %v973_v0 }
 0x349   : > { %v991_v4 = vsel %vm942_vm2, %v1626_v1, 0.0  ;;  %v1628_v5 = vpop.eup %1627 }
 0x34a   : > { %1637 = vpow2.f32 %v987_v3  ;;  %992 = vadd.xlane.f32.xlu0 %v991_v4  ;;  %v997_v8 = vsel %vm942_vm2, %v1628_v5, 0.0 }
 0x34b   : > { %1639 = vpow2.f32 %v989_v2 }
 0x34c   : > { %v1630_v6 = vpop.eup %1629 }
 0x34d   : > { %v994_v7 = vsel %vm942_vm2, %v1630_v6, 0.0  ;;  %v1632_v9 = vpop.eup %1631 }
 0x34e   : > { %995 = vadd.xlane.f32.xlu1 %v994_v7  ;;  %998 = vadd.xlane.f32.xlu0 %v997_v8  ;;  %v1000_v11 = vsel %vm942_vm2, %v1632_v9, 0.0 }
 0x350   : > { %v1634_v10 = vpop.eup %1633 }
 0x351   : > { %v1003_v12 = vsel %vm942_vm2, %v1634_v10, 0.0  ;;  %v1636_v13 = vpop.eup %1635 }
 0x352   : > { %1001 = vadd.xlane.f32.xlu1 %v1000_v11  ;;  %1004 = vadd.xlane.f32.xlu0 %v1003_v12  ;;  %v1006_v15 = vsel %vm942_vm2, %v1636_v13, 0.0 }
 0x354   : > { %v1638_v14 = vpop.eup %1637 }
 0x355   : > { %v1009_v16 = vsel %vm942_vm2, %v1638_v14, 0.0  ;;  %v1640_v17 = vpop.eup %1639 }
 0x356   : > { %1007 = vadd.xlane.f32.xlu1 %v1006_v15  ;;  %1010 = vadd.xlane.f32.xlu0 %v1009_v16  ;;  %v1012_v18 = vsel %vm942_vm2, %v1640_v17, 0.0 }
 0x35a   : > { %1013 = vadd.xlane.f32.xlu1 %v1012_v18 }
 0x3d7   : > { %v993_v21 = vpop.xlane.xlu0 %992 }
 0x3d8   : > { %1641 = vrcp.f32 %v993_v21 }
 0x3db   : > { %v996_v22 = vpop.xlane.xlu1 %995  ;;  %v999_v23 = vpop.xlane.xlu0 %998 }
 0x3dc   : > { %1643 = vrcp.f32 %v996_v22 }
 0x3dd   : > { %1645 = vrcp.f32 %v999_v23 }
 0x3df   : > { %v1002_v24 = vpop.xlane.xlu1 %1001  ;;  %v1005_v25 = vpop.xlane.xlu0 %1004 }
 0x3e0   : > { %1647 = vrcp.f32 %v1002_v24 }
 0x3e1   : > { %1649 = vrcp.f32 %v1005_v25 }
 0x3e2   : > { %v1642_v26 = vpop.eup %1641 }
 0x3e3   : > { %v1008_v27 = vpop.xlane.xlu1 %1007  ;;  %v1011_v28 = vpop.xlane.xlu0 %1010  ;;  %v1023_v29 = vmul.f32 %v1642_v26, %v1626_v1 }
 0x3e4   : > { %1651 = vrcp.f32 %v1008_v27 }
 0x3e5   : > { %1653 = vrcp.f32 %v1011_v28  ;;  %1563 = vmatprep.mubr.msk.f32.mxu0 %vm942_vm2, %v1023_v29 }
 0x3e6   : > { %v1644_v30 = vpop.eup %1643 }
 0x3e7   : > { %v1646_v31 = vpop.eup %1645  ;;  %v1024_v32 = vmul.f32 %v1644_v30, %v1630_v6  ;;  %v1014_v33 = vpop.xlane.xlu1 %1013 }
 0x3e8   : > { %1655 = vrcp.f32 %v1014_v33  ;;  %v1025_v34 = vmul.f32 %v1646_v31, %v1628_v5 }
 0x3e9   : > { %1564 = vmatmul.mubr.msk.f32.vlgmr.msra.gmra.mrb[10].mxu0 %vm942_vm2, %v1024_v32 }
 0x3ea   : > { %v1648_v35 = vpop.eup %1647  ;;  %1566 = vmatprep.mubr.msk.f32.mxu0 %vm942_vm2, %v1025_v34 }
 0x3eb   : > { %v1650_v36 = vpop.eup %1649  ;;  %v1026_v37 = vmul.f32 %v1648_v35, %v1632_v9 }
 0x3ec   : > { %v1027_v38 = vmul.f32 %v1650_v36, %v1634_v10 }
 0x3ed   : > { %1567 = vmatmul.mubr.msk.f32.gmra.mrb[12].mxu0 %vm942_vm2, %v1026_v37 }
 0x3ee   : > { %v1652_v39 = vpop.eup %1651  ;;  %1569 = vmatprep.mubr.msk.f32.mxu0 %vm942_vm2, %v1027_v38 }
 0x3ef   : > { %v1654_v40 = vpop.eup %1653  ;;  %v1028_v41 = vmul.f32 %v1652_v39, %v1636_v13 }
 0x3f0   : > { %v1029_v42 = vmul.f32 %v1654_v40, %v1638_v14 }
 0x3f1   : > { %1570 = vmatmul.mubr.msk.f32.gmra.mrb[14].mxu0 %vm942_vm2, %v1028_v41 }
 0x3f2   : > { %v1656_v43 = vpop.eup %1655  ;;  %1572 = vmatprep.mubr.msk.f32.mxu0 %vm942_vm2, %v1029_v42 }
 0x3f3   : > { %v1030_v44 = vmul.f32 %v1656_v43, %v1640_v17 }
 0x3f5   : > { %1573 = vmatmul.mubr.msk.f32.gmra.mrb[16].mxu0 %vm942_vm2, %v1030_v44 }
 0x4bc   : > { %v1565_v46 = vpop.f32.mrb[10].mxu0 }
 0x4bd   : > { %v1125_v47 = vpop.f32.mrb[11].mxu0 }
 0x4be   : > { %v1164_v48 = vpack.c.bf16 %v1565_v46, %v1125_v47 }
 0x4c0   : > { %v1568_v49 = vpop.f32.mrb[12].mxu0  ;;  %1579 = vmatprep.mubr.msk.bf16.mxu1 %vm684_vm1, %v1164_v48 }
 0x4c1   : > { %v1135_v50 = vpop.f32.mrb[13].mxu0 }
 0x4c2   : > { %v1165_v51 = vpack.c.bf16 %v1568_v49, %v1135_v50 }
 0x4c4   : > { %v1571_v52 = vpop.f32.mrb[14].mxu0  ;;  %1580 = vmatmul.mubr.msk.bf16.vlgmr.msra.gmra.mrb[16].mxu1 %vm684_vm1, %v1165_v51 }
 0x4c5   : > { %v1145_v53 = vpop.f32.mrb[15].mxu0 }
 0x4c6   : > { %v1166_v54 = vpack.c.bf16 %v1571_v52, %v1145_v53 }
 0x4c8   : > { %v1574_v55 = vpop.f32.mrb[16].mxu0  ;;  %1583 = vmatprep.mubr.msk.bf16.mxu1 %vm684_vm1, %v1166_v54 }
 0x4c9   : > { %v1155_v56 = vpop.f32.mrb[17].mxu0 }
 0x4ca   : > { %v1167_v57 = vpack.c.bf16 %v1574_v55, %v1155_v56 }
 0x4cc   : > { %1584 = vmatmul.mubr.msk.bf16.gmra.mrb[20].mxu1 %vm684_vm1, %v1167_v57 }
 0x597   : > { %v1581_v59 = vpop.f32.mrb[16].mxu1 }
 0x598   : > { %v1270_v61 = vmul.f32 %v1581_v59, %v1475_v58  ;;  %v1230_v62 = vpop.f32.mrb[17].mxu1 }
 0x599   : > { %v1268_v63 = vmul.f32 %v1475_v58, %v1230_v62  ;;  %v1582_v0 = vpop.f32.mrb[18].mxu1 }
 0x59a   : > { %v1285_v1 = vadd.f32 %v1476_v60, %v1270_v61  ;;  %v1271_v2 = vmul.f32 %v1582_v0, %v1475_v58  ;;  %v1233_v3 = vpop.f32.mrb[19].mxu1 }
 0x59b   : > { %v1283_v4 = vadd.f32 %v1476_v60, %v1268_v63  ;;  %v1269_v5 = vmul.f32 %v1475_v58, %v1233_v3 }
 0x59c   : > { %v1293_v6 = vmax.f32 %v1285_v1, 0.0  ;;  %v1286_v7 = vadd.f32 %v1476_v60, %v1271_v2 }
 0x59d   : > { %v1291_v8 = vmax.f32 %v1283_v4, 0.0  ;;  %v1284_v9 = vadd.f32 %v1476_v60, %v1269_v5 }
 0x59e   : > { %1301 = vst.msk [vmem:[%s1875_s25 + $0x10] sm:$0xff] %vm548_vm0, %v1293_v6  ;;  %v1294_v10 = vmax.f32 %v1286_v7, 0.0 }
 0x59f   : > { %1299 = vst.msk [vmem:[%s1875_s25] sm:$0xff] %vm548_vm0, %v1291_v8  ;;  %v1292_v11 = vmax.f32 %v1284_v9, 0.0  ;;  %v1585_v12 = vpop.f32.mrb[20].mxu1 }
 0x5a0   : > { %1302 = vst.msk [vmem:[%s1875_s25 + $0x18] sm:$0xff] %vm548_vm0, %v1294_v10  ;;  %v1274_v13 = vmul.f32 %v1585_v12, %v1475_v58  ;;  %v1246_v14 = vpop.f32.mrb[21].mxu1 }
 0x5a1   : > { %1300 = vst.msk [vmem:[%s1875_s25 + $0x8] sm:$0xff] %vm548_vm0, %v1292_v11  ;;  %v1272_v15 = vmul.f32 %v1475_v58, %v1246_v14  ;;  %v1586_v16 = vpop.f32.mrb[22].mxu1 }
 0x5a2   : > { %v1289_v17 = vadd.f32 %v1476_v60, %v1274_v13  ;;  %v1275_v18 = vmul.f32 %v1586_v16, %v1475_v58  ;;  %v1249_v19 = vpop.f32.mrb[23].mxu1 }
 0x5a3   : > { %v1287_v20 = vadd.f32 %v1476_v60, %v1272_v15  ;;  %v1273_v21 = vmul.f32 %v1475_v58, %v1249_v19 }
 0x5a4   : > { %v1297_v22 = vmax.f32 %v1289_v17, 0.0  ;;  %v1290_v23 = vadd.f32 %v1476_v60, %v1275_v18 }
 0x5a5   : > { %v1295_v24 = vmax.f32 %v1287_v20, 0.0  ;;  %v1288_v25 = vadd.f32 %v1476_v60, %v1273_v21 }
 0x5a6   : > { %1305 = vst.msk [vmem:[%s1875_s25 + $0x30] sm:$0xff] %vm548_vm0, %v1297_v22  ;;  %v1298_v26 = vmax.f32 %v1290_v23, 0.0 }
 0x5a7   : > { %1303 = vst.msk [vmem:[%s1875_s25 + $0x20] sm:$0xff] %vm548_vm0, %v1295_v24  ;;  %v1296_v27 = vmax.f32 %v1288_v25, 0.0 }
 0x5a8   : > { %1306 = vst.msk [vmem:[%s1875_s25 + $0x38] sm:$0xff] %vm548_vm0, %v1298_v26 }
 0x5a9   : > { %1304 = vst.msk [vmem:[%s1875_s25 + $0x28] sm:$0xff] %vm548_vm0, %v1296_v27 }
 0x5aa PF: > { %s22_s23 = sadd.s32 1, %s1679_s23   ;;  %s1915_s21 = smov %s1675_s22 }
 0x5ab   : > { %p19_p5 = scmp.ge.s32.totalorder %s22_s23, 4   ;;  %s1916_s22 = smov %s1918_s24 }
 0x5ad   :  { %21 = sbr.rel (!%p19_p5) target bundleno = 2 (0x2), region = 104 }

// kernel: hrnet_weeder_forward.24
= control target key start
LH: loop header
LB: loop body
LE: loop exit
PB: predicated region body
PF: predicated region fallthrough
CT: control target
= control target key end

     0   :  { %s980_s1 = inlined_call_operand.vmem [shape: bf16[128,128], index: 1, kind: input, shape index: {}]   ;;  %s981_s0 = inlined_call_operand.vmem [shape: bf16[128,128], index: 0, kind: input, shape index: {}]   ;;  %s982_s4 = inlined_call_operand.vmem [shape: bf16[128,128], index: 4, kind: input, shape index: {}]   ;;  %s983_s2 = inlined_call_operand.vmem [shape: f32[1,128], index: 2, kind: input, shape index: {}]   ;;  %s984_s3 = inlined_call_operand.vmem [shape: f32[1,128], index: 3, kind: input, shape index: {}]   ;;  %s985_s7 = inlined_call_operand.vmem [shape: f32[128,128], index: 7, kind: output, shape index: {0}]   ;;  %s986_s5 = inlined_call_operand.vmem [shape: f32[1,128], index: 5, kind: input, shape index: {}]   ;;  %s987_s6 = inlined_call_operand.vmem [shape: f32[1,128], index: 6, kind: input, shape index: {}]   ;;  %s988_s8 = inlined_call_operand.vmem [shape: f32[128,128], index: 8, kind: output, shape index: {1}]  }
   0x1   :  { %v695_v0 = vld [vmem:[%s980_s1] sm:$0xff]   ;;  %v696_v1 = vld [vmem:[%s980_s1 + $0x8] sm:$0xff]   ;;  %v697_v2 = vld [vmem:[%s980_s1 + $0x10] sm:$0xff]  }
   0x2   :  { %631 = vmatprep.subr.bf16.mxu0 %v695_v0  ;;  %v698_v3 = vld [vmem:[%s980_s1 + $0x18] sm:$0xff]   ;;  %v703_v4 = vld [vmem:[%s981_s0] sm:$0xff]   ;;  %v700_v6 = vld [vmem:[%s980_s1 + $0x28] sm:$0xff]  }
   0x3   :  { %632 = vmatpush3.bf16.msra.mxu0 %v695_v0  ;;  %647 = vmatprep.mubr.bf16.mxu0 %v703_v4  ;;  %v699_v5 = vld [vmem:[%s980_s1 + $0x20] sm:$0xff]   ;;  %v712_v8 = vld [vmem:[%s982_s4 + $0x8] sm:$0xff]   ;;  %v701_v9 = vld [vmem:[%s980_s1 + $0x30] sm:$0xff]  }
   0x4   :  { %633 = vmatprep.subr.bf16.mxu0 %v696_v1  ;;  %v711_v7 = vld [vmem:[%s982_s4] sm:$0xff]   ;;  %v713_v10 = vld [vmem:[%s982_s4 + $0x10] sm:$0xff]   ;;  %v702_v11 = vld [vmem:[%s980_s1 + $0x38] sm:$0xff]  }
   0x5   :  { %663 = vmatprep.subr.bf16.mxu1 %v711_v7  ;;  %v714_v12 = vld [vmem:[%s982_s4 + $0x18] sm:$0xff]   ;;  %v715_v13 = vld [vmem:[%s982_s4 + $0x20] sm:$0xff]   ;;  %v704_v14 = vld [vmem:[%s981_s0 + $0x8] sm:$0xff]  }
   0x6   :  { %664 = vmatpush3.bf16.msra.mxu1 %v711_v7  ;;  %v705_v15 = vld [vmem:[%s981_s0 + $0x10] sm:$0xff]   ;;  %v706_v16 = vld [vmem:[%s981_s0 + $0x18] sm:$0xff]   ;;  %v707_v17 = vld [vmem:[%s981_s0 + $0x20] sm:$0xff]  }
   0x7   :  { %634 = vmatpush3.bf16.msra.mxu0 %v696_v1  ;;  %665 = vmatprep.subr.bf16.mxu1 %v712_v8  ;;  %v708_v18 = vld [vmem:[%s981_s0 + $0x28] sm:$0xff]   ;;  %v709_v19 = vld [vmem:[%s981_s0 + $0x30] sm:$0xff]   ;;  %v710_v20 = vld [vmem:[%s981_s0 + $0x38] sm:$0xff]  }
   0x8   :  { %635 = vmatprep.subr.bf16.mxu0 %v697_v2  ;;  %v716_v21 = vld [vmem:[%s982_s4 + $0x28] sm:$0xff]   ;;  %v717_v22 = vld [vmem:[%s982_s4 + $0x30] sm:$0xff]   ;;  %v718_v23 = vld [vmem:[%s982_s4 + $0x38] sm:$0xff]  }
   0x9   :  { %v839_v24 = vld [vmem:[%s983_s2] ss:$0 sm:$0xff] }
   0xa   :  { %666 = vmatpush3.bf16.msra.mxu1 %v712_v8  ;;  %v844_v26 = vld [vmem:[%s984_s3] ss:$0 sm:$0xff] }
   0xb   :  { %636 = vmatpush3.bf16.msra.mxu0 %v697_v2  ;;  %667 = vmatprep.subr.bf16.mxu1 %v713_v10 }
   0xc   :  { %637 = vmatprep.subr.bf16.mxu0 %v698_v3 }
   0xe   :  { %668 = vmatpush3.bf16.msra.mxu1 %v713_v10 }
   0xf   :  { %638 = vmatpush3.bf16.msra.mxu0 %v698_v3  ;;  %669 = vmatprep.subr.bf16.mxu1 %v714_v12 }
  0x10   :  { %639 = vmatprep.subr.bf16.mxu0 %v699_v5 }
  0x12   :  { %670 = vmatpush3.bf16.msra.mxu1 %v714_v12 }
  0x13   :  { %640 = vmatpush3.bf16.msra.mxu0 %v699_v5  ;;  %671 = vmatprep.subr.bf16.mxu1 %v715_v13 }
  0x14   :  { %641 = vmatprep.subr.bf16.mxu0 %v700_v6 }
  0x16   :  { %672 = vmatpush3.bf16.msra.mxu1 %v715_v13 }
  0x17   :  { %642 = vmatpush3.bf16.msra.mxu0 %v700_v6  ;;  %673 = vmatprep.subr.bf16.mxu1 %v716_v21 }
  0x18   :  { %643 = vmatprep.subr.bf16.mxu0 %v701_v9 }
  0x1a   :  { %674 = vmatpush3.bf16.msra.mxu1 %v716_v21 }
  0x1b   :  { %644 = vmatpush3.bf16.msra.mxu0 %v701_v9  ;;  %675 = vmatprep.subr.bf16.mxu1 %v717_v22 }
  0x1c   :  { %645 = vmatprep.subr.bf16.mxu0 %v702_v11 }
  0x1e   :  { %676 = vmatpush3.bf16.msra.mxu1 %v717_v22 }
  0x1f   :  { %646 = vmatpush3.bf16.msra.mxu0 %v702_v11  ;;  %677 = vmatprep.subr.bf16.mxu1 %v718_v23 }
  0x22   :  { %648 = vmatmul.mubr.bf16.vlgmr.msra.gmra.mrb[0].mxu0 %v704_v14  ;;  %678 = vmatpush3.bf16.msra.mxu1 %v718_v23 }
  0x23   :  { %651 = vmatprep.mubr.bf16.mxu0 %v705_v15 }
  0x2a   :  { %652 = vmatmul.mubr.bf16.gmra.mrb[4].mxu0 %v706_v16 }
  0x2b   :  { %655 = vmatprep.mubr.bf16.mxu0 %v707_v17 }
  0x32   :  { %656 = vmatmul.mubr.bf16.gmra.mrb[8].mxu0 %v708_v18 }
  0x33   :  { %659 = vmatprep.mubr.bf16.mxu0 %v709_v19 }
  0x3a   :  { %660 = vmatmul.mubr.bf16.gmra.mrb[12].mxu0 %v710_v20 }
  0xf5   :  { %v649_v25 = vpop.f32.mrb[0].mxu0 }
  0xf6   :  { %v263_v27 = vmul.f32 %v649_v25, %v839_v24  ;;  %v191_v28 = vpop.f32.mrb[1].mxu0 }
  0xf7   :  { %v261_v29 = vmul.f32 %v839_v24, %v191_v28  ;;  %v650_v30 = vpop.f32.mrb[2].mxu0 }
  0xf8   :  { %v286_v31 = vadd.f32 %v844_v26, %v263_v27  ;;  %v264_v32 = vmul.f32 %v650_v30, %v839_v24  ;;  %v194_v33 = vpop.f32.mrb[3].mxu0 }
  0xf9   :  { %v262_v34 = vmul.f32 %v839_v24, %v194_v33  ;;  %v284_v35 = vadd.f32 %v844_v26, %v261_v29 }
  0xfa   :  { %v302_v36 = vmax.f32 %v286_v31, 0.0  ;;  %v287_v37 = vadd.f32 %v844_v26, %v264_v32 }
  0xfb   :  { %v285_v38 = vadd.f32 %v844_v26, %v262_v34  ;;  %v300_v39 = vmax.f32 %v284_v35, 0.0  ;;  %v597_v34 = vld [vmem:[%s986_s5] ss:$0 sm:$0xff] }
  0xfc   :  { %533 = vst [vmem:[%s985_s7 + $0x10] sm:$0xff] %v302_v36  ;;  %v303_v40 = vmax.f32 %v287_v37, 0.0 }
  0xfd   :  { %v653_v41 = vpop.f32.mrb[4].mxu0  ;;  %v301_v42 = vmax.f32 %v285_v38, 0.0  ;;  %531 = vst [vmem:[%s985_s7] sm:$0xff] %v300_v39 }
  0xfe   :  { %534 = vst [vmem:[%s985_s7 + $0x18] sm:$0xff] %v303_v40  ;;  %v267_v43 = vmul.f32 %v653_v41, %v839_v24  ;;  %v207_v44 = vpop.f32.mrb[5].mxu0  ;;  %v317_v45 = vpack.c.bf16 %v303_v40, %v302_v36  ;;  %v598_v36 = vld [vmem:[%s987_s6] ss:$0 sm:$0xff] }
  0xff   :  { %v265_v46 = vmul.f32 %v839_v24, %v207_v44  ;;  %v654_v47 = vpop.f32.mrb[6].mxu0  ;;  %v316_v48 = vpack.c.bf16 %v301_v42, %v300_v39  ;;  %532 = vst [vmem:[%s985_s7 + $0x8] sm:$0xff] %v301_v42 }
 0x100   :  { %v290_v49 = vadd.f32 %v844_v26, %v267_v43  ;;  %v268_v50 = vmul.f32 %v654_v47, %v839_v24  ;;  %v210_v51 = vpop.f32.mrb[7].mxu0 }
 0x101   :  { %v288_v52 = vadd.f32 %v844_v26, %v265_v46  ;;  %v266_v53 = vmul.f32 %v839_v24, %v210_v51  ;;  %679 = vmatprep.mubr.bf16.mxu1 %v316_v48 }
 0x102   :  { %v306_v54 = vmax.f32 %v290_v49, 0.0  ;;  %v291_v55 = vadd.f32 %v844_v26, %v268_v50  ;;  %680 = vmatmul.mubr.bf16.vlgmr.msra.gmra.mrb[0].mxu1 %v317_v45 }
 0x103   :  { %v304_v56 = vmax.f32 %v288_v52, 0.0  ;;  %v289_v57 = vadd.f32 %v844_v26, %v266_v53 }
 0x104   :  { %537 = vst [vmem:[%s985_s7 + $0x30] sm:$0xff] %v306_v54  ;;  %v307_v58 = vmax.f32 %v291_v55, 0.0 }
 0x105   :  { %535 = vst [vmem:[%s985_s7 + $0x20] sm:$0xff] %v304_v56  ;;  %v305_v59 = vmax.f32 %v289_v57, 0.0  ;;  %v657_v60 = vpop.f32.mrb[8].mxu0 }
 0x106   :  { %538 = vst [vmem:[%s985_s7 + $0x38] sm:$0xff] %v307_v58  ;;  %v271_v61 = vmul.f32 %v657_v60, %v839_v24  ;;  %v223_v62 = vpop.f32.mrb[9].mxu0  ;;  %v319_v63 = vpack.c.bf16 %v307_v58, %v306_v54 }
 0x107   :  { %536 = vst [vmem:[%s985_s7 + $0x28] sm:$0xff] %v305_v59  ;;  %v269_v0 = vmul.f32 %v839_v24, %v223_v62  ;;  %v658_v1 = vpop.f32.mrb[10].mxu0  ;;  %v318_v2 = vpack.c.bf16 %v305_v59, %v304_v56 }
 0x108   :  { %v294_v3 = vadd.f32 %v844_v26, %v271_v61  ;;  %v272_v4 = vmul.f32 %v658_v1, %v839_v24  ;;  %v226_v5 = vpop.f32.mrb[11].mxu0 }
 0x109   :  { %v292_v6 = vadd.f32 %v844_v26, %v269_v0  ;;  %v270_v7 = vmul.f32 %v839_v24, %v226_v5  ;;  %683 = vmatprep.mubr.bf16.mxu1 %v318_v2 }
 0x10a   :  { %v310_v8 = vmax.f32 %v294_v3, 0.0  ;;  %v295_v9 = vadd.f32 %v844_v26, %v272_v4  ;;  %684 = vmatmul.mubr.bf16.gmra.mrb[4].mxu1 %v319_v63 }
 0x10b   :  { %v308_v10 = vmax.f32 %v292_v6, 0.0  ;;  %v293_v11 = vadd.f32 %v844_v26, %v270_v7 }
 0x10c   :  { %541 = vst [vmem:[%s985_s7 + $0x50] sm:$0xff] %v310_v8  ;;  %v311_v12 = vmax.f32 %v295_v9, 0.0 }
 0x10d   :  { %539 = vst [vmem:[%s985_s7 + $0x40] sm:$0xff] %v308_v10  ;;  %v309_v13 = vmax.f32 %v293_v11, 0.0  ;;  %v661_v14 = vpop.f32.mrb[12].mxu0 }
 0x10e   :  { %542 = vst [vmem:[%s985_s7 + $0x58] sm:$0xff] %v311_v12  ;;  %v275_v15 = vmul.f32 %v661_v14, %v839_v24  ;;  %v239_v16 = vpop.f32.mrb[13].mxu0  ;;  %v321_v17 = vpack.c.bf16 %v311_v12, %v310_v8 }
 0x10f   :  { %540 = vst [vmem:[%s985_s7 + $0x48] sm:$0xff] %v309_v13  ;;  %v273_v18 = vmul.f32 %v839_v24, %v239_v16  ;;  %v662_v19 = vpop.f32.mrb[14].mxu0  ;;  %v320_v20 = vpack.c.bf16 %v309_v13, %v308_v10 }
 0x110   :  { %v298_v21 = vadd.f32 %v844_v26, %v275_v15  ;;  %v276_v22 = vmul.f32 %v662_v19, %v839_v24  ;;  %v242_v23 = vpop.f32.mrb[15].mxu0 }
 0x111   :  { %v296_v25 = vadd.f32 %v844_v26, %v273_v18  ;;  %v274_v27 = vmul.f32 %v839_v24, %v242_v23  ;;  %687 = vmatprep.mubr.bf16.mxu1 %v320_v20 }
 0x112   :  { %v314_v28 = vmax.f32 %v298_v21, 0.0  ;;  %v299_v29 = vadd.f32 %v844_v26, %v276_v22  ;;  %688 = vmatmul.mubr.bf16.gmra.mrb[8].mxu1 %v321_v17 }
 0x113   :  { %v312_v30 = vmax.f32 %v296_v25, 0.0  ;;  %v297_v31 = vadd.f32 %v844_v26, %v274_v27 }
 0x114   :  { %545 = vst [vmem:[%s985_s7 + $0x70] sm:$0xff] %v314_v28  ;;  %v315_v32 = vmax.f32 %v299_v29, 0.0 }
 0x115   :  { %543 = vst [vmem:[%s985_s7 + $0x60] sm:$0xff] %v312_v30  ;;  %v313_v33 = vmax.f32 %v297_v31, 0.0 }
 0x116   :  { %546 = vst [vmem:[%s985_s7 + $0x78] sm:$0xff] %v315_v32  ;;  %v323_v24 = vpack.c.bf16 %v315_v32, %v314_v28 }
 0x117   :  { %544 = vst [vmem:[%s985_s7 + $0x68] sm:$0xff] %v313_v33  ;;  %v322_v26 = vpack.c.bf16 %v313_v33, %v312_v30 }
 0x119   :  { %691 = vmatprep.mubr.bf16.mxu1 %v322_v26 }
 0x11a   :  { %692 = vmatmul.mubr.bf16.gmra.mrb[12].mxu1 %v323_v24 }
 0x1d5   :  { %v681_v35 = vpop.f32.mrb[0].mxu1 }
 0x1d6   :  { %v494_v37 = vmul.f32 %v681_v35, %v597_v34  ;;  %v422_v38 = vpop.f32.mrb[1].mxu1 }
 0x1d7   :  { %v492_v39 = vmul.f32 %v597_v34, %v422_v38  ;;  %v682_v40 = vpop.f32.mrb[2].mxu1 }
 0x1d8   :  { %v517_v41 = vadd.f32 %v598_v36, %v494_v37  ;;  %v495_v42 = vmul.f32 %v682_v40, %v597_v34  ;;  %v425_v43 = vpop.f32.mrb[3].mxu1 }
 0x1d9   :  { %v515_v44 = vadd.f32 %v598_v36, %v492_v39  ;;  %v493_v45 = vmul.f32 %v597_v34, %v425_v43 }
 0x1da   :  { %549 = vst [vmem:[%s988_s8 + $0x10] sm:$0xff] %v517_v41  ;;  %v518_v46 = vadd.f32 %v598_v36, %v495_v42 }
 0x1db   :  { %547 = vst [vmem:[%s988_s8] sm:$0xff] %v515_v44  ;;  %v516_v47 = vadd.f32 %v598_v36, %v493_v45 }
 0x1dc   :  { %550 = vst [vmem:[%s988_s8 + $0x18] sm:$0xff] %v518_v46 }
 0x1dd   :  { %548 = vst [vmem:[%s988_s8 + $0x8] sm:$0xff] %v516_v47  ;;  %v685_v48 = vpop.f32.mrb[4].mxu1 }
 0x1de   :  { %v498_v49 = vmul.f32 %v685_v48, %v597_v34  ;;  %v438_v50 = vpop.f32.mrb[5].mxu1 }
 0x1df   :  { %v496_v51 = vmul.f32 %v597_v34, %v438_v50  ;;  %v686_v52 = vpop.f32.mrb[6].mxu1 }
 0x1e0   :  { %v521_v53 = vadd.f32 %v598_v36, %v498_v49  ;;  %v499_v54 = vmul.f32 %v686_v52, %v597_v34  ;;  %v441_v55 = vpop.f32.mrb[7].mxu1 }
 0x1e1   :  { %v519_v56 = vadd.f32 %v598_v36, %v496_v51  ;;  %v497_v57 = vmul.f32 %v597_v34, %v441_v55 }
 0x1e2   :  { %553 = vst [vmem:[%s988_s8 + $0x30] sm:$0xff] %v521_v53  ;;  %v522_v58 = vadd.f32 %v598_v36, %v499_v54 }
 0x1e3   :  { %551 = vst [vmem:[%s988_s8 + $0x20] sm:$0xff] %v519_v56  ;;  %v520_v59 = vadd.f32 %v598_v36, %v497_v57 }
 0x1e4   :  { %554 = vst [vmem:[%s988_s8 + $0x38] sm:$0xff] %v522_v58 }
 0x1e5   :  { %552 = vst [vmem:[%s988_s8 + $0x28] sm:$0xff] %v520_v59  ;;  %v689_v60 = vpop.f32.mrb[8].mxu1 }
 0x1e6   :  { %v502_v61 = vmul.f32 %v689_v60, %v597_v34  ;;  %v454_v62 = vpop.f32.mrb[9].mxu1 }
 0x1e7   :  { %v500_v63 = vmul.f32 %v597_v34, %v454_v62  ;;  %v690_v0 = vpop.f32.mrb[10].mxu1 }
 0x1e8   :  { %v525_v1 = vadd.f32 %v598_v36, %v502_v61  ;;  %v503_v2 = vmul.f32 %v690_v0, %v597_v34  ;;  %v457_v3 = vpop.f32.mrb[11].mxu1 }
 0x1e9   :  { %v523_v4 = vadd.f32 %v598_v36, %v500_v63  ;;  %v501_v5 = vmul.f32 %v597_v34, %v457_v3 }
 0x1ea   :  { %557 = vst [vmem:[%s988_s8 + $0x50] sm:$0xff] %v525_v1  ;;  %v526_v6 = vadd.f32 %v598_v36, %v503_v2 }
 0x1eb   :  { %555 = vst [vmem:[%s988_s8 + $0x40] sm:$0xff] %v523_v4  ;;  %v524_v7 = vadd.f32 %v598_v36, %v501_v5 }
 0x1ec   :  { %558 = vst [vmem:[%s988_s8 + $0x58] sm:$0xff] %v526_v6 }
 0x1ed   :  { %556 = vst [vmem:[%s988_s8 + $0x48] sm:$0xff] %v524_v7  ;;  %v693_v8 = vpop.f32.mrb[12].mxu1 }
 0x1ee   :  { %v506_v9 = vmul.f32 %v693_v8, %v597_v34  ;;  %v470_v10 = vpop.f32.mrb[13].mxu1 }
 0x1ef   :  { %v504_v11 = vmul.f32 %v597_v34, %v470_v10  ;;  %v694_v12 = vpop.f32.mrb[14].mxu1 }
 0x1f0   :  { %v529_v13 = vadd.f32 %v598_v36, %v506_v9  ;;  %v507_v14 = vmul.f32 %v694_v12, %v597_v34  ;;  %v473_v15 = vpop.f32.mrb[15].mxu1 }
 0x1f1   :  { %v527_v16 = vadd.f32 %v598_v36, %v504_v11  ;;  %v505_v17 = vmul.f32 %v597_v34, %v473_v15 }
 0x1f2   :  { %561 = vst [vmem:[%s988_s8 + $0x70] sm:$0xff] %v529_v13  ;;  %v530_v18 = vadd.f32 %v598_v36, %v507_v14 }
 0x1f3   :  { %559 = vst [vmem:[%s988_s8 + $0x60] sm:$0xff] %v527_v16  ;;  %v528_v19 = vadd.f32 %v598_v36, %v505_v17 }
 0x1f4   :  { %562 = vst [vmem:[%s988_s8 + $0x78] sm:$0xff] %v530_v18 }
 0x1f5   :  { %560 = vst [vmem:[%s988_s8 + $0x68] sm:$0xff] %v528_v19 }

// kernel: hrnet_weeder_forward.28
= control target key start
LH: loop header
LB: loop body
LE: loop exit
PB: predicated region body
PF: predicated region fallthrough
CT: control target
= control target key end

     0   :  { %v120_v0 = vmov 0.0   ;;  %vm121_vm0 = vmmov 0   ;;  %vm35_vm1 = vcmask 261120   ;;  %s165_s1 = inlined_call_operand.vmem [shape: bf16[32,128], index: 1, kind: input, shape index: {}]   ;;  %s166_s0 = inlined_call_operand.vmem [shape: bf16[8,32], index: 0, kind: input, shape index: {}]   ;;  %s167_s2 = inlined_call_operand.vmem [shape: f32[1,128], index: 2, kind: input, shape index: {}]   ;;  %s168_s3 = inlined_call_operand.vmem [shape: f32[1,128], index: 3, kind: input, shape index: {}]   ;;  %s169_s4 = inlined_call_operand.vmem [shape: f32[8,128], index: 4, kind: output, shape index: {}]  }
   0x1   :  { %108 = vmatprep.subr.bf16.mxu0 %v120_v0  ;;  %v118_v1 = vld [vmem:[%s165_s1] sm:$0xff]   ;;  %112 = vmatprep.mubr.msk.bf16.mxu0 %vm121_vm0, %v120_v0  ;;  %v119_v2 = vld [vmem:[%s165_s1 + $0x8] sm:$0xff]  }
   0x2   :  { %109 = vmatpush3.bf16.msra.mxu0 %v118_v1  ;;  %v18_v3 = vld [vmem:[%s166_s0] sm:$0xf] }
   0x3   :  { %110 = vmatprep.subr.bf16.mxu0 %v120_v0  ;;  %v103_v4 = vld [vmem:[%s167_s2] ss:$0 sm:$0xff] }
   0x4   :  { %v104_v6 = vld [vmem:[%s168_s3] ss:$0 sm:$0xff] }
   0x6   :  { %111 = vmatpush3.bf16.msra.mxu0 %v119_v2 }
   0x9   :  { %113 = vmatmul.mubr.msk.bf16.vlgmr.msra.gmra.mrb[0].mxu0 %vm35_vm1, %v18_v3 }
  0xdc   :  { %v73_v5 = vpop.f32.mrb[0].mxu0 }
  0xdd   :  { %v86_v7 = vmul.f32 %v103_v4, %v73_v5  ;;  %v114_v8 = vpop.f32.mrb[1].mxu0 }
  0xde   :  { %v76_v9 = vpop.f32.mrb[2].mxu0 }
  0xdf   :  { %v94_v10 = vadd.f32 %v104_v6, %v86_v7  ;;  %v115_v11 = vpop.f32.mrb[3].mxu0 }
  0xe1   :  { %95 = vst [vmem:[%s169_s4] sm:$0xff] %v94_v10 }

// kernel: hrnet_weeder_forward.27
= control target key start
LH: loop header
LB: loop body
LE: loop exit
PB: predicated region body
PF: predicated region fallthrough
CT: control target
= control target key end

     0   :  { %s1215_s1 = inlined_call_operand.vmem [shape: bf16[1024,128], index: 1, kind: input, shape index: {}]   ;;  %s1216_s0 = inlined_call_operand.vmem [shape: bf16[8,1024], index: 0, kind: input, shape index: {}]   ;;  %s1217_s2 = inlined_call_operand.vmem [shape: f32[1,128], index: 2, kind: input, shape index: {}]   ;;  %s1218_s3 = inlined_call_operand.vmem [shape: f32[1,128], index: 3, kind: input, shape index: {}]   ;;  %s1219_s4 = inlined_call_operand.vmem [shape: f32[8,128], index: 4, kind: output, shape index: {}]  }
   0x1   :  { %v905_v0 = vld [vmem:[%s1215_s1 + $0x40] sm:$0xff]   ;;  %v909_v4 = vld [vmem:[%s1215_s1 + $0x48] sm:$0xff]   ;;  %v913_v8 = vld [vmem:[%s1215_s1 + $0x50] sm:$0xff]  }
   0x2   :  { %v906_v1 = vld [vmem:[%s1215_s1 + $0xc0] sm:$0xff]   ;;  %817 = vmatprep.subr.bf16.mxu0 %v905_v0  ;;  %v910_v5 = vld [vmem:[%s1215_s1 + $0xc8] sm:$0xff]   ;;  %v914_v9 = vld [vmem:[%s1215_s1 + $0xd0] sm:$0xff]  }
   0x3   :  { %v907_v2 = vld [vmem:[%s1215_s1] sm:$0xff]   ;;  %839 = vmatprep.subr.bf16.mxu1 %v906_v1  ;;  %v911_v6 = vld [vmem:[%s1215_s1 + $0x8] sm:$0xff]   ;;  %v915_v10 = vld [vmem:[%s1215_s1 + $0x10] sm:$0xff]  }
   0x4   :  { %v908_v3 = vld [vmem:[%s1215_s1 + $0x80] sm:$0xff]   ;;  %818 = vmatpush3.bf16.msra.mxu0 %v907_v2  ;;  %v912_v7 = vld [vmem:[%s1215_s1 + $0x88] sm:$0xff]   ;;  %v916_v11 = vld [vmem:[%s1215_s1 + $0x90] sm:$0xff]  }
   0x5   :  { %840 = vmatpush3.bf16.msra.mxu1 %v908_v3  ;;  %819 = vmatprep.subr.bf16.mxu0 %v909_v4  ;;  %v917_v12 = vld [vmem:[%s1215_s1 + $0x58] sm:$0xff]   ;;  %v921_v16 = vld [vmem:[%s1215_s1 + $0x60] sm:$0xff]   ;;  %v925_v20 = vld [vmem:[%s1215_s1 + $0x68] sm:$0xff]  }
   0x6   :  { %841 = vmatprep.subr.bf16.mxu1 %v910_v5  ;;  %v918_v13 = vld [vmem:[%s1215_s1 + $0xd8] sm:$0xff]   ;;  %v922_v17 = vld [vmem:[%s1215_s1 + $0xe0] sm:$0xff]   ;;  %v926_v21 = vld [vmem:[%s1215_s1 + $0xe8] sm:$0xff]  }
   0x7   :  { %v919_v14 = vld [vmem:[%s1215_s1 + $0x18] sm:$0xff]   ;;  %v923_v18 = vld [vmem:[%s1215_s1 + $0x20] sm:$0xff]   ;;  %v927_v22 = vld [vmem:[%s1215_s1 + $0x28] sm:$0xff]  }
   0x8   :  { %820 = vmatpush3.bf16.msra.mxu0 %v911_v6  ;;  %v920_v15 = vld [vmem:[%s1215_s1 + $0x98] sm:$0xff]   ;;  %v924_v19 = vld [vmem:[%s1215_s1 + $0xa0] sm:$0xff]   ;;  %v928_v23 = vld [vmem:[%s1215_s1 + $0xa8] sm:$0xff]  }
   0x9   :  { %842 = vmatpush3.bf16.msra.mxu1 %v912_v7  ;;  %821 = vmatprep.subr.bf16.mxu0 %v913_v8  ;;  %v929_v24 = vld [vmem:[%s1215_s1 + $0x70] sm:$0xff]   ;;  %v933_v28 = vld [vmem:[%s1215_s1 + $0x78] sm:$0xff]   ;;  %v18_v32 = vld [vmem:[%s1216_s0] sm:$0xff] }
   0xa   :  { %843 = vmatprep.subr.bf16.mxu1 %v914_v9  ;;  %v930_v25 = vld [vmem:[%s1215_s1 + $0xf0] sm:$0xff]   ;;  %v934_v29 = vld [vmem:[%s1215_s1 + $0xf8] sm:$0xff]   ;;  %v19_v33 = vld [vmem:[%s1216_s0 + $0x8] sm:$0xff]  ;;  %v743_v34 = vcombine.low %v18_v32, %v18_v32  ;;  %v744_v35 = vcombine.high %v18_v32, %v18_v32 }
   0xb   :  { %v931_v26 = vld [vmem:[%s1215_s1 + $0x30] sm:$0xff]   ;;  %v935_v30 = vld [vmem:[%s1215_s1 + $0x38] sm:$0xff]   ;;  %v745_v36 = vcombine.low %v19_v33, %v19_v33  ;;  %v746_v37 = vcombine.high %v19_v33, %v19_v33  ;;  %v941_v38 = vld [vmem:[%s1215_s1 + $0x140] sm:$0xff]  }
   0xc   :  { %822 = vmatpush3.bf16.msra.mxu0 %v915_v10  ;;  %v932_v27 = vld [vmem:[%s1215_s1 + $0xb0] sm:$0xff]   ;;  %v936_v31 = vld [vmem:[%s1215_s1 + $0xb8] sm:$0xff]   ;;  %v942_v39 = vld [vmem:[%s1215_s1 + $0x1c0] sm:$0xff]   ;;  %594 = vmatprep.mubr.bf16.mxu0 %v744_v35 }
   0xd   :  { %844 = vmatpush3.bf16.msra.mxu1 %v916_v11  ;;  %823 = vmatprep.subr.bf16.mxu0 %v917_v12  ;;  %v943_v40 = vld [vmem:[%s1215_s1 + $0x100] sm:$0xff]   ;;  %v945_v42 = vld [vmem:[%s1215_s1 + $0x148] sm:$0xff]   ;;  %v949_v46 = vld [vmem:[%s1215_s1 + $0x150] sm:$0xff]  }
   0xe   :  { %845 = vmatprep.subr.bf16.mxu1 %v918_v13  ;;  %634 = vmatprep.mubr.bf16.mxu1 %v746_v37  ;;  %v944_v41 = vld [vmem:[%s1215_s1 + $0x180] sm:$0xff]   ;;  %v946_v43 = vld [vmem:[%s1215_s1 + $0x1c8] sm:$0xff]   ;;  %v950_v47 = vld [vmem:[%s1215_s1 + $0x1d0] sm:$0xff]  }
   0xf   :  { %v947_v44 = vld [vmem:[%s1215_s1 + $0x108] sm:$0xff]   ;;  %v951_v48 = vld [vmem:[%s1215_s1 + $0x110] sm:$0xff]   ;;  %v953_v50 = vld [vmem:[%s1215_s1 + $0x158] sm:$0xff]  }
  0x10   :  { %824 = vmatpush3.bf16.msra.mxu0 %v919_v14  ;;  %v948_v45 = vld [vmem:[%s1215_s1 + $0x188] sm:$0xff]   ;;  %v952_v49 = vld [vmem:[%s1215_s1 + $0x190] sm:$0xff]   ;;  %v954_v51 = vld [vmem:[%s1215_s1 + $0x1d8] sm:$0xff]  }
  0x11   :  { %846 = vmatpush3.bf16.msra.mxu1 %v920_v15  ;;  %825 = vmatprep.subr.bf16.mxu0 %v921_v16  ;;  %v955_v52 = vld [vmem:[%s1215_s1 + $0x118] sm:$0xff]   ;;  %v957_v54 = vld [vmem:[%s1215_s1 + $0x160] sm:$0xff]   ;;  %v961_v58 = vld [vmem:[%s1215_s1 + $0x168] sm:$0xff]  }
  0x12   :  { %847 = vmatprep.subr.bf16.mxu1 %v922_v17  ;;  %v956_v53 = vld [vmem:[%s1215_s1 + $0x198] sm:$0xff]   ;;  %v958_v55 = vld [vmem:[%s1215_s1 + $0x1e0] sm:$0xff]   ;;  %v962_v59 = vld [vmem:[%s1215_s1 + $0x1e8] sm:$0xff]  }
  0x13   :  { %v959_v56 = vld [vmem:[%s1215_s1 + $0x120] sm:$0xff]   ;;  %v963_v60 = vld [vmem:[%s1215_s1 + $0x128] sm:$0xff]   ;;  %v965_v62 = vld [vmem:[%s1215_s1 + $0x170] sm:$0xff]  }
  0x14   :  { %826 = vmatpush3.bf16.msra.mxu0 %v923_v18  ;;  %v960_v57 = vld [vmem:[%s1215_s1 + $0x1a0] sm:$0xff]   ;;  %v964_v61 = vld [vmem:[%s1215_s1 + $0x1a8] sm:$0xff]   ;;  %v966_v63 = vld [vmem:[%s1215_s1 + $0x1f0] sm:$0xff]  }
  0x15   :  { %848 = vmatpush3.bf16.msra.mxu1 %v924_v19  ;;  %827 = vmatprep.subr.bf16.mxu0 %v925_v20  ;;  %v967_v0 = vld [vmem:[%s1215_s1 + $0x130] sm:$0xff]   ;;  %v969_v2 = vld [vmem:[%s1215_s1 + $0x178] sm:$0xff]  }
  0x16   :  { %849 = vmatprep.subr.bf16.mxu1 %v926_v21  ;;  %v968_v1 = vld [vmem:[%s1215_s1 + $0x1b0] sm:$0xff]   ;;  %v970_v3 = vld [vmem:[%s1215_s1 + $0x1f8] sm:$0xff]  }
  0x17   :  { %v971_v4 = vld [vmem:[%s1215_s1 + $0x138] sm:$0xff]   ;;  %v20_v6 = vld [vmem:[%s1216_s0 + $0x10] sm:$0xff] }
  0x18   :  { %828 = vmatpush3.bf16.msra.mxu0 %v927_v22  ;;  %v972_v5 = vld [vmem:[%s1215_s1 + $0x1b8] sm:$0xff]   ;;  %v747_v7 = vcombine.low %v20_v6, %v20_v6  ;;  %v748_v8 = vcombine.high %v20_v6, %v20_v6 }
  0x19   :  { %850 = vmatpush3.bf16.msra.mxu1 %v928_v23  ;;  %829 = vmatprep.subr.bf16.mxu0 %v929_v24  ;;  %v21_v9 = vld [vmem:[%s1216_s0 + $0x18] sm:$0xff] }
  0x1a   :  { %851 = vmatprep.subr.bf16.mxu1 %v930_v25  ;;  %v749_v10 = vcombine.low %v21_v9, %v21_v9  ;;  %v750_v11 = vcombine.high %v21_v9, %v21_v9 }
  0x1c   :  { %830 = vmatpush3.bf16.msra.mxu0 %v931_v26 }
  0x1d   :  { %852 = vmatpush3.bf16.msra.mxu1 %v932_v27  ;;  %831 = vmatprep.subr.bf16.mxu0 %v933_v28 }
  0x1e   :  { %853 = vmatprep.subr.bf16.mxu1 %v934_v29 }
  0x20   :  { %832 = vmatpush3.bf16.msra.mxu0 %v935_v30 }
  0x21   :  { %854 = vmatpush3.bf16.msra.mxu1 %v936_v31  ;;  %861 = vmatprep.subr.bf16.mxu0 %v941_v38 }
  0x22   :  { %883 = vmatprep.subr.bf16.mxu1 %v942_v39 }
  0x23   :  { %595 = vmatmul.mubr.bf16.vlgmr.msra.gmra.mrb[0].mxu0 %v743_v34  ;;  %v815_v34 = vld [vmem:[%s1217_s2] ss:$0 sm:$0xff] }
  0x24   :  { %635 = vmatmul.mubr.bf16.vlgmr.msra.gmra.mrb[0].mxu1 %v745_v36  ;;  %862 = vmatpush3.bf16.msra.mxu0 %v943_v40  ;;  %v816_v36 = vld [vmem:[%s1218_s3] ss:$0 sm:$0xff] }
  0x25   :  { %884 = vmatpush3.bf16.msra.mxu1 %v944_v41  ;;  %863 = vmatprep.subr.bf16.mxu0 %v945_v42 }
  0x26   :  { %885 = vmatprep.subr.bf16.mxu1 %v946_v43  ;;  %674 = vmatprep.mubr.bf16.mxu0 %v748_v8 }
  0x27   :  { %714 = vmatprep.mubr.bf16.mxu1 %v750_v11 }
  0x28   :  { %864 = vmatpush3.bf16.msra.mxu0 %v947_v44 }
  0x29   :  { %886 = vmatpush3.bf16.msra.mxu1 %v948_v45  ;;  %865 = vmatprep.subr.bf16.mxu0 %v949_v46 }
  0x2a   :  { %887 = vmatprep.subr.bf16.mxu1 %v950_v47 }
  0x2c   :  { %866 = vmatpush3.bf16.msra.mxu0 %v951_v48 }
  0x2d   :  { %888 = vmatpush3.bf16.msra.mxu1 %v952_v49  ;;  %867 = vmatprep.subr.bf16.mxu0 %v953_v50 }
  0x2e   :  { %889 = vmatprep.subr.bf16.mxu1 %v954_v51 }
  0x30   :  { %868 = vmatpush3.bf16.msra.mxu0 %v955_v52 }
  0x31   :  { %890 = vmatpush3.bf16.msra.mxu1 %v956_v53  ;;  %869 = vmatprep.subr.bf16.mxu0 %v957_v54 }
  0x32   :  { %891 = vmatprep.subr.bf16.mxu1 %v958_v55 }
  0x34   :  { %870 = vmatpush3.bf16.msra.mxu0 %v959_v56 }
  0x35   :  { %892 = vmatpush3.bf16.msra.mxu1 %v960_v57  ;;  %871 = vmatprep.subr.bf16.mxu0 %v961_v58 }
  0x36   :  { %893 = vmatprep.subr.bf16.mxu1 %v962_v59 }
  0x38   :  { %872 = vmatpush3.bf16.msra.mxu0 %v963_v60 }
  0x39   :  { %894 = vmatpush3.bf16.msra.mxu1 %v964_v61  ;;  %873 = vmatprep.subr.bf16.mxu0 %v965_v62 }
  0x3a   :  { %895 = vmatprep.subr.bf16.mxu1 %v966_v63 }
  0x3c   :  { %874 = vmatpush3.bf16.msra.mxu0 %v967_v0 }
  0x3d   :  { %896 = vmatpush3.bf16.msra.mxu1 %v968_v1  ;;  %875 = vmatprep.subr.bf16.mxu0 %v969_v2 }
  0x3e   :  { %897 = vmatprep.subr.bf16.mxu1 %v970_v3 }
  0x40   :  { %876 = vmatpush3.bf16.msra.mxu0 %v971_v4 }
  0x41   :  { %898 = vmatpush3.bf16.msra.mxu1 %v972_v5 }
  0x43   :  { %675 = vmatmul.mubr.bf16.vlgmr.msra.gmra.mrb[4].mxu0 %v747_v7 }
  0x44   :  { %715 = vmatmul.mubr.bf16.vlgmr.msra.gmra.mrb[4].mxu1 %v749_v10 }
  0xf6   :  { %v833_v12 = vpop.f32.mrb[0].mxu0 }
  0xf7   :  { %v855_v13 = vpop.f32.mrb[0].mxu1  ;;  %v834_v14 = vpop.f32.mrb[1].mxu0 }
  0xf8   :  { %v856_v15 = vpop.f32.mrb[1].mxu1  ;;  %v835_v16 = vadd.f32 %v834_v14, %v833_v12  ;;  %v836_v18 = vpop.f32.mrb[2].mxu0 }
  0xf9   :  { %v857_v17 = vadd.f32 %v856_v15, %v855_v13  ;;  %v858_v19 = vpop.f32.mrb[2].mxu1  ;;  %v837_v20 = vpop.f32.mrb[3].mxu0 }
  0xfa   :  { %v859_v21 = vpop.f32.mrb[3].mxu1 }
  0xfb   :  { %v637_v22 = vadd.f32 %v857_v17, %v835_v16 }
 0x116   :  { %v877_v23 = vpop.f32.mrb[4].mxu0 }
 0x117   :  { %v899_v24 = vpop.f32.mrb[4].mxu1  ;;  %v878_v25 = vpop.f32.mrb[5].mxu0 }
 0x118   :  { %v900_v26 = vpop.f32.mrb[5].mxu1  ;;  %v879_v27 = vadd.f32 %v878_v25, %v877_v23  ;;  %v880_v29 = vpop.f32.mrb[6].mxu0 }
 0x119   :  { %v901_v28 = vadd.f32 %v900_v26, %v899_v24  ;;  %v902_v30 = vpop.f32.mrb[6].mxu1  ;;  %v881_v31 = vpop.f32.mrb[7].mxu0 }
 0x11a   :  { %v903_v32 = vpop.f32.mrb[7].mxu1  ;;  %v677_v33 = vadd.f32 %v879_v27, %v637_v22 }
 0x11c   :  { %v717_v35 = vadd.f32 %v901_v28, %v677_v33 }
 0x11e   :  { %v729_v37 = vmul.f32 %v815_v34, %v717_v35 }
 0x120   :  { %v737_v38 = vadd.f32 %v816_v36, %v729_v37 }
 0x122   :  { %738 = vst [vmem:[%s1219_s4] sm:$0xff] %v737_v38 }

// kernel: hrnet_weeder_forward.29
= control target key start
LH: loop header
LB: loop body
LE: loop exit
PB: predicated region body
PF: predicated region fallthrough
CT: control target
= control target key end

     0   :  { %s885_s12 = smov 0   ;;  %s988_s0 = inlined_call_operand.vmem [shape: bf16[2,4,4,8], index: 0, kind: input, shape index: {}]   ;;  %s989_s1 = inlined_call_operand.vmem [shape: bf16[2,4,4,8], index: 1, kind: input, shape index: {}]   ;;  %s990_s2 = inlined_call_operand.vmem [shape: bf16[2,4,4,8], index: 2, kind: input, shape index: {}]   ;;  %s991_s3 = inlined_call_operand.vmem [shape: f32[2,4,4,8], index: 3, kind: output, shape index: {}]  }
   0x1 LB: > { %s735_s13 = sadd.s32 4294967295, %s861_s12   ;;  %p739_p0 = scmp.ge.s32.totalorder %s861_s12, 1  ;;  %s861_s12 = sphi %s885_s12, %s13_s12  }
   0x2   : > { %p157_p1 = scmp.lt.s32.totalorder %s861_s12, 3 }
   0x4   : > { %p158_p2 = pnand %p739_p0, %p157_p1 }
   0x5   : > { %p191_p3 = scmp.lt.s32.totalorder (!%p158_p2), %s735_s13, 1  ;;  %v863_v0 = vmov (!%p158_p2), 0.0   ;;  %vm864_vm0 = vmmov (!%p158_p2), 0   ;;  %vm224_vm1 = vcmask (!%p158_p2), 64512   ;;  %vm272_vm2 = vcmask (!%p158_p2), 27648  }
   0x6   : > { %161 = sbr.rel (%p158_p2) target bundleno = 1324 (0x52c), region = 32  ;;  %781 = vmatprep.subr.bf16.mxu0 (!%p158_p2), %v863_v0  ;;  %783 = vmatprep.mubr.msk.bf16.mxu0 (!%p158_p2), %vm864_vm0, %v863_v0  ;;  %vm289_vm3 = vcmask (!%p158_p2), 1041408   ;;  %vm285_vm4 = vcmask (!%p158_p2), 31744   ;;  %vm333_vm5 = vcmask (!%p158_p2), 60416  }
   0x7   : > { %787 = vmatprep.subr.bf16.mxu1 (!%p158_p2), %v863_v0  ;;  %789 = vmatprep.mubr.msk.bf16.mxu1 (!%p158_p2), %vm864_vm0, %v863_v0 }
   0xd   : > { %s993_s13 = smov (!%p191_p3, %s735_s13), 1 }
   0xe   : > { %s761_s14 = sshll.u32 %s993_s13, 3  ;;  %s764_s24 = sshll.u32 %s993_s13, 4 }
   0xf   : > { %s905_s17 = scalar_lea.vmem %s989_s1, %s761_s14  ;;  %s912_s20 = scalar_lea.vmem %s988_s0, %s761_s14 }
  0x10   : > { %v216_v1 = vld [vmem:[%s905_s17] sm:$0x3]  ;;  %s924_s23 = scalar_lea.vmem %s990_s2, %s761_s14  ;;  %v217_v19 = vld [vmem:[%s905_s17 + $0x2] sm:$0x3]  ;;  %v218_v23 = vld [vmem:[%s905_s17 + $0x4] sm:$0x3]  ;;  %s954_s27 = scalar_lea.vmem %s991_s3, %s764_s24 }
  0x11   : > { %v229_v2 = vsel %vm224_vm1, %v216_v1, 0  ;;  %v212_v3 = vld [vmem:[%s912_s20] sm:$0x3]  ;;  %v339_v22 = vsel %vm224_vm1, %v217_v19, 0  ;;  %v213_v24 = vld [vmem:[%s912_s20 + $0x2] sm:$0x3] }
  0x12   : > { %782 = vmatpush3.bf16.xpose.msra.mxu0 %v229_v2  ;;  %v220_v15 = vld [vmem:[%s924_s23] sm:$0x3]  ;;  %v446_v25 = vsel %vm224_vm1, %v218_v23, 0  ;;  %v219_v26 = vld [vmem:[%s905_s17 + $0x6] sm:$0x3] }
  0x13   : > { %799 = vmatprep.subr.bf16.mxu0 %v863_v0  ;;  %v291_v16 = vsel %vm289_vm3, %v220_v15, 0  ;;  %v214_v27 = vld [vmem:[%s912_s20 + $0x4] sm:$0x3]  ;;  %v553_v28 = vsel %vm224_vm1, %v219_v26, 0  ;;  %v215_v29 = vld [vmem:[%s912_s20 + $0x6] sm:$0x3] }
  0x14   : > { %788 = vmatpush3.bf16.msra.mxu1 %v291_v16  ;;  %v223_v15 = vld [vmem:[%s924_s23 + $0x6] sm:$0x3] }
  0x15   : > { %793 = vmatprep.subr.bf16.mxu1 %v863_v0 }
  0x19   : > { %784 = vmatmul.mubr.msk.bf16.vlgmr.msra.gmra.mrb[0].mxu0 %vm224_vm1, %v212_v3 }
  0x1a   : > { %801 = vmatprep.mubr.msk.bf16.mxu0 %vm864_vm0, %v863_v0 }
  0xec   : > { %v265_v4 = vpop.f32.mrb[0].mxu0 }
  0xed   : > { %v271_v5 = vmul.f32 0.35355338, %v265_v4  ;;  %v785_v6 = vpop.f32.mrb[1].mxu0  ;;  %v221_v4 = vld [vmem:[%s924_s23 + $0x2] sm:$0x3] }
  0xee   : > { %v268_v7 = vpop.f32.mrb[2].mxu0 }
  0xef   : > { %v786_v8 = vpop.f32.mrb[3].mxu0  ;;  %v273_v9 = vsel %vm272_vm2, %v271_v5, -inf }
  0xf0   : > { %274 = vmax.xlane.f32.xlu0 %v273_v9  ;;  %v222_v9 = vld [vmem:[%s924_s23 + $0x4] sm:$0x3] }
 0x17d   : > { %v275_v10 = vpop.xlane.xlu0 %274 }
 0x17e   : > { %v276_v11 = vsub.f32 %v271_v5, %v275_v10  ;;  %v398_v5 = vsel %vm289_vm3, %v221_v4, 0 }
 0x17f   : > { %800 = vmatpush3.bf16.msra.mxu0 %v398_v5 }
 0x180   : > { %v277_v12 = vmul.f32 1.442695, %v276_v11  ;;  %811 = vmatprep.subr.bf16.mxu0 %v863_v0 }
 0x182   : > { %839 = vpow2.f32 %v277_v12  ;;  %v505_v12 = vsel %vm289_vm3, %v222_v9, 0 }
 0x18c   : > { %v840_v13 = vpop.eup %839 }
 0x18d   : > { %v279_v14 = vsel %vm272_vm2, %v840_v13, 0.0 }
 0x18e   : > { %280 = vadd.xlane.f32.xlu0 %v279_v14 }
 0x21b   : > { %v281_v17 = vpop.xlane.xlu0 %280 }
 0x21c   : > { %841 = vrcp.f32 %v281_v17 }
 0x226   : > { %v842_v18 = vpop.eup %841 }
 0x227   : > { %v283_v20 = vmul.f32 %v842_v18, %v840_v13  ;;  %v612_v18 = vsel %vm289_vm3, %v223_v15, 0 }
 0x229   : > { %v284_v21 = vpack.c.bf16 %v283_v20, %v283_v20 }
 0x22b   : > { %790 = vmatmul.mubr.msk.bf16.vlgmr.msra.gmra.mrb[0].mxu1 %vm285_vm4, %v284_v21 }
 0x22c   : > { %794 = vmatpush3.bf16.xpose.msra.mxu1 %v339_v22  ;;  %795 = vmatprep.mubr.msk.bf16.mxu1 %vm864_vm0, %v863_v0 }
 0x22d   : > { %805 = vmatprep.subr.bf16.mxu1 %v863_v0 }
 0x233   : > { %796 = vmatmul.mubr.msk.bf16.vlgmr.msra.gmra.mrb[4].mxu1 %vm224_vm1, %v213_v24 }
 0x234   : > { %806 = vmatpush3.bf16.xpose.msra.mxu1 %v446_v25  ;;  %807 = vmatprep.mubr.msk.bf16.mxu1 %vm864_vm0, %v863_v0 }
 0x235   : > { %817 = vmatprep.subr.bf16.mxu1 %v863_v0 }
 0x23b   : > { %808 = vmatmul.mubr.msk.bf16.vlgmr.msra.gmra.mrb[8].mxu1 %vm224_vm1, %v214_v27 }
 0x23c   : > { %818 = vmatpush3.bf16.xpose.msra.mxu1 %v553_v28  ;;  %819 = vmatprep.mubr.msk.bf16.mxu1 %vm864_vm0, %v863_v0 }
 0x243   : > { %820 = vmatmul.mubr.msk.bf16.vlgmr.msra.gmra.mrb[12].mxu1 %vm224_vm1, %v215_v29 }
 0x2fe   : > { %v327_v30 = vpop.f32.mrb[0].mxu1 }
 0x2ff   : > { %334 = vst.msk [vmem:[%s954_s27] sm:$0xf] %vm333_vm5, %v327_v30  ;;  %v791_v31 = vpop.f32.mrb[1].mxu1 }
 0x300   : > { %v330_v32 = vpop.f32.mrb[2].mxu1 }
 0x301   : > { %v792_v33 = vpop.f32.mrb[3].mxu1 }
 0x306   : > { %v375_v34 = vpop.f32.mrb[4].mxu1 }
 0x307   : > { %v381_v35 = vmul.f32 0.35355338, %v375_v34  ;;  %v797_v36 = vpop.f32.mrb[5].mxu1 }
 0x308   : > { %v378_v37 = vpop.f32.mrb[6].mxu1 }
 0x309   : > { %v798_v38 = vpop.f32.mrb[7].mxu1  ;;  %v382_v39 = vsel %vm272_vm2, %v381_v35, -inf }
 0x30a   : > { %383 = vmax.xlane.f32.xlu1 %v382_v39 }
 0x30e   : > { %v482_v40 = vpop.f32.mrb[8].mxu1 }
 0x30f   : > { %v488_v41 = vmul.f32 0.35355338, %v482_v40  ;;  %v809_v42 = vpop.f32.mrb[9].mxu1 }
 0x310   : > { %v485_v43 = vpop.f32.mrb[10].mxu1 }
 0x311   : > { %v810_v44 = vpop.f32.mrb[11].mxu1  ;;  %v489_v45 = vsel %vm272_vm2, %v488_v41, -inf }
 0x312   : > { %490 = vmax.xlane.f32.xlu1 %v489_v45 }
 0x316   : > { %v589_v46 = vpop.f32.mrb[12].mxu1 }
 0x317   : > { %v595_v47 = vmul.f32 0.35355338, %v589_v46  ;;  %v821_v48 = vpop.f32.mrb[13].mxu1 }
 0x318   : > { %v592_v49 = vpop.f32.mrb[14].mxu1 }
 0x319   : > { %v822_v50 = vpop.f32.mrb[15].mxu1  ;;  %v596_v51 = vsel %vm272_vm2, %v595_v47, -inf }
 0x31a   : > { %597 = vmax.xlane.f32.xlu0 %v596_v51 }
 0x397   : > { %v384_v52 = vpop.xlane.xlu1 %383 }
 0x398   : > { %v385_v53 = vsub.f32 %v381_v35, %v384_v52 }
 0x39a   : > { %v386_v54 = vmul.f32 1.442695, %v385_v53 }
 0x39c   : > { %843 = vpow2.f32 %v386_v54 }
 0x39f   : > { %v491_v55 = vpop.xlane.xlu1 %490 }
 0x3a0   : > { %v492_v56 = vsub.f32 %v488_v41, %v491_v55 }
 0x3a2   : > { %v493_v57 = vmul.f32 1.442695, %v492_v56 }
 0x3a4   : > { %845 = vpow2.f32 %v493_v57 }
 0x3a6   : > { %v844_v58 = vpop.eup %843 }
 0x3a7   : > { %v598_v59 = vpop.xlane.xlu0 %597  ;;  %v388_v60 = vsel %vm272_vm2, %v844_v58, 0.0 }
 0x3a8   : > { %v599_v61 = vsub.f32 %v595_v47, %v598_v59  ;;  %389 = vadd.xlane.f32.xlu1 %v388_v60 }
 0x3aa   : > { %v600_v62 = vmul.f32 1.442695, %v599_v61 }
 0x3ac   : > { %847 = vpow2.f32 %v600_v62 }
 0x3ae   : > { %v846_v63 = vpop.eup %845 }
 0x3af   : > { %v495_v1 = vsel %vm272_vm2, %v846_v63, 0.0 }
 0x3b0   : > { %496 = vadd.xlane.f32.xlu0 %v495_v1 }
 0x3b6   : > { %v848_v2 = vpop.eup %847 }
 0x3b7   : > { %v602_v3 = vsel %vm272_vm2, %v848_v2, 0.0 }
 0x3b8   : > { %603 = vadd.xlane.f32.xlu1 %v602_v3 }
 0x435   : > { %v390_v6 = vpop.xlane.xlu1 %389 }
 0x436   : > { %849 = vrcp.f32 %v390_v6 }
 0x43d   : > { %v497_v7 = vpop.xlane.xlu0 %496 }
 0x43e   : > { %851 = vrcp.f32 %v497_v7 }
 0x440   : > { %v850_v8 = vpop.eup %849 }
 0x441   : > { %v392_v10 = vmul.f32 %v850_v8, %v844_v58 }
 0x443   : > { %v393_v11 = vpack.c.bf16 %v392_v10, %v392_v10 }
 0x445   : > { %802 = vmatmul.mubr.msk.bf16.vlgmr.msra.gmra.mrb[4].mxu0 %vm285_vm4, %v393_v11  ;;  %v604_v13 = vpop.xlane.xlu1 %603 }
 0x446   : > { %812 = vmatpush3.bf16.msra.mxu0 %v505_v12  ;;  %853 = vrcp.f32 %v604_v13  ;;  %813 = vmatprep.mubr.msk.bf16.mxu0 %vm864_vm0, %v863_v0 }
 0x447   : > { %823 = vmatprep.subr.bf16.mxu0 %v863_v0 }
 0x448   : > { %v852_v14 = vpop.eup %851 }
 0x449   : > { %v499_v16 = vmul.f32 %v852_v14, %v846_v63 }
 0x44b   : > { %v500_v17 = vpack.c.bf16 %v499_v16, %v499_v16 }
 0x44d   : > { %814 = vmatmul.mubr.msk.bf16.vlgmr.msra.gmra.mrb[8].mxu0 %vm285_vm4, %v500_v17 }
 0x44e   : > { %824 = vmatpush3.bf16.msra.mxu0 %v612_v18  ;;  %825 = vmatprep.mubr.msk.bf16.mxu0 %vm864_vm0, %v863_v0 }
 0x450   : > { %v854_v19 = vpop.eup %853 }
 0x451   : > { %v606_v20 = vmul.f32 %v854_v19, %v848_v2 }
 0x453   : > { %v607_v21 = vpack.c.bf16 %v606_v20, %v606_v20 }
 0x455   : > { %826 = vmatmul.mubr.msk.bf16.vlgmr.msra.gmra.mrb[12].mxu0 %vm285_vm4, %v607_v21 }
 0x518   : > { %v434_v22 = vpop.f32.mrb[4].mxu0 }
 0x519   : > { %752 = vst.msk [vmem:[%s954_s27 + $0x4] sm:$0xf] %vm333_vm5, %v434_v22  ;;  %v803_v23 = vpop.f32.mrb[5].mxu0 }
 0x51a   : > { %v437_v24 = vpop.f32.mrb[6].mxu0 }
 0x51b   : > { %v804_v25 = vpop.f32.mrb[7].mxu0 }
 0x520   : > { %v541_v26 = vpop.f32.mrb[8].mxu0 }
 0x521   : > { %755 = vst.msk [vmem:[%s954_s27 + $0x8] sm:$0xf] %vm333_vm5, %v541_v26  ;;  %v815_v27 = vpop.f32.mrb[9].mxu0 }
 0x522   : > { %v544_v28 = vpop.f32.mrb[10].mxu0 }
 0x523   : > { %v816_v29 = vpop.f32.mrb[11].mxu0 }
 0x528   : > { %v648_v30 = vpop.f32.mrb[12].mxu0 }
 0x529   : > { %758 = vst.msk [vmem:[%s954_s27 + $0xc] sm:$0xf] %vm333_vm5, %v648_v30  ;;  %v827_v0 = vpop.f32.mrb[13].mxu0 }
 0x52a   : > { %v651_v31 = vpop.f32.mrb[14].mxu0 }
 0x52b   : > { %v828_v32 = vpop.f32.mrb[15].mxu0 }
 0x52c PF: > { %s13_s12 = sadd.s32 1, %s861_s12  }
 0x52d   : > { %p10_p4 = scmp.ge.s32.totalorder %s13_s12, 4  }
 0x52f   :  { %12 = sbr.rel (!%p10_p4) target bundleno = 1 (0x1), region = 71 }

// kernel: hrnet_weeder_forward.30
= control target key start
LH: loop header
LB: loop body
LE: loop exit
PB: predicated region body
PF: predicated region fallthrough
CT: control target
= control target key end

     0   :  { %v302_v0 = vmov 0.0   ;;  %vm303_vm0 = vmmov 0   ;;  %vm47_vm1 = vcmask 261120   ;;  %s400_s1 = inlined_call_operand.vmem [shape: bf16[32,128], index: 1, kind: input, shape index: {}]   ;;  %s401_s4 = inlined_call_operand.vmem [shape: bf16[128,128], index: 4, kind: input, shape index: {}]   ;;  %s402_s0 = inlined_call_operand.vmem [shape: bf16[8,32], index: 0, kind: input, shape index: {}]   ;;  %s403_s2 = inlined_call_operand.vmem [shape: f32[1,128], index: 2, kind: input, shape index: {}]   ;;  %s404_s3 = inlined_call_operand.vmem [shape: f32[1,128], index: 3, kind: input, shape index: {}]   ;;  %s405_s7 = inlined_call_operand.vmem [shape: f32[8,128], index: 7, kind: input, shape index: {}]   ;;  %s406_s5 = inlined_call_operand.vmem [shape: f32[1,128], index: 5, kind: input, shape index: {}]   ;;  %s407_s6 = inlined_call_operand.vmem [shape: f32[1,128], index: 6, kind: input, shape index: {}]   ;;  %s408_s8 = inlined_call_operand.vmem [shape: f32[8,128], index: 8, kind: output, shape index: {}]  }
   0x1   :  { %262 = vmatprep.subr.bf16.mxu0 %v302_v0  ;;  %v292_v1 = vld [vmem:[%s400_s1] sm:$0xff]   ;;  %266 = vmatprep.mubr.msk.bf16.mxu0 %vm303_vm0, %v302_v0  ;;  %v293_v2 = vld [vmem:[%s400_s1 + $0x8] sm:$0xff]   ;;  %v296_v6 = vld [vmem:[%s401_s4 + $0x10] sm:$0xff]  }
   0x2   :  { %270 = vmatprep.subr.bf16.mxu1 %v302_v0  ;;  %286 = vmatprep.mubr.msk.bf16.mxu1 %vm303_vm0, %v302_v0  ;;  %v294_v3 = vld [vmem:[%s401_s4] sm:$0xff]   ;;  %v295_v4 = vld [vmem:[%s401_s4 + $0x8] sm:$0xff]   ;;  %v297_v7 = vld [vmem:[%s401_s4 + $0x18] sm:$0xff]  }
   0x3   :  { %263 = vmatpush3.bf16.msra.mxu0 %v292_v1  ;;  %271 = vmatpush3.bf16.msra.mxu1 %v294_v3  ;;  %v30_v5 = vld [vmem:[%s402_s0] sm:$0xf]  ;;  %v299_v9 = vld [vmem:[%s401_s4 + $0x28] sm:$0xff]   ;;  %v300_v10 = vld [vmem:[%s401_s4 + $0x30] sm:$0xff]  }
   0x4   :  { %264 = vmatprep.subr.bf16.mxu0 %v302_v0  ;;  %272 = vmatprep.subr.bf16.mxu1 %v302_v0  ;;  %v298_v8 = vld [vmem:[%s401_s4 + $0x20] sm:$0xff]   ;;  %v301_v11 = vld [vmem:[%s401_s4 + $0x38] sm:$0xff]  }
   0x5   :  { %v238_v12 = vld [vmem:[%s403_s2] ss:$0 sm:$0xff] }
   0x6   :  { %v239_v14 = vld [vmem:[%s404_s3] ss:$0 sm:$0xff] }
   0x7   :  { %265 = vmatpush3.bf16.msra.mxu0 %v293_v2  ;;  %273 = vmatpush3.bf16.msra.mxu1 %v295_v4  ;;  %v107_v18 = vld [vmem:[%s405_s7] sm:$0xff] }
   0x8   :  { %274 = vmatprep.subr.bf16.mxu1 %v302_v0  ;;  %v248_v23 = vld [vmem:[%s406_s5] ss:$0 sm:$0xff] }
   0x9   :  { %v249_v25 = vld [vmem:[%s407_s6] ss:$0 sm:$0xff] }
   0xa   :  { %267 = vmatmul.mubr.msk.bf16.vlgmr.msra.gmra.mrb[0].mxu0 %vm47_vm1, %v30_v5 }
   0xb   :  { %275 = vmatpush3.bf16.msra.mxu1 %v296_v6 }
   0xc   :  { %276 = vmatprep.subr.bf16.mxu1 %v302_v0 }
   0xf   :  { %277 = vmatpush3.bf16.msra.mxu1 %v297_v7 }
  0x10   :  { %278 = vmatprep.subr.bf16.mxu1 %v302_v0 }
  0x13   :  { %279 = vmatpush3.bf16.msra.mxu1 %v298_v8 }
  0x14   :  { %280 = vmatprep.subr.bf16.mxu1 %v302_v0 }
  0x17   :  { %281 = vmatpush3.bf16.msra.mxu1 %v299_v9 }
  0x18   :  { %282 = vmatprep.subr.bf16.mxu1 %v302_v0 }
  0x1b   :  { %283 = vmatpush3.bf16.msra.mxu1 %v300_v10 }
  0x1c   :  { %284 = vmatprep.subr.bf16.mxu1 %v302_v0 }
  0x1f   :  { %285 = vmatpush3.bf16.msra.mxu1 %v301_v11 }
  0xdd   :  { %v85_v13 = vpop.f32.mrb[0].mxu0 }
  0xde   :  { %v98_v15 = vmul.f32 %v238_v12, %v85_v13  ;;  %v268_v16 = vpop.f32.mrb[1].mxu0 }
  0xdf   :  { %v88_v17 = vpop.f32.mrb[2].mxu0 }
  0xe0   :  { %v106_v19 = vadd.f32 %v239_v14, %v98_v15  ;;  %v269_v20 = vpop.f32.mrb[3].mxu0 }
  0xe2   :  { %v108_v21 = vadd.f32 %v107_v18, %v106_v19 }
  0xe4   :  { %v109_v22 = vpack.c.bf16 %v108_v21, %v108_v21 }
  0xe6   :  { %287 = vmatmul.mubr.bf16.vlgmr.msra.gmra.mrb[0].mxu1 %v109_v22 }
 0x1b9   :  { %v208_v24 = vpop.f32.mrb[0].mxu1 }
 0x1ba   :  { %v221_v26 = vmul.f32 %v248_v23, %v208_v24  ;;  %v288_v27 = vpop.f32.mrb[1].mxu1 }
 0x1bb   :  { %v211_v28 = vpop.f32.mrb[2].mxu1 }
 0x1bc   :  { %v229_v29 = vadd.f32 %v249_v25, %v221_v26  ;;  %v289_v30 = vpop.f32.mrb[3].mxu1 }
 0x1be   :  { %230 = vst [vmem:[%s408_s8] sm:$0xff] %v229_v29 }

// kernel: hrnet_weeder_forward.31
= control target key start
LH: loop header
LB: loop body
LE: loop exit
PB: predicated region body
PF: predicated region fallthrough
CT: control target
= control target key end

     0   :  { %8 = vsyncpa [#allocation3], 0  ;;  %s748_s0 = inlined_call_operand.vmem [shape: f32[6,8,8], index: 0, kind: input, shape index: {}]   ;;  %s749_s1 = inlined_call_operand.vmem [shape: f32[32,8], index: 1, kind: input, shape index: {}]   ;;  %s750_s2 = inlined_call_operand.vmem [shape: f32[8,32], index: 2, kind: input, shape index: {}]   ;;  %s751_s3 = inlined_call_operand.hbm [shape: f32[6,32,32], index: 3, kind: output, shape index: {}]  }
   0x1   :  { %10 = vsyncpa [#allocation3 + $0x1], 0  ;;  %s622_s12 = smov 0   ;;  %s624_s13 = smov 0  }
   0x2   :  { %s626_s14 = smov 0   ;;  %s628_s15 = smov 0  }
   0x3 LB: > { %s643_s16 = sadd.s32 4294967295, %s597_s15   ;;  %s448_s17 = sadd.s32 4294967294, %s597_s15   ;;  %s597_s15 = sphi %s628_s15, %s757_s15   ;;  %s593_s14 = sphi %s626_s14, %s756_s14   ;;  %s589_s13 = sphi %s624_s13, %s755_s13   ;;  %s585_s12 = sphi %s622_s12, %s754_s12  }
   0x4   : > { %s647_s18 = sadd.s32 1, %s597_s15   ;;  %s91_s19 = sadd.s32 1, %s593_s14 }
   0x5   : > { %s88_s20 = ssub.s32 %s597_s15, %s647_s18  ;;  %p101_p0 = scmp.ne.s32.totalorder %s593_s14, %s589_s13 }
   0x6   : > { %p89_p1 = scmp.eq.s32.totalorder %s88_s20, 0  ;;  %p102_p2 = scmp.eq.s32.totalorder %s643_s16, 5 }
   0x7   : > { %p107_p3 = scmp.ne.s32.totalorder %s589_s13, %s585_s12  ;;  %p108_p4 = scmp.eq.s32.totalorder %s448_s17, 5 }
   0x8   : > { %s658_s21 = scalar_select %p89_p1, %s593_s14, %s91_s19  }
   0x9   : > { %p660_p5 = por %p102_p2, %p101_p0  ;;  %p664_p6 = por %p108_p4, %p107_p3 }
   0xa   : > { %p451_p7 = scmp.ge.s32.totalorder %s597_s15, 1  ;;  %p139_p8 = scmp.lt.s32.totalorder %s597_s15, 7 }
   0xc   : > { %p140_p9 = pnand %p451_p7, %p139_p8 }
   0xd   : > { %p162_p10 = scmp.lt.s32.totalorder (!%p140_p9), %s643_s16, 5  ;;  %v166_v0 = vld [vmem:[%s749_s1] sm:$0xff] (!%p140_p9)  ;;  %vm171_vm0 = vcmask (!%p140_p9), 64512   ;;  %v167_v2 = vld [vmem:[%s749_s1 + $0x8] sm:$0xff] (!%p140_p9)  ;;  %v168_v3 = vld [vmem:[%s749_s1 + $0x10] sm:$0xff] (!%p140_p9)  ;;  %s159_s17 = sand.u32 (!%p140_p9), 1, %s589_s13  }
   0xe   : > { %143 = sbr.rel (%p140_p9) target bundleno = 474 (0x1da), region = 32  ;;  %480 = vmatprep.mubr.msk.f32.mxu0 (!%p140_p9), %vm171_vm0, %v166_v0  ;;  %v169_v4 = vld [vmem:[%s749_s1 + $0x18] sm:$0xff] (!%p140_p9)  ;;  %v269_v5 = vld [vmem:[%s750_s2] sm:$0xff] (!%p140_p9)  ;;  %s452_s19 = sshll.u32 (!%p140_p9), %s159_s17, 5  ;;  %vm367_vm1 = vcmask (!%p140_p9), 261120  }
   0xf   : > { %486 = vmatprep.subr.mxu1 (!%p140_p9), %v269_v5  ;;  %s161_s20 = scalar_lea.vmem (!%p140_p9), [#allocation2], %s452_s19  ;;  %s467_s25 = sshll.u32 (!%p140_p9), %s643_s16, 9 }
  0x10   : > { %487 = vmatpush3.msra.mxu1 (!%p140_p9), %v269_v5  ;;  %s386_s24 = sshll.u32 (!%p140_p9), %s161_s20, 4  ;;  %s705_s28 = scalar_lea.hbm (!%p140_p9), %s751_s3, %s467_s25  ;;  %s700_s24 = int_to_ptr.vmem [resolvable:$true] %s386_s24 }
  0x11   : > { %s707_s29 = scalar_lea.sflag (!%p140_p9), [#allocation3], %s159_s17 }
  0x15   : > { %s163_s26 = scalar_select %p162_p10, %s643_s16, 5 }
  0x16   : > { %s535_s16 = scalar_lea.vmem %s700_s24, 512 }
  0x17   : > { %s453_s27 = sshll.u32 %s163_s26, 3  ;;  %p536_p11 = scmp.ne.s32.totalorder %s700_s24, %s535_s16 }
  0x18   : > { %s165_s30 = scalar_lea.vmem %s748_s0, %s453_s27 }
  0x19   : > { %v170_v1 = vld [vmem:[%s165_s30] sm:$0xff]  ;;  %p537_p12 = pnand %p536_p11, %p660_p5  ;;  %s599_s30 = smov [#allocation2]  }
  0x1a   : > { %478 = vmatprep.subr.mxu0 %v170_v1  ;;  %s539_s4 = sshll.u32 %s599_s30, 4  ;;  %s540_s4 = int_to_ptr.vmem [resolvable:$false] %s539_s4 }
  0x1b   : > { %479 = vmatpush3.msra.mxu0 %v170_v1  ;;  %p538_p13 = pneg %p537_p12  ;;  %s541_s5 = scalar_lea.vmem %s540_s4, 1024 }
  0x1c   : > { %481 = vmatmul.mubr.msk.f32.vlgmr.msra.gmra.mrb[0].mxu0 %vm171_vm0, %v167_v2  ;;  %p542_p0 = scmp.lt.s32.totalorder %s700_s24, %s540_s4  ;;  %p543_p1 = scmp.lt.s32.totalorder %s541_s5, %s535_s16 }
  0x1d   : > { %483 = vmatprep.mubr.msk.f32.mxu0 %vm171_vm0, %v168_v3 }
  0x1e   : > { %p544_p2 = por %p543_p1, %p542_p0 }
  0x20   : > { %484 = vmatmul.mubr.msk.f32.gmra.mrb[2].mxu0 %vm171_vm0, %v169_v4  ;;  %p545_p3 = pnand %p544_p2, %p538_p13 }
  0xef   : > { %v482_v6 = vpop.f32.mrb[0].mxu0 }
  0xf0   : > { %v250_v7 = vpop.f32.mrb[1].mxu0 }
  0xf1   : > { %488 = vmatprep.mubr.msk.f32.mxu1 %vm171_vm0, %v250_v7 }
  0xf2   : > { %489 = vmatmul.mubr.msk.f32.vlgmr.msra.gmra.mrb[0].mxu1 %vm171_vm0, %v482_v6 }
  0xf3   : > { %v485_v8 = vpop.f32.mrb[2].mxu0 }
  0xf4   : > { %v260_v9 = vpop.f32.mrb[3].mxu0 }
  0xf5   : > { %491 = vmatprep.mubr.msk.f32.mxu1 %vm171_vm0, %v260_v9 }
  0xf6   : > { %492 = vmatmul.mubr.msk.f32.gmra.mrb[2].mxu1 %vm171_vm0, %v485_v8 }
 0x1c5   : > { %v490_v10 = vpop.f32.mrb[0].mxu1 }
 0x1c6   : > { %369 = vst.msk [vmem:[%s161_s20 + $0x8] sm:$0xff] %vm367_vm1, %v490_v10  ;;  %v348_v11 = vpop.f32.mrb[1].mxu1 }
 0x1c7   : > { %368 = vst.msk [vmem:[%s161_s20] sm:$0xff] %vm367_vm1, %v348_v11 }
 0x1c9   : > { %v493_v12 = vpop.f32.mrb[2].mxu1 }
 0x1ca   : > { %371 = vst.msk [vmem:[%s161_s20 + $0x18] sm:$0xff] %vm367_vm1, %v493_v12  ;;  %v358_v13 = vpop.f32.mrb[3].mxu1 }
 0x1cb   : > { %370 = vst.msk [vmem:[%s161_s20 + $0x10] sm:$0xff] %vm367_vm1, %v358_v13 }
 0x1cc   : > { %548 = shalt.err (!%p545_p3)
}
 0x1cd   : > { %s549_s6 = scalar_lea.hbm %s705_s28, 512  ;;  %s553_s9 = scalar_lea.hbm %s751_s3, 3072 }
 0x1ce   : > { %p550_p4 = scmp.ne.s32.totalorder %s705_s28, %s549_s6  ;;  %p554_p9 = scmp.lt.u32.totalorder %s705_s28, %s751_s3 }
 0x1cf   : > { %p555_p10 = scmp.lt.u32.totalorder %s553_s9, %s549_s6  ;;  %p557_p12 = scmp.lt.u32.totalorder %s549_s6, %s705_s28 }
 0x1d0   : > { %p551_p7 = pnand %p550_p4, %p660_p5 }
 0x1d1   : > { %p556_p11 = por %p555_p10, %p554_p9 }
 0x1d2   : > { %p552_p8 = pneg %p551_p7 }
 0x1d3   : > { %p558_p13 = por %p557_p12, %p556_p11 }
 0x1d5   : > { %p559_p0 = pnand %p558_p13, %p552_p8 }
 0x1d7   : > { %562 = shalt.err (!%p559_p0)
}
 0x1d8   : > { %s600_s17 = smov 128   ;;  %s601_s19 = smov 8  }
 0x1d9   : > { %494 = dma.vmem_to_hbm [thread:$0]  (%p660_p5), %s700_s24, 512, %s705_s28, %s707_s29, %s600_s17, %s600_s17, %s601_s19  }
 0x1da PF: > { %p500_p1 = scmp.ge.s32.totalorder %s597_s15, 2  ;;  %s401_s20 = sand.u32 1, %s585_s12  }
 0x1db   : > { %s402_s25 = scalar_lea.sflag [#allocation3], %s401_s20 }
 0x1dc   : > { %p497_p2 = pnand %p500_p1, %p664_p6 }
 0x1de   : > { %580 = dma.done.wait (!%p497_p2), %s402_s25, 512  }
 0x1df   : > { %582 = vsyncadd (!%p497_p2), %s402_s25, 4294966784  ;;  %p13_p3 = scmp.ge.s32.totalorder %s647_s18, 8   ;;  %s754_s12 = smov %s589_s13 }
 0x1e0   : > { %s755_s13 = smov %s593_s14  ;;  %s756_s14 = smov %s658_s21 }
 0x1e1   : > { %s757_s15 = smov %s647_s18  ;;  %15 = sbr.rel (!%p13_p3) target bundleno = 3 (0x3), region = 67 }
 0x1e8   :  { %407 = vsyncpa [#allocation3], 1 }
 0x1e9   :  { %409 = vsyncpa [#allocation3 + $0x1], 1 }

</bundles_post_ra>
